<compile_context>
chip_gen: v7x
topology: tpu7x:2x2x1
jax: 0.10.0
libtpu: 0.0.40
codegen_flags: <defaults>
</compile_context>

<pallas_src>
import functools

import jax
import jax.numpy as jnp
import numpy as np
from jax.experimental import pallas as pl
from jax.experimental.pallas import tpu as pltpu


# --------------------------------------------------------------------------
# Host-side helpers (numpy, cached per (in,out) size): resize matrices.
# --------------------------------------------------------------------------
@functools.lru_cache(maxsize=None)
def _resize_matrix_np(in_size: int, out_size: int) -> np.ndarray:
    """(out_size, in_size) matrix R such that resized_signal = R @ signal.

    PyTorch bilinear, align_corners=False, antialias=False:
      src = max((dst + 0.5) * in/out - 0.5, 0), lo = floor(src),
      hi = min(lo + 1, in - 1), weights (1 - frac, frac).
    """
    scale = in_size / out_size
    dst = np.arange(out_size, dtype=np.float64)
    src = np.maximum((dst + 0.5) * scale - 0.5, 0.0)
    lo = np.floor(src)
    frac = (src - lo).astype(np.float32)
    lo = np.clip(lo.astype(np.int64), 0, in_size - 1)
    hi = np.clip(lo + 1, 0, in_size - 1)
    mat = np.zeros((out_size, in_size), dtype=np.float32)
    rows = np.arange(out_size)
    np.add.at(mat, (rows, lo), 1.0 - frac)
    np.add.at(mat, (rows, hi), frac)
    return mat


def _physical_vmem_bytes() -> int:
    try:
        return int(pltpu.get_tpu_info().vmem_capacity_bytes)
    except Exception:  # conservative fallback (v7x-sized VMEM)
        return 64 << 20


def _round_up(x: int, m: int) -> int:
    return ((x + m - 1) // m) * m


def _pick_channel_block(C, S1, S2, H, W, emb_itemsize, budget_bytes):
    """Largest useful channel block: prefer grid=2 (both v7x cores busy),
    then grid=1, under a VMEM budget and with a lane-dense/legal out block."""

    def legal(cb):
        if cb == C:
            return True  # block == full array dims, always legal
        return (cb * W) % 128 == 0 and (cb * S1) % 8 == 0

    def vmem_need(cb):
        in_buf = 2 * cb * S1 * S2 * emb_itemsize                   # dbl-buffered in
        out_buf = 2 * H * _round_up(cb * W, 128) * emb_itemsize    # dbl-buffered out
        t_scr = cb * S1 * _round_up(W, 128) * 4
        p_scr = S1 * _round_up(cb * W, 128) * 4
        mats = (H * _round_up(S1, 128) + S2 * _round_up(W, 128)) * 4
        return in_buf + out_buf + t_scr + p_scr + 2 * mats

    divisors = sorted((d for d in range(1, C + 1) if C % d == 0), reverse=True)
    preferred = []
    if C % 2 == 0:
        preferred.append(C // 2)   # grid = 2
    preferred.append(C)            # grid = 1
    preferred += [d for d in divisors if d not in preferred]
    for cb in preferred:
        if legal(cb) and vmem_need(cb) <= budget_bytes:
            return cb
    for cb in reversed(divisors):  # last resort: smallest legal block
        if legal(cb):
            return cb
    return C


# --------------------------------------------------------------------------
# Pallas kernel.
# --------------------------------------------------------------------------
def _make_resize_kernel(cb, S1, W):
    def kernel(ry_ref, rxT_ref, emb_ref, out_ref, t_scr, p_scr):
        # Stage 1 (W-resize): the (cb*S1, S2) embedding block streams through
        # the MXU as LHS; Rx^T is the single stationary RHS weight per step.
        t_scr[...] = jnp.dot(emb_ref[...], rxT_ref[...],
                             preferred_element_type=jnp.float32)

        # Lane-pack the per-channel (S1, W) panels into one (S1, cb*W) slab so
        # stage 2 is a single lane-dense matmul.  Static offsets => static
        # lane slices; per-iteration live data is one small panel (bounded
        # liveness, no fori_loop / dynamic lane offsets needed).
        for c in range(cb):
            p_scr[:, c * W:(c + 1) * W] = t_scr[c * S1:(c + 1) * S1, :]

        # Stage 2 (H-resize): ONE matmul, lane-dense (H, cb*W) output block.
        out_ref[...] = jnp.dot(
            ry_ref[...], p_scr[...], preferred_element_type=jnp.float32
        ).astype(out_ref.dtype)

    return kernel


# --------------------------------------------------------------------------
# Wrapper: mirrors PositionEmbedding.forward(image).
# --------------------------------------------------------------------------
def position_embedding_forward(embedding, image):
    """embedding: (hidden, S1, S2) buffer; image: (..., H, W) -> (hidden, H, W)."""
    C, S1, S2 = embedding.shape
    H, W = int(image.shape[-2]), int(image.shape[-1])

    ry = jnp.asarray(_resize_matrix_np(S1, H), dtype=jnp.float32)          # (H, S1)
    rxT = jnp.asarray(_resize_matrix_np(S2, W).T, dtype=embedding.dtype)   # (S2, W)

    phys_vmem = _physical_vmem_bytes()
    vmem_limit = int(phys_vmem * 0.75)
    cb = _pick_channel_block(C, S1, S2, H, W, embedding.dtype.itemsize,
                             int(vmem_limit * 0.8))
    grid = (C // cb,)

    # Free reshape (merges contiguous leading dims): embedding as 2D LHS slab.
    emb2d = embedding.reshape(C * S1, S2)

    out2d = pl.pallas_call(
        _make_resize_kernel(cb, S1, W),
        out_shape=jax.ShapeDtypeStruct((H, C * W), embedding.dtype),
        grid_spec=pltpu.PrefetchScalarGridSpec(
            num_scalar_prefetch=0,
            grid=grid,
            in_specs=[
                pl.BlockSpec((H, S1), lambda c: (0, 0)),        # Ry   (resident)
                pl.BlockSpec((S2, W), lambda c: (0, 0)),        # Rx^T (resident)
                pl.BlockSpec((cb * S1, S2), lambda c: (c, 0)),  # embedding block
            ],
            out_specs=pl.BlockSpec((H, cb * W), lambda c: (0, c)),
            scratch_shapes=[
                pltpu.VMEM((cb * S1, W), jnp.float32),   # stage-1 result
                pltpu.VMEM((S1, cb * W), jnp.float32),   # lane-packed panels
            ],
        ),
        compiler_params=pltpu.CompilerParams(
            dimension_semantics=("parallel",),
            vmem_limit_bytes=vmem_limit,
        ),
    )(ry, rxT, emb2d)

    # Undo the channel-along-lanes interleave: (H, C*W) -> (C, H, W); tiny.
    return out2d.reshape(H, C, W).transpose(1, 0, 2)


# --------------------------------------------------------------------------
# Pure-JAX reference (independent gather-based bilinear, same coord math).
# --------------------------------------------------------------------------
def _source_coords_jnp(in_size, out_size):
    scale = in_size / out_size
    dst = jnp.arange(out_size, dtype=jnp.float32)
    src = jnp.maximum((dst + 0.5) * scale - 0.5, 0.0)
    lo = jnp.floor(src)
    frac = src - lo
    lo = jnp.clip(lo.astype(jnp.int32), 0, in_size - 1)
    hi = jnp.clip(lo + 1, 0, in_size - 1)
    return lo, hi, frac


def position_embedding_ref(embedding, image):
    C, S1, S2 = embedding.shape
    H, W = int(image.shape[-2]), int(image.shape[-1])
    y0, y1, fy = _source_coords_jnp(S1, H)
    x0, x1, fx = _source_coords_jnp(S2, W)
    emb = embedding.astype(jnp.float32)
    rows0 = emb[:, y0, :]                                         # (C, H, S2)
    rows1 = emb[:, y1, :]
    rowmix = rows0 * (1.0 - fy)[None, :, None] + rows1 * fy[None, :, None]
    left = rowmix[:, :, x0]                                       # (C, H, W)
    right = rowmix[:, :, x1]
    return left * (1.0 - fx)[None, None, :] + right * fx[None, None, :]


# --------------------------------------------------------------------------
if __name__ == "__main__":
    hidden_size = 32
    max_position_ids = 128
    B, Cimg, Himg, Wimg = 2, 4, 16, 16

    key = jax.random.PRNGKey(0)
    k_emb, k_img = jax.random.split(key)
    # matches torch.rand initialization of the registered buffer
    embedding = jax.random.uniform(
        k_emb, (hidden_size, max_position_ids, max_position_ids), jnp.float32)
    image = jax.random.normal(k_img, (B, Cimg, Himg, Wimg), jnp.float32)

    out = jax.block_until_ready(position_embedding_forward(embedding, image))
    assert out.shape == (hidden_size, Himg, Wimg), out.shape
    ref = position_embedding_ref(embedding, image)
    assert jnp.allclose(out, ref, atol=1e-4, rtol=1e-4), float(
        jnp.max(jnp.abs(out - ref)))

    # Non-square spatial size to exercise generality of the tiling.
    image2 = jnp.zeros((B, Cimg, 32, 16), jnp.float32)
    out2 = jax.block_until_ready(position_embedding_forward(embedding, image2))
    ref2 = position_embedding_ref(embedding, image2)
    assert out2.shape == (hidden_size, 32, 16)
    assert jnp.allclose(out2, ref2, atol=1e-4, rtol=1e-4)

    # bf16-stored buffer: halves the HBM-read floor once memory-bound.
    emb_bf16 = embedding.astype(jnp.bfloat16)
    out_bf16 = jax.block_until_ready(position_embedding_forward(emb_bf16, image))
    assert out_bf16.shape == (hidden_size, Himg, Wimg)
    assert out_bf16.dtype == jnp.bfloat16
    assert jnp.allclose(out_bf16.astype(jnp.float32), ref, atol=5e-2, rtol=5e-2)

    print("KERNEL_OK")
</pallas_src>

<mosaic_0001>
module attributes {stable_mosaic.version = 11 : i64} {
  func.func @kernel(%arg0: i32, %arg1: memref<16x128xf32, #tpu.memory_space<vmem>>, %arg2: memref<128x16xf32, #tpu.memory_space<vmem>>, %arg3: memref<2048x128xf32, #tpu.memory_space<vmem>>, %arg4: memref<16x256xf32, #tpu.memory_space<vmem>>, %arg5: memref<2048x16xf32, #tpu.memory_space<vmem>>, %arg6: memref<128x256xf32, #tpu.memory_space<vmem>>) attributes {dimension_semantics = [#tpu.dimension_semantics<parallel>], iteration_bounds = array<i64: 2>, scalar_prefetch = 0 : i64, scratch_operands = 2 : i64, tpu.core_type = #tpu.core_type<tc>, window_params = [{pipeline_mode = #tpu.pipeline_mode<synchronous>, transform_indices = @transform_0, window_bounds = array<i64: 16, 128>}, {pipeline_mode = #tpu.pipeline_mode<synchronous>, transform_indices = @transform_1, window_bounds = array<i64: 128, 16>}, {transform_indices = @transform_2, window_bounds = array<i64: 2048, 128>}, {transform_indices = @transform_3, window_bounds = array<i64: 16, 256>}]} {
    %c0 = arith.constant 0 : index
    %c0_0 = arith.constant 0 : index
    %0 = vector.load %arg3[%c0, %c0_0] : memref<2048x128xf32, #tpu.memory_space<vmem>>, vector<2048x128xf32>
    %c0_1 = arith.constant 0 : index
    %c0_2 = arith.constant 0 : index
    %1 = vector.load %arg2[%c0_1, %c0_2] : memref<128x16xf32, #tpu.memory_space<vmem>>, vector<128x16xf32>
    %cst = arith.constant dense<0.000000e+00> : vector<2048x16xf32>
    %2 = tpu.matmul %0, %1, %cst {dimension_numbers = #tpu.dot_dimension_numbers<[1], [0], [0], [1], [0, 0, 1, 1], [], []>} : vector<2048x128xf32>, vector<128x16xf32>, vector<2048x16xf32> -> vector<2048x16xf32>
    %c0_3 = arith.constant 0 : index
    %c0_4 = arith.constant 0 : index
    %3 = vector.load %arg5[%c0_3, %c0_4] : memref<2048x16xf32, #tpu.memory_space<vmem>>, vector<2048x16xf32>
    tpu.vector_store %arg5[%c0_3, %c0_4], %2 {strides = array<i32>} : memref<2048x16xf32, #tpu.memory_space<vmem>>, vector<2048x16xf32>,
    %c0_5 = arith.constant 0 : index
    %c0_6 = arith.constant 0 : index
    %4 = vector.load %arg5[%c0_5, %c0_6] : memref<2048x16xf32, #tpu.memory_space<vmem>>, vector<128x16xf32>
    %c0_7 = arith.constant 0 : index
    %c0_8 = arith.constant 0 : index
    %5 = vector.load %arg6[%c0_7, %c0_8] : memref<128x256xf32, #tpu.memory_space<vmem>>, vector<128x16xf32>
    tpu.vector_store %arg6[%c0_7, %c0_8], %4 {strides = array<i32>} : memref<128x256xf32, #tpu.memory_space<vmem>>, vector<128x16xf32>,
    %c128 = arith.constant 128 : index
    %c0_9 = arith.constant 0 : index
    %6 = vector.load %arg5[%c128, %c0_9] : memref<2048x16xf32, #tpu.memory_space<vmem>>, vector<128x16xf32>
    %c0_10 = arith.constant 0 : index
    %c16 = arith.constant 16 : index
    %7 = vector.load %arg6[%c0_10, %c16] : memref<128x256xf32, #tpu.memory_space<vmem>>, vector<128x16xf32>
    tpu.vector_store %arg6[%c0_10, %c16], %6 {strides = array<i32>} : memref<128x256xf32, #tpu.memory_space<vmem>>, vector<128x16xf32>,
    %c256 = arith.constant 256 : index
    %c0_11 = arith.constant 0 : index
    %8 = vector.load %arg5[%c256, %c0_11] : memref<2048x16xf32, #tpu.memory_space<vmem>>, vector<128x16xf32>
    %c0_12 = arith.constant 0 : index
    %c32 = arith.constant 32 : index
    %9 = vector.load %arg6[%c0_12, %c32] : memref<128x256xf32, #tpu.memory_space<vmem>>, vector<128x16xf32>
    tpu.vector_store %arg6[%c0_12, %c32], %8 {strides = array<i32>} : memref<128x256xf32, #tpu.memory_space<vmem>>, vector<128x16xf32>,
    %c384 = arith.constant 384 : index
    %c0_13 = arith.constant 0 : index
    %10 = vector.load %arg5[%c384, %c0_13] : memref<2048x16xf32, #tpu.memory_space<vmem>>, vector<128x16xf32>
    %c0_14 = arith.constant 0 : index
    %c48 = arith.constant 48 : index
    %11 = vector.load %arg6[%c0_14, %c48] : memref<128x256xf32, #tpu.memory_space<vmem>>, vector<128x16xf32>
    tpu.vector_store %arg6[%c0_14, %c48], %10 {strides = array<i32>} : memref<128x256xf32, #tpu.memory_space<vmem>>, vector<128x16xf32>,
    %c512 = arith.constant 512 : index
    %c0_15 = arith.constant 0 : index
    %12 = vector.load %arg5[%c512, %c0_15] : memref<2048x16xf32, #tpu.memory_space<vmem>>, vector<128x16xf32>
    %c0_16 = arith.constant 0 : index
    %c64 = arith.constant 64 : index
    %13 = vector.load %arg6[%c0_16, %c64] : memref<128x256xf32, #tpu.memory_space<vmem>>, vector<128x16xf32>
    tpu.vector_store %arg6[%c0_16, %c64], %12 {strides = array<i32>} : memref<128x256xf32, #tpu.memory_space<vmem>>, vector<128x16xf32>,
    %c640 = arith.constant 640 : index
    %c0_17 = arith.constant 0 : index
    %14 = vector.load %arg5[%c640, %c0_17] : memref<2048x16xf32, #tpu.memory_space<vmem>>, vector<128x16xf32>
    %c0_18 = arith.constant 0 : index
    %c80 = arith.constant 80 : index
    %15 = vector.load %arg6[%c0_18, %c80] : memref<128x256xf32, #tpu.memory_space<vmem>>, vector<128x16xf32>
    tpu.vector_store %arg6[%c0_18, %c80], %14 {strides = array<i32>} : memref<128x256xf32, #tpu.memory_space<vmem>>, vector<128x16xf32>,
    %c768 = arith.constant 768 : index
    %c0_19 = arith.constant 0 : index
    %16 = vector.load %arg5[%c768, %c0_19] : memref<2048x16xf32, #tpu.memory_space<vmem>>, vector<128x16xf32>
    %c0_20 = arith.constant 0 : index
    %c96 = arith.constant 96 : index
    %17 = vector.load %arg6[%c0_20, %c96] : memref<128x256xf32, #tpu.memory_space<vmem>>, vector<128x16xf32>
    tpu.vector_store %arg6[%c0_20, %c96], %16 {strides = array<i32>} : memref<128x256xf32, #tpu.memory_space<vmem>>, vector<128x16xf32>,
    %c896 = arith.constant 896 : index
    %c0_21 = arith.constant 0 : index
    %18 = vector.load %arg5[%c896, %c0_21] : memref<2048x16xf32, #tpu.memory_space<vmem>>, vector<128x16xf32>
    %c0_22 = arith.constant 0 : index
    %c112 = arith.constant 112 : index
    %19 = vector.load %arg6[%c0_22, %c112] : memref<128x256xf32, #tpu.memory_space<vmem>>, vector<128x16xf32>
    tpu.vector_store %arg6[%c0_22, %c112], %18 {strides = array<i32>} : memref<128x256xf32, #tpu.memory_space<vmem>>, vector<128x16xf32>,
    %c1024 = arith.constant 1024 : index
    %c0_23 = arith.constant 0 : index
    %20 = vector.load %arg5[%c1024, %c0_23] : memref<2048x16xf32, #tpu.memory_space<vmem>>, vector<128x16xf32>
    %c0_24 = arith.constant 0 : index
    %c128_25 = arith.constant 128 : index
    %21 = vector.load %arg6[%c0_24, %c128_25] : memref<128x256xf32, #tpu.memory_space<vmem>>, vector<128x16xf32>
    tpu.vector_store %arg6[%c0_24, %c128_25], %20 {strides = array<i32>} : memref<128x256xf32, #tpu.memory_space<vmem>>, vector<128x16xf32>,
    %c1152 = arith.constant 1152 : index
    %c0_26 = arith.constant 0 : index
    %22 = vector.load %arg5[%c1152, %c0_26] : memref<2048x16xf32, #tpu.memory_space<vmem>>, vector<128x16xf32>
    %c0_27 = arith.constant 0 : index
    %c144 = arith.constant 144 : index
    %23 = vector.load %arg6[%c0_27, %c144] : memref<128x256xf32, #tpu.memory_space<vmem>>, vector<128x16xf32>
    tpu.vector_store %arg6[%c0_27, %c144], %22 {strides = array<i32>} : memref<128x256xf32, #tpu.memory_space<vmem>>, vector<128x16xf32>,
    %c1280 = arith.constant 1280 : index
    %c0_28 = arith.constant 0 : index
    %24 = vector.load %arg5[%c1280, %c0_28] : memref<2048x16xf32, #tpu.memory_space<vmem>>, vector<128x16xf32>
    %c0_29 = arith.constant 0 : index
    %c160 = arith.constant 160 : index
    %25 = vector.load %arg6[%c0_29, %c160] : memref<128x256xf32, #tpu.memory_space<vmem>>, vector<128x16xf32>
    tpu.vector_store %arg6[%c0_29, %c160], %24 {strides = array<i32>} : memref<128x256xf32, #tpu.memory_space<vmem>>, vector<128x16xf32>,
    %c1408 = arith.constant 1408 : index
    %c0_30 = arith.constant 0 : index
    %26 = vector.load %arg5[%c1408, %c0_30] : memref<2048x16xf32, #tpu.memory_space<vmem>>, vector<128x16xf32>
    %c0_31 = arith.constant 0 : index
    %c176 = arith.constant 176 : index
    %27 = vector.load %arg6[%c0_31, %c176] : memref<128x256xf32, #tpu.memory_space<vmem>>, vector<128x16xf32>
    tpu.vector_store %arg6[%c0_31, %c176], %26 {strides = array<i32>} : memref<128x256xf32, #tpu.memory_space<vmem>>, vector<128x16xf32>,
    %c1536 = arith.constant 1536 : index
    %c0_32 = arith.constant 0 : index
    %28 = vector.load %arg5[%c1536, %c0_32] : memref<2048x16xf32, #tpu.memory_space<vmem>>, vector<128x16xf32>
    %c0_33 = arith.constant 0 : index
    %c192 = arith.constant 192 : index
    %29 = vector.load %arg6[%c0_33, %c192] : memref<128x256xf32, #tpu.memory_space<vmem>>, vector<128x16xf32>
    tpu.vector_store %arg6[%c0_33, %c192], %28 {strides = array<i32>} : memref<128x256xf32, #tpu.memory_space<vmem>>, vector<128x16xf32>,
    %c1664 = arith.constant 1664 : index
    %c0_34 = arith.constant 0 : index
    %30 = vector.load %arg5[%c1664, %c0_34] : memref<2048x16xf32, #tpu.memory_space<vmem>>, vector<128x16xf32>
    %c0_35 = arith.constant 0 : index
    %c208 = arith.constant 208 : index
    %31 = vector.load %arg6[%c0_35, %c208] : memref<128x256xf32, #tpu.memory_space<vmem>>, vector<128x16xf32>
    tpu.vector_store %arg6[%c0_35, %c208], %30 {strides = array<i32>} : memref<128x256xf32, #tpu.memory_space<vmem>>, vector<128x16xf32>,
    %c1792 = arith.constant 1792 : index
    %c0_36 = arith.constant 0 : index
    %32 = vector.load %arg5[%c1792, %c0_36] : memref<2048x16xf32, #tpu.memory_space<vmem>>, vector<128x16xf32>
    %c0_37 = arith.constant 0 : index
    %c224 = arith.constant 224 : index
    %33 = vector.load %arg6[%c0_37, %c224] : memref<128x256xf32, #tpu.memory_space<vmem>>, vector<128x16xf32>
    tpu.vector_store %arg6[%c0_37, %c224], %32 {strides = array<i32>} : memref<128x256xf32, #tpu.memory_space<vmem>>, vector<128x16xf32>,
    %c1920 = arith.constant 1920 : index
    %c0_38 = arith.constant 0 : index
    %34 = vector.load %arg5[%c1920, %c0_38] : memref<2048x16xf32, #tpu.memory_space<vmem>>, vector<128x16xf32>
    %c0_39 = arith.constant 0 : index
    %c240 = arith.constant 240 : index
    %35 = vector.load %arg6[%c0_39, %c240] : memref<128x256xf32, #tpu.memory_space<vmem>>, vector<128x16xf32>
    tpu.vector_store %arg6[%c0_39, %c240], %34 {strides = array<i32>} : memref<128x256xf32, #tpu.memory_space<vmem>>, vector<128x16xf32>,
    %c0_40 = arith.constant 0 : index
    %c0_41 = arith.constant 0 : index
    %36 = vector.load %arg1[%c0_40, %c0_41] : memref<16x128xf32, #tpu.memory_space<vmem>>, vector<16x128xf32>
    %c0_42 = arith.constant 0 : index
    %c0_43 = arith.constant 0 : index
    %37 = vector.load %arg6[%c0_42, %c0_43] : memref<128x256xf32, #tpu.memory_space<vmem>>, vector<128x256xf32>
    %cst_44 = arith.constant dense<0.000000e+00> : vector<16x256xf32>
    %38 = tpu.matmul %36, %37, %cst_44 {dimension_numbers = #tpu.dot_dimension_numbers<[1], [0], [0], [1], [0, 0, 1, 1], [], []>} : vector<16x128xf32>, vector<128x256xf32>, vector<16x256xf32> -> vector<16x256xf32>
    %c0_45 = arith.constant 0 : index
    %c0_46 = arith.constant 0 : index
    %39 = vector.load %arg4[%c0_45, %c0_46] : memref<16x256xf32, #tpu.memory_space<vmem>>, vector<16x256xf32>
    tpu.vector_store %arg4[%c0_45, %c0_46], %38 {strides = array<i32>} : memref<16x256xf32, #tpu.memory_space<vmem>>, vector<16x256xf32>,
    return
  }
  func.func @transform_0(%arg0: i32) -> (i32, i32) {
    %c0_i32 = arith.constant 0 : i32
    %c0_i32_0 = arith.constant 0 : i32
    %c0_i32_1 = arith.constant 0 : i32
    return %c0_i32, %c0_i32_0 : i32, i32
  }
  func.func @transform_1(%arg0: i32) -> (i32, i32) {
    %c0_i32 = arith.constant 0 : i32
    %c0_i32_0 = arith.constant 0 : i32
    %c0_i32_1 = arith.constant 0 : i32
    return %c0_i32, %c0_i32_0 : i32, i32
  }
  func.func @transform_2(%arg0: i32) -> (i32, i32) {
    %c0_i32 = arith.constant 0 : i32
    %c0_i32_0 = arith.constant 0 : i32
    return %arg0, %c0_i32 : i32, i32
  }
  func.func @transform_3(%arg0: i32) -> (i32, i32) {
    %c0_i32 = arith.constant 0 : i32
    %c0_i32_0 = arith.constant 0 : i32
    return %c0_i32, %arg0 : i32, i32
  }
}

</mosaic_0001>

<bundles_post_ra>
// kernel: tpu_custom_call.1
= control target key start
LH: loop header
LB: loop body
LE: loop exit
PB: predicated region body
PF: predicated region fallthrough
CT: control target
= control target key end

     0   :  { %8 = vsyncpa [#allocation5], 0  ;;  %s5994_s0 = inlined_call_operand.hbm [shape: f32[16,128], index: 0, kind: input, shape index: {}]   ;;  %s5995_s1 = inlined_call_operand.vmem [shape: f32[128,16], index: 1, kind: input, shape index: {}]   ;;  %s5996_s2 = inlined_call_operand.hbm [shape: f32[4096,128], index: 2, kind: input, shape index: {}]   ;;  %s5997_s3 = inlined_call_operand.hbm [shape: f32[16,512], index: 3, kind: output, shape index: {}]  }
   0x1   :  { %9 = vsyncpa [#allocation8], 0 }
   0x2   :  { %11 = vsyncpa [#allocation8 + $0x1], 0 }
   0x3   :  { %12 = vsyncpa [#allocation6], 0 }
   0x4   :  { %14 = vsyncpa [#allocation6 + $0x1], 0  ;;  %s4729_s12 = smov 0   ;;  %s4731_s13 = smov 0  }
   0x5   :  { %s4733_s14 = smov 0   ;;  %s4735_s15 = smov 0  }
   0x6 LB: > { %s4750_s16 = sadd.s32 4294967295, %s4692_s15   ;;  %s3709_s17 = sadd.s32 4294967294, %s4692_s15   ;;  %s4692_s15 = sphi %s4735_s15, %s6017_s15   ;;  %s4688_s14 = sphi %s4733_s14, %s6016_s14   ;;  %s4684_s13 = sphi %s4731_s13, %s6015_s13   ;;  %s4680_s12 = sphi %s4729_s12, %s6014_s12  }
   0x7   : > { %p82_p0 = scmp.ne.s32.totalorder %s4684_s13, %s4680_s12  ;;  %p5998_p1 = scmp.eq.s32.totalorder %s4750_s16, 0 }
   0x8   : > { %p112_p3 = scmp.eq.s32.totalorder %s3709_s17, 1  ;;  %p3710_p5 = scmp.ge.s32.totalorder %s4692_s15, 1 }
   0x9   : > { %p4759_p4 = por %p5998_p1, %p82_p0  ;;  %p119_p7 = scmp.lt.s32.totalorder %s4692_s15, 3 }
   0xa   : > { %p4764_p6 = por %p112_p3, %p82_p0  ;;  %s4694_s21 = smov [#allocation4]  }
   0xb   : > { %s6001_s18 = scalar_select %p4759_p4, 1, 0 }
   0xc   : > { %s6002_s19 = scalar_select %p4764_p6, 1, 0 }
   0xd   : > { %p4769_p8 = pnand %p3710_p5, %p119_p7  ;;  %s131_s22 = sshll.u32 %s4694_s21, 4  ;;  %s4773_s22 = int_to_ptr.vmem [resolvable:$true] %s131_s22 }
   0xe   : > { %s4785_s24 = sadd.s32 1, %s4692_s15   ;;  %s69_s25 = sadd.s32 1, %s4688_s14 }
   0xf   : > { %s6003_s20 = scalar_select %p4769_p8, 1, 0 }
  0x10   : > { %p4503_p9 = pneg %p4769_p8  ;;  %s66_s26 = ssub.s32 %s4692_s15, %s4785_s24 }
  0x11   : > { %s4564_s29 = scalar_lea.hbm %s5994_s0, 256 }
  0x12   : > { %p4780_p11 = pnand %p4503_p9, %p5998_p1  ;;  %p4565_p12 = scmp.ne.s32.totalorder %s5994_s0, %s4564_s29 }
  0x13   : > { %p4571_p5 = scmp.lt.u32.totalorder %s4564_s29, %s5994_s0 }
  0x14   : > { %p4566_p13 = pneg %p4780_p11 }
  0x16   : > { %p4567_p0 = pnand %p4566_p13, %p4565_p12 }
  0x18   : > { %p4568_p3 = pneg %p4567_p0 }
  0x1a   : > { %p4573_p7 = pnand %p4571_p5, %p4568_p3 }
  0x1c   : > { %4576 = shalt.err (!%p4573_p7)
}
  0x1d   : > { %s4577_s7 = scalar_lea.vmem %s4773_s22, 256  ;;  %p4585_p2 = scmp.lt.s32.totalorder %s4773_s22, %s4773_s22 }
  0x1e   : > { %p4578_p9 = scmp.ne.s32.totalorder %s4773_s22, %s4577_s7  ;;  %p4586_p6 = scmp.lt.s32.totalorder %s4577_s7, %s4577_s7 }
  0x20   : > { %p4580_p10 = pnand %p4578_p9, %p4566_p13  ;;  %p4587_p4 = por %p4586_p6, %p4585_p2 }
  0x22   : > { %p4581_p1 = pneg %p4580_p10 }
  0x24   : > { %p4588_p8 = pnand %p4587_p4, %p4581_p1 }
  0x26   : > { %4591 = shalt.err (!%p4588_p8)
}
  0x27   : > { %s4695_s8 = smov 128   ;;  %s4696_s9 = smov 8  }
  0x28   : > { %4506 = dma.hbm_to_vmem [thread:$0]  (!%p4780_p11), %s5994_s0, 256, %s4773_s22, [#allocation5], %s4695_s8, %s4695_s8, %s4696_s9  }
  0x29   : > { %p67_p1 = scmp.eq.s32.totalorder %s66_s26, 0  ;;  %p76_p2 = scmp.ne.s32.totalorder %s4688_s14, %s4684_s13 }
  0x2a   : > { %p77_p4 = scmp.eq.s32.totalorder %s4692_s15, 0  ;;  %p4516_p6 = scmp.lt.s32.totalorder %s4692_s15, 2 }
  0x2b   : > { %s4819_s17 = scalar_select %p67_p1, %s4688_s14, %s69_s25  }
  0x2c   : > { %p78_p8 = por %p77_p4, %p76_p2  ;;  %p6005_p10 = scmp.eq.s32.totalorder %s4750_s16, 1 }
  0x2d   : > { %s148_s23 = sand.u32 1, %s4688_s14   ;;  %s3725_s27 = sshll.u32 %s4692_s15, 15 }
  0x2e   : > { %p4823_p12 = por %p6005_p10, %p76_p2  ;;  %s3713_s28 = sshll.u32 %s148_s23, 11 }
  0x2f   : > { %s4832_s4 = scalar_lea.hbm %s5996_s2, %s3725_s27  ;;  %s152_s22 = scalar_lea.vmem [#allocation7], %s3713_s28 }
  0x30   : > { %s159_s25 = sshll.u32 %s152_s22, 4  ;;  %p4834_p11 = pnand %p4516_p6, %p78_p8  ;;  %s4838_s25 = int_to_ptr.vmem [resolvable:$true] %s159_s25 }
  0x31   : > { %s4840_s5 = scalar_lea.sflag [#allocation8], %s148_s23  ;;  %s4592_s6 = scalar_lea.hbm %s4832_s4, 32768 }
  0x32   : > { %p4593_p13 = scmp.ne.s32.totalorder %s4832_s4, %s4592_s6  ;;  %p4594_p0 = pneg %p4834_p11 }
  0x33   : > { %s4597_s11 = scalar_lea.hbm %s5996_s2, 65536  ;;  %p4598_p7 = scmp.lt.u32.totalorder %s4832_s4, %s5996_s2 }
  0x34   : > { %p4595_p3 = pnand %p4594_p0, %p4593_p13  ;;  %p4599_p9 = scmp.lt.u32.totalorder %s4597_s11, %s4592_s6 }
  0x35   : > { %p4601_p2 = scmp.lt.u32.totalorder %s4592_s6, %s4832_s4 }
  0x36   : > { %p4596_p5 = pneg %p4595_p3  ;;  %p4600_p1 = por %p4599_p9, %p4598_p7 }
  0x38   : > { %p4602_p4 = por %p4601_p2, %p4600_p1 }
  0x3a   : > { %p4603_p6 = pnand %p4602_p4, %p4596_p5 }
  0x3c   : > { %4606 = shalt.err (!%p4603_p6)
}
  0x3d   : > { %s4607_s23 = scalar_lea.vmem %s4838_s25, 32768  ;;  %s4697_s29 = smov [#allocation7]  }
  0x3e   : > { %p4608_p8 = scmp.ne.s32.totalorder %s4838_s25, %s4607_s23  ;;  %s4612_s30 = sshll.u32 %s4697_s29, 4  ;;  %s4613_s30 = int_to_ptr.vmem [resolvable:$false] %s4612_s30 }
  0x3f   : > { %s4614_s22 = scalar_lea.vmem %s4613_s30, 65536  ;;  %p4615_p3 = scmp.lt.s32.totalorder %s4838_s25, %s4613_s30 }
  0x40   : > { %p4610_p10 = pnand %p4608_p8, %p4594_p0  ;;  %p4616_p7 = scmp.lt.s32.totalorder %s4614_s22, %s4607_s23 }
  0x42   : > { %p4611_p13 = pneg %p4610_p10  ;;  %p4617_p9 = por %p4616_p7, %p4615_p3 }
  0x44   : > { %p4618_p1 = pnand %p4617_p9, %p4611_p13 }
  0x46   : > { %4621 = shalt.err (!%p4618_p1)
}
  0x47   : > { %4510 = dma.hbm_to_vmem [thread:$0]  (!%p4834_p11), %s4832_s4, 32768, %s4838_s25, %s4840_s5, %s4695_s8, %s4695_s8, %s4696_s9  }
  0x48   : > { %p6008_p0 = scmp.ne.s32.totalorder %s6003_s20, 0 }
  0x49   : > { %p6009_p5 = scmp.eq.s32.totalorder (!%p6008_p0), %s4750_s16, 0 }
  0x4a   : > { %171 = sbr.rel (%p6008_p0) target bundleno = 1175 (0x497), region = 32 }
  0x51   : > { %4667 = dma.done.wait (%p6009_p5), [#allocation5], 256   ;;  %p6010_p2 = pmov %p6009_p5 }
  0x52   : > { %s4878_s6 = sand.u32 1, %s4684_s13   ;;  %p6011_p11 = scmp.ne.s32.totalorder %s6001_s18, 0 }
  0x53   : > { %4669 = vsyncadd (%p6010_p2), [#allocation5], 4294967040  ;;  %s3718_s26 = sshll.u32 %s4878_s6, 11  ;;  %s178_s7 = scalar_lea.sflag [#allocation8], %s4878_s6 }
  0x54   : > { %s4882_s10 = scalar_lea.vmem [#allocation7], %s3718_s26 }
  0x55   : > { %4671 = dma.done.wait (%p6011_p11), %s178_s7, 32768  }
  0x56   : > { %4673 = vsyncadd (%p6011_p11), %s178_s7, 4294934528  ;;  %v462_v0 = vld [vmem:[%s5995_s1] sm:$0xff]  ;;  %v463_v1 = vld [vmem:[%s5995_s1 + $0x8] sm:$0xff]  ;;  %vm1823_vm0 = vcmask 130048   ;;  %s4698_s20 = smov 16   ;;  %s4699_s8 = smov 32  }
  0x57   : > { %v464_v2 = vld [vmem:[%s5995_s1 + $0x10] sm:$0xff]  ;;  %v4415_v3 = vpack.c.bf16 %v463_v1, %v462_v0  ;;  %v465_v4 = vld [vmem:[%s5995_s1 + $0x18] sm:$0xff]  ;;  %v466_v6 = vld [vmem:[%s5995_s1 + $0x20] sm:$0xff]  ;;  %vm2192_vm1 = vcmask 261248   ;;  %vm2289_vm2 = vcmask 392448   ;;  %s4701_s9 = smov 64  }
  0x58   : > { %v4419_v5 = vpack.c.bf16 %v465_v4, %v464_v2  ;;  %v467_v7 = vld [vmem:[%s5995_s1 + $0x28] sm:$0xff]  ;;  %v206_v9 = vld [vmem:[%s4882_s10] sm:$0xff]  ;;  %v336_v10 = vld [vmem:[%s4882_s10 + $0x410] sm:$0xff]  ;;  %vm2386_vm3 = vcmask 523648   ;;  %s4702_s4 = smov 80   ;;  %vm2483_vm4 = vcmask 654848  }
  0x59   : > { %4416 = vmatprep.subr.bf16.mxu0 %v4415_v3  ;;  %4479 = vmatprep.subr.bf16.mxu1 %v4415_v3  ;;  %v4423_v8 = vpack.c.bf16 %v467_v7, %v466_v6  ;;  %v468_v11 = vld [vmem:[%s5995_s1 + $0x30] sm:$0xff]  ;;  %v469_v12 = vld [vmem:[%s5995_s1 + $0x38] sm:$0xff]  ;;  %v470_v14 = vld [vmem:[%s5995_s1 + $0x40] sm:$0xff]  ;;  %s4703_s25 = smov 96   ;;  %vm2580_vm5 = vcmask 786048   ;;  %s4704_s5 = smov 112  }
  0x5a   : > { %4418 = vmatpush3.bf16.msra.mxu0 %v4415_v3  ;;  %4487 = vmatpush3.bf16.msra.mxu1 %v4415_v3  ;;  %v4427_v13 = vpack.c.bf16 %v469_v12, %v468_v11  ;;  %v471_v15 = vld [vmem:[%s5995_s1 + $0x48] sm:$0xff]  ;;  %v472_v17 = vld [vmem:[%s5995_s1 + $0x50] sm:$0xff]  ;;  %v473_v18 = vld [vmem:[%s5995_s1 + $0x58] sm:$0xff]  ;;  %vm2677_vm6 = vcmask 917248   ;;  %vm2774_vm7 = vcmask 1048448   ;;  %s3719_s11 = sshll.u32 %s4878_s6, 5 }
  0x5b   : > { %4420 = vmatprep.subr.bf16.mxu0 %v4419_v5  ;;  %4480 = vmatprep.subr.bf16.mxu1 %v4419_v5  ;;  %v4431_v16 = vpack.c.bf16 %v471_v15, %v470_v14  ;;  %v4435_v19 = vpack.c.bf16 %v473_v18, %v472_v17  ;;  %v474_v20 = vld [vmem:[%s5995_s1 + $0x60] sm:$0xff]  ;;  %v475_v21 = vld [vmem:[%s5995_s1 + $0x68] sm:$0xff]  ;;  %v476_v23 = vld [vmem:[%s5995_s1 + $0x70] sm:$0xff]  ;;  %s203_s27 = scalar_lea.vmem [#allocation9], %s3719_s11  ;;  %s3726_s28 = sshll.u32 %s4750_s16, 8 }
  0x5c   : > { %4031 = vmatprep.mubr.f32.mxu0 %v206_v9  ;;  %4226 = vmatprep.mubr.f32.mxu1 %v336_v10  ;;  %v4439_v22 = vpack.c.bf16 %v475_v21, %v474_v20  ;;  %v477_v24 = vld [vmem:[%s5995_s1 + $0x78] sm:$0xff]  ;;  %v337_v27 = vld [vmem:[%s4882_s10 + $0x418] sm:$0xff]  ;;  %v208_v28 = vld [vmem:[%s4882_s10 + $0x10] sm:$0xff]  ;;  %s3624_s18 = sshll.u32 %s203_s27, 4  ;;  %s5949_s30 = scalar_lea.hbm %s5997_s3, %s3726_s28  ;;  %s5944_s18 = int_to_ptr.vmem [resolvable:$true] %s3624_s18 }
  0x5d   : > { %v4443_v25 = vpack.c.bf16 %v477_v24, %v476_v23  ;;  %v207_v26 = vld [vmem:[%s4882_s10 + $0x8] sm:$0xff]  ;;  %v338_v29 = vld [vmem:[%s4882_s10 + $0x420] sm:$0xff]  ;;  %v209_v30 = vld [vmem:[%s4882_s10 + $0x18] sm:$0xff]  ;;  %s3611_s22 = scalar_lea.sflag [#allocation6], %s4878_s6  ;;  %s4622_s26 = scalar_lea.vmem %s5944_s18, 512 }
  0x5e   : > { %4422 = vmatpush3.bf16.msra.mxu0 %v4419_v5  ;;  %4488 = vmatpush3.bf16.msra.mxu1 %v4419_v5  ;;  %v339_v31 = vld [vmem:[%s4882_s10 + $0x428] sm:$0xff]  ;;  %v210_v32 = vld [vmem:[%s4882_s10 + $0x20] sm:$0xff]  ;;  %v340_v33 = vld [vmem:[%s4882_s10 + $0x430] sm:$0xff]  ;;  %p4623_p4 = scmp.ne.s32.totalorder %s5944_s18, %s4622_s26  ;;  %s4706_s16 = smov [#allocation9]  }
  0x5f   : > { %4424 = vmatprep.subr.bf16.mxu0 %v4423_v8  ;;  %4481 = vmatprep.subr.bf16.mxu1 %v4423_v8  ;;  %v211_v34 = vld [vmem:[%s4882_s10 + $0x28] sm:$0xff]  ;;  %v341_v35 = vld [vmem:[%s4882_s10 + $0x438] sm:$0xff]  ;;  %v212_v36 = vld [vmem:[%s4882_s10 + $0x30] sm:$0xff]  ;;  %s4626_s7 = sshll.u32 %s4706_s16, 4  ;;  %s4627_s7 = int_to_ptr.vmem [resolvable:$false] %s4626_s7 }
  0x60   : > { %v342_v37 = vld [vmem:[%s4882_s10 + $0x440] sm:$0xff]  ;;  %v213_v38 = vld [vmem:[%s4882_s10 + $0x38] sm:$0xff]  ;;  %v343_v39 = vld [vmem:[%s4882_s10 + $0x448] sm:$0xff]  ;;  %p4624_p6 = pnand %p4623_p4, %p4823_p12  ;;  %p4629_p10 = scmp.lt.s32.totalorder %s5944_s18, %s4627_s7 }
  0x61   : > { %v214_v40 = vld [vmem:[%s4882_s10 + $0x40] sm:$0xff]  ;;  %v344_v41 = vld [vmem:[%s4882_s10 + $0x450] sm:$0xff]  ;;  %v215_v42 = vld [vmem:[%s4882_s10 + $0x48] sm:$0xff] }
  0x62   : > { %4426 = vmatpush3.bf16.msra.mxu0 %v4423_v8  ;;  %4489 = vmatpush3.bf16.msra.mxu1 %v4423_v8  ;;  %v345_v43 = vld [vmem:[%s4882_s10 + $0x458] sm:$0xff]  ;;  %v216_v44 = vld [vmem:[%s4882_s10 + $0x50] sm:$0xff]  ;;  %v346_v45 = vld [vmem:[%s4882_s10 + $0x460] sm:$0xff]  ;;  %p4625_p8 = pneg %p4624_p6 }
  0x63   : > { %4428 = vmatprep.subr.bf16.mxu0 %v4427_v13  ;;  %4482 = vmatprep.subr.bf16.mxu1 %v4427_v13  ;;  %v217_v46 = vld [vmem:[%s4882_s10 + $0x58] sm:$0xff]  ;;  %v347_v47 = vld [vmem:[%s4882_s10 + $0x468] sm:$0xff]  ;;  %v218_v48 = vld [vmem:[%s4882_s10 + $0x60] sm:$0xff] }
  0x64   : > { %v348_v49 = vld [vmem:[%s4882_s10 + $0x470] sm:$0xff]  ;;  %v219_v50 = vld [vmem:[%s4882_s10 + $0x68] sm:$0xff]  ;;  %v349_v51 = vld [vmem:[%s4882_s10 + $0x478] sm:$0xff] }
  0x65   : > { %v220_v52 = vld [vmem:[%s4882_s10 + $0x70] sm:$0xff]  ;;  %v350_v53 = vld [vmem:[%s4882_s10 + $0x480] sm:$0xff]  ;;  %v221_v54 = vld [vmem:[%s4882_s10 + $0x78] sm:$0xff] }
  0x66   : > { %4430 = vmatpush3.bf16.msra.mxu0 %v4427_v13  ;;  %4490 = vmatpush3.bf16.msra.mxu1 %v4427_v13  ;;  %v351_v55 = vld [vmem:[%s4882_s10 + $0x488] sm:$0xff]  ;;  %v222_v56 = vld [vmem:[%s4882_s10 + $0x80] sm:$0xff]  ;;  %v352_v57 = vld [vmem:[%s4882_s10 + $0x490] sm:$0xff] }
  0x67   : > { %4432 = vmatprep.subr.bf16.mxu0 %v4431_v16  ;;  %4483 = vmatprep.subr.bf16.mxu1 %v4431_v16  ;;  %v223_v58 = vld [vmem:[%s4882_s10 + $0x88] sm:$0xff]  ;;  %v353_v59 = vld [vmem:[%s4882_s10 + $0x498] sm:$0xff]  ;;  %v224_v60 = vld [vmem:[%s4882_s10 + $0x90] sm:$0xff] }
  0x68   : > { %v354_v61 = vld [vmem:[%s4882_s10 + $0x4a0] sm:$0xff]  ;;  %v225_v62 = vld [vmem:[%s4882_s10 + $0x98] sm:$0xff]  ;;  %v355_v63 = vld [vmem:[%s4882_s10 + $0x4a8] sm:$0xff] }
  0x69   : > { %v226_v0 = vld [vmem:[%s4882_s10 + $0xa0] sm:$0xff]  ;;  %v356_v1 = vld [vmem:[%s4882_s10 + $0x4b0] sm:$0xff]  ;;  %v227_v2 = vld [vmem:[%s4882_s10 + $0xa8] sm:$0xff] }
  0x6a   : > { %4434 = vmatpush3.bf16.msra.mxu0 %v4431_v16  ;;  %4491 = vmatpush3.bf16.msra.mxu1 %v4431_v16  ;;  %v357_v3 = vld [vmem:[%s4882_s10 + $0x4b8] sm:$0xff]  ;;  %v228_v4 = vld [vmem:[%s4882_s10 + $0xb0] sm:$0xff]  ;;  %v358_v5 = vld [vmem:[%s4882_s10 + $0x4c0] sm:$0xff] }
  0x6b   : > { %4436 = vmatprep.subr.bf16.mxu0 %v4435_v19  ;;  %4484 = vmatprep.subr.bf16.mxu1 %v4435_v19  ;;  %v229_v6 = vld [vmem:[%s4882_s10 + $0xb8] sm:$0xff]  ;;  %v359_v7 = vld [vmem:[%s4882_s10 + $0x4c8] sm:$0xff]  ;;  %v230_v8 = vld [vmem:[%s4882_s10 + $0xc0] sm:$0xff] }
  0x6c   : > { %v360_v9 = vld [vmem:[%s4882_s10 + $0x4d0] sm:$0xff]  ;;  %v231_v10 = vld [vmem:[%s4882_s10 + $0xc8] sm:$0xff]  ;;  %v361_v11 = vld [vmem:[%s4882_s10 + $0x4d8] sm:$0xff] }
  0x6d   : > { %v232_v12 = vld [vmem:[%s4882_s10 + $0xd0] sm:$0xff]  ;;  %v362_v13 = vld [vmem:[%s4882_s10 + $0x4e0] sm:$0xff]  ;;  %v233_v14 = vld [vmem:[%s4882_s10 + $0xd8] sm:$0xff] }
  0x6e   : > { %4438 = vmatpush3.bf16.msra.mxu0 %v4435_v19  ;;  %4492 = vmatpush3.bf16.msra.mxu1 %v4435_v19  ;;  %v363_v15 = vld [vmem:[%s4882_s10 + $0x4e8] sm:$0xff]  ;;  %v234_v16 = vld [vmem:[%s4882_s10 + $0xe0] sm:$0xff]  ;;  %v364_v17 = vld [vmem:[%s4882_s10 + $0x4f0] sm:$0xff] }
  0x6f   : > { %4440 = vmatprep.subr.bf16.mxu0 %v4439_v22  ;;  %4485 = vmatprep.subr.bf16.mxu1 %v4439_v22  ;;  %v235_v18 = vld [vmem:[%s4882_s10 + $0xe8] sm:$0xff]  ;;  %v365_v19 = vld [vmem:[%s4882_s10 + $0x4f8] sm:$0xff]  ;;  %v236_v20 = vld [vmem:[%s4882_s10 + $0xf0] sm:$0xff] }
  0x70   : > { %v366_v21 = vld [vmem:[%s4882_s10 + $0x500] sm:$0xff]  ;;  %v367_v23 = vld [vmem:[%s4882_s10 + $0x508] sm:$0xff] }
  0x71   : > { %v238_v24 = vld [vmem:[%s4882_s10 + $0x100] sm:$0xff] }
  0x72   : > { %4442 = vmatpush3.bf16.msra.mxu0 %v4439_v22  ;;  %4493 = vmatpush3.bf16.msra.mxu1 %v4439_v22  ;;  %v237_v22 = vld [vmem:[%s4882_s10 + $0xf8] sm:$0xff] }
  0x73   : > { %4444 = vmatprep.subr.bf16.mxu0 %v4443_v25  ;;  %4486 = vmatprep.subr.bf16.mxu1 %v4443_v25 }
  0x76   : > { %4446 = vmatpush3.bf16.msra.mxu0 %v4443_v25  ;;  %4494 = vmatpush3.bf16.msra.mxu1 %v4443_v25  ;;  %v368_v25 = vld [vmem:[%s4882_s10 + $0x510] sm:$0xff] }
  0x79   : > { %4032 = vmatmul.mubr.f32.vlgmr.msra.gmra.mrb[0].mxu0 %v207_v26  ;;  %4227 = vmatmul.mubr.f32.vlgmr.msra.gmra.mrb[0].mxu1 %v337_v27  ;;  %v239_v26 = vld [vmem:[%s4882_s10 + $0x108] sm:$0xff]  ;;  %v369_v27 = vld [vmem:[%s4882_s10 + $0x518] sm:$0xff] }
  0x7a   : > { %4034 = vmatprep.mubr.f32.mxu0 %v208_v28  ;;  %4229 = vmatprep.mubr.f32.mxu1 %v338_v29  ;;  %v240_v28 = vld [vmem:[%s4882_s10 + $0x110] sm:$0xff]  ;;  %v370_v29 = vld [vmem:[%s4882_s10 + $0x520] sm:$0xff] }
  0x7d   : > { %4035 = vmatmul.mubr.f32.gmra.mrb[2].mxu0 %v209_v30  ;;  %4230 = vmatmul.mubr.f32.gmra.mrb[2].mxu1 %v339_v31  ;;  %v241_v30 = vld [vmem:[%s4882_s10 + $0x118] sm:$0xff]  ;;  %v371_v31 = vld [vmem:[%s4882_s10 + $0x528] sm:$0xff] }
  0x7e   : > { %4037 = vmatprep.mubr.f32.mxu0 %v210_v32  ;;  %4232 = vmatprep.mubr.f32.mxu1 %v340_v33  ;;  %v242_v32 = vld [vmem:[%s4882_s10 + $0x120] sm:$0xff]  ;;  %v372_v33 = vld [vmem:[%s4882_s10 + $0x530] sm:$0xff] }
  0x81   : > { %4038 = vmatmul.mubr.f32.gmra.mrb[4].mxu0 %v211_v34  ;;  %4233 = vmatmul.mubr.f32.gmra.mrb[4].mxu1 %v341_v35  ;;  %v243_v34 = vld [vmem:[%s4882_s10 + $0x128] sm:$0xff]  ;;  %v373_v35 = vld [vmem:[%s4882_s10 + $0x538] sm:$0xff] }
  0x82   : > { %4040 = vmatprep.mubr.f32.mxu0 %v212_v36  ;;  %4235 = vmatprep.mubr.f32.mxu1 %v342_v37  ;;  %v244_v36 = vld [vmem:[%s4882_s10 + $0x130] sm:$0xff]  ;;  %v374_v37 = vld [vmem:[%s4882_s10 + $0x540] sm:$0xff] }
  0x85   : > { %4041 = vmatmul.mubr.f32.gmra.mrb[6].mxu0 %v213_v38  ;;  %4236 = vmatmul.mubr.f32.gmra.mrb[6].mxu1 %v343_v39  ;;  %v245_v38 = vld [vmem:[%s4882_s10 + $0x138] sm:$0xff]  ;;  %v375_v39 = vld [vmem:[%s4882_s10 + $0x548] sm:$0xff] }
  0x86   : > { %4043 = vmatprep.mubr.f32.mxu0 %v214_v40  ;;  %4238 = vmatprep.mubr.f32.mxu1 %v344_v41  ;;  %v246_v40 = vld [vmem:[%s4882_s10 + $0x140] sm:$0xff]  ;;  %v376_v41 = vld [vmem:[%s4882_s10 + $0x550] sm:$0xff] }
  0x89   : > { %4044 = vmatmul.mubr.f32.gmra.mrb[8].mxu0 %v215_v42  ;;  %4239 = vmatmul.mubr.f32.gmra.mrb[8].mxu1 %v345_v43  ;;  %v247_v42 = vld [vmem:[%s4882_s10 + $0x148] sm:$0xff]  ;;  %v377_v43 = vld [vmem:[%s4882_s10 + $0x558] sm:$0xff] }
  0x8a   : > { %4046 = vmatprep.mubr.f32.mxu0 %v216_v44  ;;  %4241 = vmatprep.mubr.f32.mxu1 %v346_v45  ;;  %v248_v44 = vld [vmem:[%s4882_s10 + $0x150] sm:$0xff]  ;;  %v378_v45 = vld [vmem:[%s4882_s10 + $0x560] sm:$0xff] }
  0x8d   : > { %4047 = vmatmul.mubr.f32.gmra.mrb[10].mxu0 %v217_v46  ;;  %4242 = vmatmul.mubr.f32.gmra.mrb[10].mxu1 %v347_v47  ;;  %v249_v46 = vld [vmem:[%s4882_s10 + $0x158] sm:$0xff]  ;;  %v379_v47 = vld [vmem:[%s4882_s10 + $0x568] sm:$0xff] }
  0x8e   : > { %4049 = vmatprep.mubr.f32.mxu0 %v218_v48  ;;  %4244 = vmatprep.mubr.f32.mxu1 %v348_v49  ;;  %v250_v48 = vld [vmem:[%s4882_s10 + $0x160] sm:$0xff]  ;;  %v380_v49 = vld [vmem:[%s4882_s10 + $0x570] sm:$0xff] }
  0x91   : > { %4050 = vmatmul.mubr.f32.gmra.mrb[12].mxu0 %v219_v50  ;;  %4245 = vmatmul.mubr.f32.gmra.mrb[12].mxu1 %v349_v51  ;;  %v251_v50 = vld [vmem:[%s4882_s10 + $0x168] sm:$0xff]  ;;  %v381_v51 = vld [vmem:[%s4882_s10 + $0x578] sm:$0xff] }
  0x92   : > { %4052 = vmatprep.mubr.f32.mxu0 %v220_v52  ;;  %4247 = vmatprep.mubr.f32.mxu1 %v350_v53  ;;  %v252_v52 = vld [vmem:[%s4882_s10 + $0x170] sm:$0xff]  ;;  %v382_v53 = vld [vmem:[%s4882_s10 + $0x580] sm:$0xff] }
  0x95   : > { %4053 = vmatmul.mubr.f32.gmra.mrb[14].mxu0 %v221_v54  ;;  %4248 = vmatmul.mubr.f32.gmra.mrb[14].mxu1 %v351_v55  ;;  %v253_v54 = vld [vmem:[%s4882_s10 + $0x178] sm:$0xff]  ;;  %v383_v55 = vld [vmem:[%s4882_s10 + $0x588] sm:$0xff] }
  0x96   : > { %4055 = vmatprep.mubr.f32.mxu0 %v222_v56  ;;  %4250 = vmatprep.mubr.f32.mxu1 %v352_v57  ;;  %v254_v56 = vld [vmem:[%s4882_s10 + $0x180] sm:$0xff]  ;;  %v384_v57 = vld [vmem:[%s4882_s10 + $0x590] sm:$0xff] }
  0x99   : > { %4056 = vmatmul.mubr.f32.gmra.mrb[16].mxu0 %v223_v58  ;;  %4251 = vmatmul.mubr.f32.gmra.mrb[16].mxu1 %v353_v59  ;;  %v255_v58 = vld [vmem:[%s4882_s10 + $0x188] sm:$0xff]  ;;  %v385_v59 = vld [vmem:[%s4882_s10 + $0x598] sm:$0xff] }
  0x9a   : > { %4058 = vmatprep.mubr.f32.mxu0 %v224_v60  ;;  %4253 = vmatprep.mubr.f32.mxu1 %v354_v61  ;;  %v256_v60 = vld [vmem:[%s4882_s10 + $0x190] sm:$0xff]  ;;  %v386_v61 = vld [vmem:[%s4882_s10 + $0x5a0] sm:$0xff] }
  0x9d   : > { %4059 = vmatmul.mubr.f32.gmra.mrb[18].mxu0 %v225_v62  ;;  %4254 = vmatmul.mubr.f32.gmra.mrb[18].mxu1 %v355_v63  ;;  %v257_v62 = vld [vmem:[%s4882_s10 + $0x198] sm:$0xff]  ;;  %v387_v63 = vld [vmem:[%s4882_s10 + $0x5a8] sm:$0xff] }
  0x9e   : > { %4061 = vmatprep.mubr.f32.mxu0 %v226_v0  ;;  %4256 = vmatprep.mubr.f32.mxu1 %v356_v1  ;;  %v258_v0 = vld [vmem:[%s4882_s10 + $0x1a0] sm:$0xff]  ;;  %v388_v1 = vld [vmem:[%s4882_s10 + $0x5b0] sm:$0xff] }
  0xa1   : > { %4062 = vmatmul.mubr.f32.gmra.mrb[20].mxu0 %v227_v2  ;;  %4257 = vmatmul.mubr.f32.gmra.mrb[20].mxu1 %v357_v3  ;;  %v259_v2 = vld [vmem:[%s4882_s10 + $0x1a8] sm:$0xff]  ;;  %v389_v3 = vld [vmem:[%s4882_s10 + $0x5b8] sm:$0xff] }
  0xa2   : > { %4064 = vmatprep.mubr.f32.mxu0 %v228_v4  ;;  %4259 = vmatprep.mubr.f32.mxu1 %v358_v5  ;;  %v260_v4 = vld [vmem:[%s4882_s10 + $0x1b0] sm:$0xff]  ;;  %v390_v5 = vld [vmem:[%s4882_s10 + $0x5c0] sm:$0xff] }
  0xa5   : > { %4065 = vmatmul.mubr.f32.gmra.mrb[22].mxu0 %v229_v6  ;;  %4260 = vmatmul.mubr.f32.gmra.mrb[22].mxu1 %v359_v7  ;;  %v261_v6 = vld [vmem:[%s4882_s10 + $0x1b8] sm:$0xff]  ;;  %v391_v7 = vld [vmem:[%s4882_s10 + $0x5c8] sm:$0xff] }
  0xa6   : > { %4067 = vmatprep.mubr.f32.mxu0 %v230_v8  ;;  %4262 = vmatprep.mubr.f32.mxu1 %v360_v9  ;;  %v262_v8 = vld [vmem:[%s4882_s10 + $0x1c0] sm:$0xff]  ;;  %v392_v9 = vld [vmem:[%s4882_s10 + $0x5d0] sm:$0xff] }
  0xa9   : > { %4068 = vmatmul.mubr.f32.gmra.mrb[24].mxu0 %v231_v10  ;;  %4263 = vmatmul.mubr.f32.gmra.mrb[24].mxu1 %v361_v11  ;;  %v263_v10 = vld [vmem:[%s4882_s10 + $0x1c8] sm:$0xff]  ;;  %v393_v11 = vld [vmem:[%s4882_s10 + $0x5d8] sm:$0xff] }
  0xaa   : > { %4070 = vmatprep.mubr.f32.mxu0 %v232_v12  ;;  %4265 = vmatprep.mubr.f32.mxu1 %v362_v13  ;;  %v264_v12 = vld [vmem:[%s4882_s10 + $0x1d0] sm:$0xff]  ;;  %v394_v13 = vld [vmem:[%s4882_s10 + $0x5e0] sm:$0xff] }
  0xad   : > { %4071 = vmatmul.mubr.f32.gmra.mrb[26].mxu0 %v233_v14  ;;  %4266 = vmatmul.mubr.f32.gmra.mrb[26].mxu1 %v363_v15  ;;  %v265_v14 = vld [vmem:[%s4882_s10 + $0x1d8] sm:$0xff]  ;;  %v395_v15 = vld [vmem:[%s4882_s10 + $0x5e8] sm:$0xff] }
  0xae   : > { %4073 = vmatprep.mubr.f32.mxu0 %v234_v16  ;;  %4268 = vmatprep.mubr.f32.mxu1 %v364_v17  ;;  %v266_v16 = vld [vmem:[%s4882_s10 + $0x1e0] sm:$0xff]  ;;  %v396_v17 = vld [vmem:[%s4882_s10 + $0x5f0] sm:$0xff] }
  0xb1   : > { %4074 = vmatmul.mubr.f32.gmra.mrb[28].mxu0 %v235_v18  ;;  %4269 = vmatmul.mubr.f32.gmra.mrb[28].mxu1 %v365_v19  ;;  %v267_v18 = vld [vmem:[%s4882_s10 + $0x1e8] sm:$0xff]  ;;  %v397_v19 = vld [vmem:[%s4882_s10 + $0x5f8] sm:$0xff] }
  0xb2   : > { %4076 = vmatprep.mubr.f32.mxu0 %v236_v20  ;;  %4271 = vmatprep.mubr.f32.mxu1 %v366_v21  ;;  %v268_v20 = vld [vmem:[%s4882_s10 + $0x1f0] sm:$0xff]  ;;  %v398_v21 = vld [vmem:[%s4882_s10 + $0x600] sm:$0xff] }
  0xb5   : > { %4077 = vmatmul.mubr.f32.gmra.mrb[30].mxu0 %v237_v22  ;;  %4272 = vmatmul.mubr.f32.gmra.mrb[30].mxu1 %v367_v23  ;;  %v269_v22 = vld [vmem:[%s4882_s10 + $0x1f8] sm:$0xff]  ;;  %v399_v23 = vld [vmem:[%s4882_s10 + $0x608] sm:$0xff] }
  0xb6   : > { %4079 = vmatprep.mubr.f32.mxu0 %v238_v24  ;;  %4274 = vmatprep.mubr.f32.mxu1 %v368_v25  ;;  %v270_v24 = vld [vmem:[%s4882_s10 + $0x200] sm:$0xff]  ;;  %v400_v25 = vld [vmem:[%s4882_s10 + $0x610] sm:$0xff] }
  0xb9   : > { %4080 = vmatmul.mubr.f32.gmra.mrb[32].mxu0 %v239_v26  ;;  %4275 = vmatmul.mubr.f32.gmra.mrb[32].mxu1 %v369_v27  ;;  %v271_v26 = vld [vmem:[%s4882_s10 + $0x208] sm:$0xff]  ;;  %v401_v27 = vld [vmem:[%s4882_s10 + $0x618] sm:$0xff] }
  0xba   : > { %4082 = vmatprep.mubr.f32.mxu0 %v240_v28  ;;  %4277 = vmatprep.mubr.f32.mxu1 %v370_v29  ;;  %v272_v28 = vld [vmem:[%s4882_s10 + $0x210] sm:$0xff]  ;;  %v402_v29 = vld [vmem:[%s4882_s10 + $0x620] sm:$0xff] }
  0xbd   : > { %4083 = vmatmul.mubr.f32.gmra.mrb[34].mxu0 %v241_v30  ;;  %4278 = vmatmul.mubr.f32.gmra.mrb[34].mxu1 %v371_v31  ;;  %v273_v30 = vld [vmem:[%s4882_s10 + $0x218] sm:$0xff]  ;;  %v403_v31 = vld [vmem:[%s4882_s10 + $0x628] sm:$0xff] }
  0xbe   : > { %4085 = vmatprep.mubr.f32.mxu0 %v242_v32  ;;  %4280 = vmatprep.mubr.f32.mxu1 %v372_v33  ;;  %v274_v32 = vld [vmem:[%s4882_s10 + $0x220] sm:$0xff]  ;;  %v404_v33 = vld [vmem:[%s4882_s10 + $0x630] sm:$0xff] }
  0xc1   : > { %4086 = vmatmul.mubr.f32.gmra.mrb[36].mxu0 %v243_v34  ;;  %4281 = vmatmul.mubr.f32.gmra.mrb[36].mxu1 %v373_v35  ;;  %v275_v34 = vld [vmem:[%s4882_s10 + $0x228] sm:$0xff]  ;;  %v405_v35 = vld [vmem:[%s4882_s10 + $0x638] sm:$0xff] }
  0xc2   : > { %4088 = vmatprep.mubr.f32.mxu0 %v244_v36  ;;  %4283 = vmatprep.mubr.f32.mxu1 %v374_v37  ;;  %v276_v36 = vld [vmem:[%s4882_s10 + $0x230] sm:$0xff]  ;;  %v406_v37 = vld [vmem:[%s4882_s10 + $0x640] sm:$0xff] }
  0xc5   : > { %4089 = vmatmul.mubr.f32.gmra.mrb[38].mxu0 %v245_v38  ;;  %4284 = vmatmul.mubr.f32.gmra.mrb[38].mxu1 %v375_v39  ;;  %v277_v38 = vld [vmem:[%s4882_s10 + $0x238] sm:$0xff]  ;;  %v407_v39 = vld [vmem:[%s4882_s10 + $0x648] sm:$0xff] }
  0xc6   : > { %4091 = vmatprep.mubr.f32.mxu0 %v246_v40  ;;  %4286 = vmatprep.mubr.f32.mxu1 %v376_v41  ;;  %v278_v40 = vld [vmem:[%s4882_s10 + $0x240] sm:$0xff]  ;;  %v408_v41 = vld [vmem:[%s4882_s10 + $0x650] sm:$0xff] }
  0xc9   : > { %4092 = vmatmul.mubr.f32.gmra.mrb[40].mxu0 %v247_v42  ;;  %4287 = vmatmul.mubr.f32.gmra.mrb[40].mxu1 %v377_v43  ;;  %v279_v42 = vld [vmem:[%s4882_s10 + $0x248] sm:$0xff]  ;;  %v409_v43 = vld [vmem:[%s4882_s10 + $0x658] sm:$0xff] }
  0xca   : > { %4094 = vmatprep.mubr.f32.mxu0 %v248_v44  ;;  %4289 = vmatprep.mubr.f32.mxu1 %v378_v45  ;;  %v280_v44 = vld [vmem:[%s4882_s10 + $0x250] sm:$0xff]  ;;  %v410_v45 = vld [vmem:[%s4882_s10 + $0x660] sm:$0xff] }
  0xcd   : > { %4095 = vmatmul.mubr.f32.gmra.mrb[42].mxu0 %v249_v46  ;;  %4290 = vmatmul.mubr.f32.gmra.mrb[42].mxu1 %v379_v47  ;;  %v281_v46 = vld [vmem:[%s4882_s10 + $0x258] sm:$0xff]  ;;  %v411_v47 = vld [vmem:[%s4882_s10 + $0x668] sm:$0xff] }
  0xce   : > { %4097 = vmatprep.mubr.f32.mxu0 %v250_v48  ;;  %4292 = vmatprep.mubr.f32.mxu1 %v380_v49  ;;  %v282_v48 = vld [vmem:[%s4882_s10 + $0x260] sm:$0xff]  ;;  %v412_v49 = vld [vmem:[%s4882_s10 + $0x670] sm:$0xff] }
  0xd1   : > { %4098 = vmatmul.mubr.f32.gmra.mrb[44].mxu0 %v251_v50  ;;  %4293 = vmatmul.mubr.f32.gmra.mrb[44].mxu1 %v381_v51  ;;  %v283_v50 = vld [vmem:[%s4882_s10 + $0x268] sm:$0xff]  ;;  %v413_v51 = vld [vmem:[%s4882_s10 + $0x678] sm:$0xff] }
  0xd2   : > { %4100 = vmatprep.mubr.f32.mxu0 %v252_v52  ;;  %4295 = vmatprep.mubr.f32.mxu1 %v382_v53  ;;  %v284_v52 = vld [vmem:[%s4882_s10 + $0x270] sm:$0xff]  ;;  %v414_v53 = vld [vmem:[%s4882_s10 + $0x680] sm:$0xff] }
  0xd5   : > { %4101 = vmatmul.mubr.f32.gmra.mrb[46].mxu0 %v253_v54  ;;  %4296 = vmatmul.mubr.f32.gmra.mrb[46].mxu1 %v383_v55  ;;  %v285_v54 = vld [vmem:[%s4882_s10 + $0x278] sm:$0xff]  ;;  %v415_v55 = vld [vmem:[%s4882_s10 + $0x688] sm:$0xff] }
  0xd6   : > { %4103 = vmatprep.mubr.f32.mxu0 %v254_v56  ;;  %4298 = vmatprep.mubr.f32.mxu1 %v384_v57  ;;  %v286_v56 = vld [vmem:[%s4882_s10 + $0x280] sm:$0xff]  ;;  %v287_v57 = vld [vmem:[%s4882_s10 + $0x288] sm:$0xff] }
  0xd9   : > { %4104 = vmatmul.mubr.f32.gmra.mrb[48].mxu0 %v255_v58  ;;  %4299 = vmatmul.mubr.f32.gmra.mrb[48].mxu1 %v385_v59  ;;  %v288_v58 = vld [vmem:[%s4882_s10 + $0x290] sm:$0xff]  ;;  %v289_v59 = vld [vmem:[%s4882_s10 + $0x298] sm:$0xff] }
  0xda   : > { %4106 = vmatprep.mubr.f32.mxu0 %v256_v60  ;;  %4301 = vmatprep.mubr.f32.mxu1 %v386_v61  ;;  %v416_v60 = vld [vmem:[%s4882_s10 + $0x690] sm:$0xff]  ;;  %v417_v61 = vld [vmem:[%s4882_s10 + $0x698] sm:$0xff] }
  0xdd   : > { %4107 = vmatmul.mubr.f32.gmra.mrb[50].mxu0 %v257_v62  ;;  %4302 = vmatmul.mubr.f32.gmra.mrb[50].mxu1 %v387_v63  ;;  %v290_v62 = vld [vmem:[%s4882_s10 + $0x2a0] sm:$0xff]  ;;  %v291_v63 = vld [vmem:[%s4882_s10 + $0x2a8] sm:$0xff] }
  0xde   : > { %4109 = vmatprep.mubr.f32.mxu0 %v258_v0  ;;  %4304 = vmatprep.mubr.f32.mxu1 %v388_v1  ;;  %v292_v0 = vld [vmem:[%s4882_s10 + $0x2b0] sm:$0xff]  ;;  %v293_v1 = vld [vmem:[%s4882_s10 + $0x2b8] sm:$0xff] }
  0xe1   : > { %4110 = vmatmul.mubr.f32.gmra.mrb[52].mxu0 %v259_v2  ;;  %4305 = vmatmul.mubr.f32.gmra.mrb[52].mxu1 %v389_v3  ;;  %v418_v2 = vld [vmem:[%s4882_s10 + $0x6a0] sm:$0xff]  ;;  %v419_v3 = vld [vmem:[%s4882_s10 + $0x6a8] sm:$0xff] }
  0xe2   : > { %4112 = vmatprep.mubr.f32.mxu0 %v260_v4  ;;  %4307 = vmatprep.mubr.f32.mxu1 %v390_v5  ;;  %v294_v4 = vld [vmem:[%s4882_s10 + $0x2c0] sm:$0xff]  ;;  %v295_v5 = vld [vmem:[%s4882_s10 + $0x2c8] sm:$0xff] }
  0xe5   : > { %4113 = vmatmul.mubr.f32.gmra.mrb[54].mxu0 %v261_v6  ;;  %4308 = vmatmul.mubr.f32.gmra.mrb[54].mxu1 %v391_v7  ;;  %v296_v6 = vld [vmem:[%s4882_s10 + $0x2d0] sm:$0xff]  ;;  %v297_v7 = vld [vmem:[%s4882_s10 + $0x2d8] sm:$0xff] }
  0xe6   : > { %4115 = vmatprep.mubr.f32.mxu0 %v262_v8  ;;  %4310 = vmatprep.mubr.f32.mxu1 %v392_v9  ;;  %v420_v8 = vld [vmem:[%s4882_s10 + $0x6b0] sm:$0xff]  ;;  %v421_v9 = vld [vmem:[%s4882_s10 + $0x6b8] sm:$0xff] }
  0xe9   : > { %4116 = vmatmul.mubr.f32.gmra.mrb[56].mxu0 %v263_v10  ;;  %4311 = vmatmul.mubr.f32.gmra.mrb[56].mxu1 %v393_v11  ;;  %v298_v10 = vld [vmem:[%s4882_s10 + $0x2e0] sm:$0xff]  ;;  %v299_v11 = vld [vmem:[%s4882_s10 + $0x2e8] sm:$0xff] }
  0xea   : > { %4118 = vmatprep.mubr.f32.mxu0 %v264_v12  ;;  %4313 = vmatprep.mubr.f32.mxu1 %v394_v13  ;;  %v300_v12 = vld [vmem:[%s4882_s10 + $0x2f0] sm:$0xff]  ;;  %v301_v13 = vld [vmem:[%s4882_s10 + $0x2f8] sm:$0xff] }
  0xed   : > { %4119 = vmatmul.mubr.f32.gmra.mrb[58].mxu0 %v265_v14  ;;  %4314 = vmatmul.mubr.f32.gmra.mrb[58].mxu1 %v395_v15  ;;  %v422_v14 = vld [vmem:[%s4882_s10 + $0x6c0] sm:$0xff]  ;;  %v423_v15 = vld [vmem:[%s4882_s10 + $0x6c8] sm:$0xff] }
  0xee   : > { %4121 = vmatprep.mubr.f32.mxu0 %v266_v16  ;;  %4316 = vmatprep.mubr.f32.mxu1 %v396_v17  ;;  %v302_v16 = vld [vmem:[%s4882_s10 + $0x300] sm:$0xff]  ;;  %v303_v17 = vld [vmem:[%s4882_s10 + $0x308] sm:$0xff] }
  0xf1   : > { %4122 = vmatmul.mubr.f32.gmra.mrb[60].mxu0 %v267_v18  ;;  %4317 = vmatmul.mubr.f32.gmra.mrb[60].mxu1 %v397_v19  ;;  %v304_v18 = vld [vmem:[%s4882_s10 + $0x310] sm:$0xff]  ;;  %v305_v19 = vld [vmem:[%s4882_s10 + $0x318] sm:$0xff] }
  0xf2   : > { %4124 = vmatprep.mubr.f32.mxu0 %v268_v20  ;;  %4319 = vmatprep.mubr.f32.mxu1 %v398_v21  ;;  %v424_v20 = vld [vmem:[%s4882_s10 + $0x6d0] sm:$0xff]  ;;  %v425_v21 = vld [vmem:[%s4882_s10 + $0x6d8] sm:$0xff] }
  0xf5   : > { %4125 = vmatmul.mubr.f32.gmra.mrb[62].mxu0 %v269_v22  ;;  %4320 = vmatmul.mubr.f32.gmra.mrb[62].mxu1 %v399_v23  ;;  %v306_v22 = vld [vmem:[%s4882_s10 + $0x320] sm:$0xff]  ;;  %v307_v23 = vld [vmem:[%s4882_s10 + $0x328] sm:$0xff] }
  0xf6   : > { %4127 = vmatprep.mubr.f32.mxu0 %v270_v24  ;;  %4322 = vmatprep.mubr.f32.mxu1 %v400_v25  ;;  %v308_v24 = vld [vmem:[%s4882_s10 + $0x330] sm:$0xff]  ;;  %v309_v25 = vld [vmem:[%s4882_s10 + $0x338] sm:$0xff] }
  0xf9   : > { %4128 = vmatmul.mubr.f32.gmra.mrb[64].mxu0 %v271_v26  ;;  %4323 = vmatmul.mubr.f32.gmra.mrb[64].mxu1 %v401_v27  ;;  %v426_v26 = vld [vmem:[%s4882_s10 + $0x6e0] sm:$0xff]  ;;  %v427_v27 = vld [vmem:[%s4882_s10 + $0x6e8] sm:$0xff] }
  0xfa   : > { %4130 = vmatprep.mubr.f32.mxu0 %v272_v28  ;;  %4325 = vmatprep.mubr.f32.mxu1 %v402_v29  ;;  %v310_v28 = vld [vmem:[%s4882_s10 + $0x340] sm:$0xff]  ;;  %v311_v29 = vld [vmem:[%s4882_s10 + $0x348] sm:$0xff] }
  0xfd   : > { %4131 = vmatmul.mubr.f32.gmra.mrb[66].mxu0 %v273_v30  ;;  %4326 = vmatmul.mubr.f32.gmra.mrb[66].mxu1 %v403_v31  ;;  %v312_v30 = vld [vmem:[%s4882_s10 + $0x350] sm:$0xff]  ;;  %v313_v31 = vld [vmem:[%s4882_s10 + $0x358] sm:$0xff] }
  0xfe   : > { %4133 = vmatprep.mubr.f32.mxu0 %v274_v32  ;;  %4328 = vmatprep.mubr.f32.mxu1 %v404_v33  ;;  %v428_v32 = vld [vmem:[%s4882_s10 + $0x6f0] sm:$0xff]  ;;  %v429_v33 = vld [vmem:[%s4882_s10 + $0x6f8] sm:$0xff] }
 0x101   : > { %4134 = vmatmul.mubr.f32.gmra.mrb[68].mxu0 %v275_v34  ;;  %4329 = vmatmul.mubr.f32.gmra.mrb[68].mxu1 %v405_v35  ;;  %v314_v34 = vld [vmem:[%s4882_s10 + $0x360] sm:$0xff] }
 0x102   : > { %4136 = vmatprep.mubr.f32.mxu0 %v276_v36  ;;  %4331 = vmatprep.mubr.f32.mxu1 %v406_v37 }
 0x105   : > { %4137 = vmatmul.mubr.f32.gmra.mrb[70].mxu0 %v277_v38  ;;  %4332 = vmatmul.mubr.f32.gmra.mrb[70].mxu1 %v407_v39  ;;  %v315_v39 = vld [vmem:[%s4882_s10 + $0x368] sm:$0xff] }
 0x106   : > { %4139 = vmatprep.mubr.f32.mxu0 %v278_v40  ;;  %4334 = vmatprep.mubr.f32.mxu1 %v408_v41  ;;  %v430_v40 = vld [vmem:[%s4882_s10 + $0x700] sm:$0xff]  ;;  %v431_v41 = vld [vmem:[%s4882_s10 + $0x708] sm:$0xff] }
 0x109   : > { %4140 = vmatmul.mubr.f32.gmra.mrb[72].mxu0 %v279_v42  ;;  %4335 = vmatmul.mubr.f32.gmra.mrb[72].mxu1 %v409_v43  ;;  %v316_v42 = vld [vmem:[%s4882_s10 + $0x370] sm:$0xff] }
 0x10a   : > { %4142 = vmatprep.mubr.f32.mxu0 %v280_v44  ;;  %4337 = vmatprep.mubr.f32.mxu1 %v410_v45 }
 0x10d   : > { %4143 = vmatmul.mubr.f32.gmra.mrb[74].mxu0 %v281_v46  ;;  %4338 = vmatmul.mubr.f32.gmra.mrb[74].mxu1 %v411_v47  ;;  %v317_v47 = vld [vmem:[%s4882_s10 + $0x378] sm:$0xff] }
 0x10e   : > { %4145 = vmatprep.mubr.f32.mxu0 %v282_v48  ;;  %4340 = vmatprep.mubr.f32.mxu1 %v412_v49  ;;  %v318_v48 = vld [vmem:[%s4882_s10 + $0x380] sm:$0xff] }
 0x111   : > { %4146 = vmatmul.mubr.f32.gmra.mrb[76].mxu0 %v283_v50  ;;  %4341 = vmatmul.mubr.f32.gmra.mrb[76].mxu1 %v413_v51 }
 0x112   : > { %4148 = vmatprep.mubr.f32.mxu0 %v284_v52  ;;  %4343 = vmatprep.mubr.f32.mxu1 %v414_v53 }
 0x115   : > { %4149 = vmatmul.mubr.f32.gmra.mrb[78].mxu0 %v285_v54  ;;  %4344 = vmatmul.mubr.f32.gmra.mrb[78].mxu1 %v415_v55 }
 0x116   : > { %4151 = vmatprep.mubr.f32.mxu0 %v286_v56  ;;  %4346 = vmatprep.mubr.f32.mxu1 %v416_v60 }
 0x119   : > { %4152 = vmatmul.mubr.f32.gmra.mrb[80].mxu0 %v287_v57  ;;  %4347 = vmatmul.mubr.f32.gmra.mrb[80].mxu1 %v417_v61  ;;  %v319_v57 = vld [vmem:[%s4882_s10 + $0x388] sm:$0xff] }
 0x11a   : > { %4154 = vmatprep.mubr.f32.mxu0 %v288_v58  ;;  %4349 = vmatprep.mubr.f32.mxu1 %v418_v2  ;;  %v320_v58 = vld [vmem:[%s4882_s10 + $0x390] sm:$0xff] }
 0x11d   : > { %4155 = vmatmul.mubr.f32.gmra.mrb[82].mxu0 %v289_v59  ;;  %4350 = vmatmul.mubr.f32.gmra.mrb[82].mxu1 %v419_v3  ;;  %v321_v3 = vld [vmem:[%s4882_s10 + $0x398] sm:$0xff] }
 0x11e   : > { %4157 = vmatprep.mubr.f32.mxu0 %v290_v62  ;;  %4352 = vmatprep.mubr.f32.mxu1 %v420_v8 }
 0x121   : > { %4158 = vmatmul.mubr.f32.gmra.mrb[84].mxu0 %v291_v63  ;;  %4353 = vmatmul.mubr.f32.gmra.mrb[84].mxu1 %v421_v9 }
 0x122   : > { %4160 = vmatprep.mubr.f32.mxu0 %v292_v0  ;;  %4355 = vmatprep.mubr.f32.mxu1 %v422_v14 }
 0x125   : > { %4161 = vmatmul.mubr.f32.gmra.mrb[86].mxu0 %v293_v1  ;;  %4356 = vmatmul.mubr.f32.gmra.mrb[86].mxu1 %v423_v15  ;;  %v323_v15 = vld [vmem:[%s4882_s10 + $0x3a8] sm:$0xff] }
 0x126   : > { %4163 = vmatprep.mubr.f32.mxu0 %v294_v4  ;;  %4358 = vmatprep.mubr.f32.mxu1 %v424_v20  ;;  %v432_v4 = vld [vmem:[%s4882_s10 + $0x710] sm:$0xff] }
 0x129   : > { %4164 = vmatmul.mubr.f32.gmra.mrb[88].mxu0 %v295_v5  ;;  %4359 = vmatmul.mubr.f32.gmra.mrb[88].mxu1 %v425_v21  ;;  %v433_v5 = vld [vmem:[%s4882_s10 + $0x718] sm:$0xff] }
 0x12a   : > { %4166 = vmatprep.mubr.f32.mxu0 %v296_v6  ;;  %4361 = vmatprep.mubr.f32.mxu1 %v426_v26  ;;  %v322_v6 = vld [vmem:[%s4882_s10 + $0x3a0] sm:$0xff] }
 0x12b   : > { %v434_v26 = vld [vmem:[%s4882_s10 + $0x720] sm:$0xff] }
 0x12d   : > { %4167 = vmatmul.mubr.f32.gmra.mrb[90].mxu0 %v297_v7  ;;  %4362 = vmatmul.mubr.f32.gmra.mrb[90].mxu1 %v427_v27  ;;  %v326_v27 = vld [vmem:[%s4882_s10 + $0x3c0] sm:$0xff] }
 0x12e   : > { %4169 = vmatprep.mubr.f32.mxu0 %v298_v10  ;;  %4364 = vmatprep.mubr.f32.mxu1 %v428_v32 }
 0x131   : > { %4170 = vmatmul.mubr.f32.gmra.mrb[92].mxu0 %v299_v11  ;;  %4365 = vmatmul.mubr.f32.gmra.mrb[92].mxu1 %v429_v33 }
 0x132   : > { %4172 = vmatprep.mubr.f32.mxu0 %v300_v12  ;;  %4367 = vmatprep.mubr.f32.mxu1 %v430_v40 }
 0x135   : > { %4173 = vmatmul.mubr.f32.gmra.mrb[94].mxu0 %v301_v13  ;;  %4368 = vmatmul.mubr.f32.gmra.mrb[94].mxu1 %v431_v41 }
 0x136   : > { %4175 = vmatprep.mubr.f32.mxu0 %v302_v16  ;;  %4370 = vmatprep.mubr.f32.mxu1 %v432_v4  ;;  %v324_v16 = vld [vmem:[%s4882_s10 + $0x3b0] sm:$0xff] }
 0x139   : > { %4176 = vmatmul.mubr.f32.gmra.mrb[96].mxu0 %v303_v17  ;;  %4371 = vmatmul.mubr.f32.gmra.mrb[96].mxu1 %v433_v5  ;;  %v333_v5 = vld [vmem:[%s4882_s10 + $0x3f8] sm:$0xff] }
 0x13a   : > { %4178 = vmatprep.mubr.f32.mxu0 %v304_v18  ;;  %4373 = vmatprep.mubr.f32.mxu1 %v434_v26 }
 0x13d   : > { %4179 = vmatmul.mubr.f32.gmra.mrb[98].mxu0 %v305_v19 }
 0x13e   : > { %4181 = vmatprep.mubr.f32.mxu0 %v306_v22 }
 0x141   : > { %4182 = vmatmul.mubr.f32.gmra.mrb[100].mxu0 %v307_v23 }
 0x142   : > { %4184 = vmatprep.mubr.f32.mxu0 %v308_v24 }
 0x145   : > { %4185 = vmatmul.mubr.f32.gmra.mrb[102].mxu0 %v309_v25  ;;  %v325_v25 = vld [vmem:[%s4882_s10 + $0x3b8] sm:$0xff] }
 0x146   : > { %4187 = vmatprep.mubr.f32.mxu0 %v310_v28  ;;  %v435_v28 = vld [vmem:[%s4882_s10 + $0x728] sm:$0xff] }
 0x147   : > { %4374 = vmatmul.mubr.f32.gmra.mrb[98].mxu1 %v435_v28 }
 0x149   : > { %4188 = vmatmul.mubr.f32.gmra.mrb[104].mxu0 %v311_v29 }
 0x14a   : > { %4190 = vmatprep.mubr.f32.mxu0 %v312_v30 }
 0x14c   : > { %v4033_v35 = vpop.f32.mrb[0].mxu0  ;;  %v4228_v36 = vpop.f32.mrb[0].mxu1 }
 0x14d   : > { %1825 = vst.msk [vmem:[#allocation2 + $0x8] sm:$0xff] %vm1823_vm0, %v4033_v35  ;;  %1955 = vst.msk [vmem:[#allocation2 + $0x418] sm:$0xff] %vm1823_vm0, %v4228_v36  ;;  %v544_v37 = vpop.f32.mrb[1].mxu0  ;;  %4191 = vmatmul.mubr.f32.gmra.mrb[106].mxu0 %v313_v31  ;;  %v1194_v38 = vpop.f32.mrb[1].mxu1 }
 0x14e   : > { %1824 = vst.msk [vmem:[#allocation2] sm:$0xff] %vm1823_vm0, %v544_v37  ;;  %1954 = vst.msk [vmem:[#allocation2 + $0x410] sm:$0xff] %vm1823_vm0, %v1194_v38  ;;  %4193 = vmatprep.mubr.f32.mxu0 %v314_v34  ;;  %v327_v37 = vld [vmem:[%s4882_s10 + $0x3c8] sm:$0xff]  ;;  %v328_v38 = vld [vmem:[%s4882_s10 + $0x3d0] sm:$0xff] }
 0x150   : > { %v4036_v43 = vpop.f32.mrb[2].mxu0  ;;  %v4231_v44 = vpop.f32.mrb[2].mxu1 }
 0x151   : > { %1827 = vst.msk [vmem:[#allocation2 + $0x18] sm:$0xff] %vm1823_vm0, %v4036_v43  ;;  %1957 = vst.msk [vmem:[#allocation2 + $0x428] sm:$0xff] %vm1823_vm0, %v4231_v44  ;;  %v554_v45 = vpop.f32.mrb[3].mxu0  ;;  %4194 = vmatmul.mubr.f32.gmra.mrb[108].mxu0 %v315_v39  ;;  %v1204_v46 = vpop.f32.mrb[3].mxu1 }
 0x152   : > { %1826 = vst.msk [vmem:[#allocation2 + $0x10] sm:$0xff] %vm1823_vm0, %v554_v45  ;;  %1956 = vst.msk [vmem:[#allocation2 + $0x420] sm:$0xff] %vm1823_vm0, %v1204_v46  ;;  %4196 = vmatprep.mubr.f32.mxu0 %v316_v42 }
 0x154   : > { %v4039_v49 = vpop.f32.mrb[4].mxu0  ;;  %v4234_v50 = vpop.f32.mrb[4].mxu1  ;;  %v2794_v51 = vld [vmem:[#allocation2 + $0x418] sm:$0xff]  ;;  %v2081_v52 = vld [vmem:[#allocation2 + $0x8] sm:$0xff] }
 0x155   : > { %1829 = vst.msk [vmem:[#allocation2 + $0x28] sm:$0xff] %vm1823_vm0, %v4039_v49  ;;  %1959 = vst.msk [vmem:[#allocation2 + $0x438] sm:$0xff] %vm1823_vm0, %v4234_v50  ;;  %v564_v53 = vpop.f32.mrb[5].mxu0  ;;  %4197 = vmatmul.mubr.f32.gmra.mrb[110].mxu0 %v317_v47  ;;  %v1214_v54 = vpop.f32.mrb[5].mxu1  ;;  %v2080_v55 = vld [vmem:[#allocation2] sm:$0xff]  ;;  %v2793_v56 = vld [vmem:[#allocation2 + $0x410] sm:$0xff] }
 0x156   : > { %2810 = vst.msk [vmem:[#allocation3 + $0x38] sm:$0xff] %vm1823_vm0, %v2794_v51  ;;  %2097 = vst.msk [vmem:[#allocation3 + $0x10] sm:$0xff] %vm1823_vm0, %v2081_v52  ;;  %4199 = vmatprep.mubr.f32.mxu0 %v318_v48  ;;  %v329_v47 = vld [vmem:[%s4882_s10 + $0x3d8] sm:$0xff]  ;;  %v436_v48 = vld [vmem:[%s4882_s10 + $0x730] sm:$0xff] }
 0x157   : > { %1828 = vst.msk [vmem:[#allocation2 + $0x20] sm:$0xff] %vm1823_vm0, %v564_v53  ;;  %1958 = vst.msk [vmem:[#allocation2 + $0x430] sm:$0xff] %vm1823_vm0, %v1214_v54  ;;  %v330_v49 = vld [vmem:[%s4882_s10 + $0x3e0] sm:$0xff]  ;;  %4376 = vmatprep.mubr.f32.mxu1 %v436_v48  ;;  %v437_v50 = vld [vmem:[%s4882_s10 + $0x738] sm:$0xff] }
 0x158   : > { %2096 = vst.msk [vmem:[#allocation3] sm:$0xff] %vm1823_vm0, %v2080_v55  ;;  %2809 = vst.msk [vmem:[#allocation3 + $0x28] sm:$0xff] %vm1823_vm0, %v2793_v56  ;;  %v4042_v59 = vpop.f32.mrb[6].mxu0  ;;  %v4237_v60 = vpop.f32.mrb[6].mxu1  ;;  %v2083_v61 = vld [vmem:[#allocation2 + $0x18] sm:$0xff]  ;;  %v2796_v62 = vld [vmem:[#allocation2 + $0x428] sm:$0xff]  ;;  %4377 = vmatmul.mubr.f32.gmra.mrb[100].mxu1 %v437_v50 }
 0x159   : > { %1831 = vst.msk [vmem:[#allocation2 + $0x38] sm:$0xff] %vm1823_vm0, %v4042_v59  ;;  %1961 = vst.msk [vmem:[#allocation2 + $0x448] sm:$0xff] %vm1823_vm0, %v4237_v60  ;;  %v574_v63 = vpop.f32.mrb[7].mxu0  ;;  %4200 = vmatmul.mubr.f32.gmra.mrb[112].mxu0 %v319_v57  ;;  %v1224_v0 = vpop.f32.mrb[7].mxu1  ;;  %v2082_v1 = vld [vmem:[#allocation2 + $0x10] sm:$0xff]  ;;  %v2795_v2 = vld [vmem:[#allocation2 + $0x420] sm:$0xff] }
 0x15a   : > { %2099 = vst.msk [vmem:[#allocation3 + $0x30] sm:$0xff] %vm1823_vm0, %v2083_v61  ;;  %2812 = vst.msk [vmem:[#allocation3 + $0x58] sm:$0xff] %vm1823_vm0, %v2796_v62  ;;  %4202 = vmatprep.mubr.f32.mxu0 %v320_v58  ;;  %v331_v59 = vld [vmem:[%s4882_s10 + $0x3e8] sm:$0xff]  ;;  %v332_v60 = vld [vmem:[%s4882_s10 + $0x3f0] sm:$0xff] }
 0x15b   : > { %1830 = vst.msk [vmem:[#allocation2 + $0x30] sm:$0xff] %vm1823_vm0, %v574_v63  ;;  %1960 = vst.msk [vmem:[#allocation2 + $0x440] sm:$0xff] %vm1823_vm0, %v1224_v0 }
 0x15c   : > { %2098 = vst.msk [vmem:[#allocation3 + $0x20] sm:$0xff] %vm1823_vm0, %v2082_v1  ;;  %2811 = vst.msk [vmem:[#allocation3 + $0x48] sm:$0xff] %vm1823_vm0, %v2795_v2  ;;  %v4045_v7 = vpop.f32.mrb[8].mxu0  ;;  %v4240_v8 = vpop.f32.mrb[8].mxu1  ;;  %v2085_v9 = vld [vmem:[#allocation2 + $0x28] sm:$0xff]  ;;  %v2798_v10 = vld [vmem:[#allocation2 + $0x438] sm:$0xff] }
 0x15d   : > { %1833 = vst.msk [vmem:[#allocation2 + $0x48] sm:$0xff] %vm1823_vm0, %v4045_v7  ;;  %1963 = vst.msk [vmem:[#allocation2 + $0x458] sm:$0xff] %vm1823_vm0, %v4240_v8  ;;  %v584_v11 = vpop.f32.mrb[9].mxu0  ;;  %4203 = vmatmul.mubr.f32.gmra.mrb[114].mxu0 %v321_v3  ;;  %v1234_v12 = vpop.f32.mrb[9].mxu1  ;;  %v334_v7 = vld [vmem:[%s4882_s10 + $0x400] sm:$0xff]  ;;  %v439_v8 = vld [vmem:[%s4882_s10 + $0x748] sm:$0xff] }
 0x15e   : > { %2101 = vst.msk [vmem:[#allocation3 + $0x50] sm:$0xff] %vm1823_vm0, %v2085_v9  ;;  %v2084_v13 = vld [vmem:[#allocation2 + $0x20] sm:$0xff]  ;;  %2814 = vst.msk [vmem:[#allocation3 + $0x78] sm:$0xff] %vm1823_vm0, %v2798_v10  ;;  %v2797_v14 = vld [vmem:[#allocation2 + $0x430] sm:$0xff]  ;;  %4205 = vmatprep.mubr.f32.mxu0 %v322_v6 }
 0x15f   : > { %1832 = vst.msk [vmem:[#allocation2 + $0x40] sm:$0xff] %vm1823_vm0, %v584_v11  ;;  %1962 = vst.msk [vmem:[#allocation2 + $0x450] sm:$0xff] %vm1823_vm0, %v1234_v12  ;;  %v438_v6 = vld [vmem:[%s4882_s10 + $0x740] sm:$0xff] }
 0x160   : > { %2100 = vst.msk [vmem:[#allocation3 + $0x40] sm:$0xff] %vm1823_vm0, %v2084_v13  ;;  %2813 = vst.msk [vmem:[#allocation3 + $0x68] sm:$0xff] %vm1823_vm0, %v2797_v14  ;;  %v4048_v17 = vpop.f32.mrb[10].mxu0  ;;  %v4243_v18 = vpop.f32.mrb[10].mxu1  ;;  %v2087_v19 = vld [vmem:[#allocation2 + $0x38] sm:$0xff]  ;;  %v2800_v20 = vld [vmem:[#allocation2 + $0x448] sm:$0xff]  ;;  %4379 = vmatprep.mubr.f32.mxu1 %v438_v6 }
 0x161   : > { %1835 = vst.msk [vmem:[#allocation2 + $0x58] sm:$0xff] %vm1823_vm0, %v4048_v17  ;;  %1965 = vst.msk [vmem:[#allocation2 + $0x468] sm:$0xff] %vm1823_vm0, %v4243_v18  ;;  %v594_v21 = vpop.f32.mrb[11].mxu0  ;;  %4206 = vmatmul.mubr.f32.gmra.mrb[116].mxu0 %v323_v15  ;;  %v1244_v22 = vpop.f32.mrb[11].mxu1  ;;  %4380 = vmatmul.mubr.f32.gmra.mrb[102].mxu1 %v439_v8  ;;  %v335_v15 = vld [vmem:[%s4882_s10 + $0x408] sm:$0xff] }
 0x162   : > { %2103 = vst.msk [vmem:[#allocation3 + $0x70] sm:$0xff] %vm1823_vm0, %v2087_v19  ;;  %v2086_v23 = vld [vmem:[#allocation2 + $0x30] sm:$0xff]  ;;  %2816 = vst.msk [vmem:[#allocation3 + $0x98] sm:$0xff] %vm1823_vm0, %v2800_v20  ;;  %v2799_v24 = vld [vmem:[#allocation2 + $0x440] sm:$0xff]  ;;  %4208 = vmatprep.mubr.f32.mxu0 %v324_v16 }
 0x163   : > { %1834 = vst.msk [vmem:[#allocation2 + $0x50] sm:$0xff] %vm1823_vm0, %v594_v21  ;;  %1964 = vst.msk [vmem:[#allocation2 + $0x460] sm:$0xff] %vm1823_vm0, %v1244_v22 }
 0x164   : > { %2102 = vst.msk [vmem:[#allocation3 + $0x60] sm:$0xff] %vm1823_vm0, %v2086_v23  ;;  %2815 = vst.msk [vmem:[#allocation3 + $0x88] sm:$0xff] %vm1823_vm0, %v2799_v24  ;;  %v4051_v29 = vpop.f32.mrb[12].mxu0  ;;  %v4246_v30 = vpop.f32.mrb[12].mxu1  ;;  %v2089_v31 = vld [vmem:[#allocation2 + $0x48] sm:$0xff]  ;;  %v2802_v32 = vld [vmem:[#allocation2 + $0x458] sm:$0xff] }
 0x165   : > { %1837 = vst.msk [vmem:[#allocation2 + $0x68] sm:$0xff] %vm1823_vm0, %v4051_v29  ;;  %1967 = vst.msk [vmem:[#allocation2 + $0x478] sm:$0xff] %vm1823_vm0, %v4246_v30  ;;  %v604_v33 = vpop.f32.mrb[13].mxu0  ;;  %4209 = vmatmul.mubr.f32.gmra.mrb[118].mxu0 %v325_v25  ;;  %v1254_v34 = vpop.f32.mrb[13].mxu1  ;;  %v440_v23 = vld [vmem:[%s4882_s10 + $0x750] sm:$0xff]  ;;  %v441_v24 = vld [vmem:[%s4882_s10 + $0x758] sm:$0xff] }
 0x166   : > { %2105 = vst.msk [vmem:[#allocation3 + $0x90] sm:$0xff] %vm1823_vm0, %v2089_v31  ;;  %v2088_v35 = vld [vmem:[#allocation2 + $0x40] sm:$0xff]  ;;  %2818 = vst.msk [vmem:[#allocation3 + $0xb8] sm:$0xff] %vm1823_vm0, %v2802_v32  ;;  %v2801_v36 = vld [vmem:[#allocation2 + $0x450] sm:$0xff]  ;;  %4211 = vmatprep.mubr.f32.mxu0 %v326_v27  ;;  %4382 = vmatprep.mubr.f32.mxu1 %v440_v23 }
 0x167   : > { %1836 = vst.msk [vmem:[#allocation2 + $0x60] sm:$0xff] %vm1823_vm0, %v604_v33  ;;  %1966 = vst.msk [vmem:[#allocation2 + $0x470] sm:$0xff] %vm1823_vm0, %v1254_v34  ;;  %4383 = vmatmul.mubr.f32.gmra.mrb[104].mxu1 %v441_v24 }
 0x168   : > { %2104 = vst.msk [vmem:[#allocation3 + $0x80] sm:$0xff] %vm1823_vm0, %v2088_v35  ;;  %2817 = vst.msk [vmem:[#allocation3 + $0xa8] sm:$0xff] %vm1823_vm0, %v2801_v36  ;;  %v4054_v39 = vpop.f32.mrb[14].mxu0  ;;  %v4249_v40 = vpop.f32.mrb[14].mxu1  ;;  %v2091_v41 = vld [vmem:[#allocation2 + $0x58] sm:$0xff]  ;;  %v2804_v42 = vld [vmem:[#allocation2 + $0x468] sm:$0xff] }
 0x169   : > { %1839 = vst.msk [vmem:[#allocation2 + $0x78] sm:$0xff] %vm1823_vm0, %v4054_v39  ;;  %1969 = vst.msk [vmem:[#allocation2 + $0x488] sm:$0xff] %vm1823_vm0, %v4249_v40  ;;  %v614_v43 = vpop.f32.mrb[15].mxu0  ;;  %4212 = vmatmul.mubr.f32.gmra.mrb[120].mxu0 %v327_v37  ;;  %v1264_v44 = vpop.f32.mrb[15].mxu1  ;;  %v442_v37 = vld [vmem:[%s4882_s10 + $0x760] sm:$0xff]  ;;  %v443_v39 = vld [vmem:[%s4882_s10 + $0x768] sm:$0xff] }
 0x16a   : > { %2107 = vst.msk [vmem:[#allocation3 + $0xb0] sm:$0xff] %vm1823_vm0, %v2091_v41  ;;  %v2090_v45 = vld [vmem:[#allocation2 + $0x50] sm:$0xff]  ;;  %2820 = vst.msk [vmem:[#allocation3 + $0xd8] sm:$0xff] %vm1823_vm0, %v2804_v42  ;;  %v2803_v46 = vld [vmem:[#allocation2 + $0x460] sm:$0xff]  ;;  %4214 = vmatprep.mubr.f32.mxu0 %v328_v38  ;;  %4385 = vmatprep.mubr.f32.mxu1 %v442_v37 }
 0x16b   : > { %1838 = vst.msk [vmem:[#allocation2 + $0x70] sm:$0xff] %vm1823_vm0, %v614_v43  ;;  %1968 = vst.msk [vmem:[#allocation2 + $0x480] sm:$0xff] %vm1823_vm0, %v1264_v44  ;;  %4386 = vmatmul.mubr.f32.gmra.mrb[106].mxu1 %v443_v39 }
 0x16c   : > { %2106 = vst.msk [vmem:[#allocation3 + $0xa0] sm:$0xff] %vm1823_vm0, %v2090_v45  ;;  %2819 = vst.msk [vmem:[#allocation3 + $0xc8] sm:$0xff] %vm1823_vm0, %v2803_v46  ;;  %v4057_v51 = vpop.f32.mrb[16].mxu0  ;;  %v4252_v52 = vpop.f32.mrb[16].mxu1  ;;  %v2093_v53 = vld [vmem:[#allocation2 + $0x68] sm:$0xff]  ;;  %v2806_v54 = vld [vmem:[#allocation2 + $0x478] sm:$0xff] }
 0x16d   : > { %1841 = vst.msk [vmem:[#allocation2 + $0x88] sm:$0xff] %vm1823_vm0, %v4057_v51  ;;  %1971 = vst.msk [vmem:[#allocation2 + $0x498] sm:$0xff] %vm1823_vm0, %v4252_v52  ;;  %v624_v55 = vpop.f32.mrb[17].mxu0  ;;  %4215 = vmatmul.mubr.f32.gmra.mrb[122].mxu0 %v329_v47  ;;  %v1274_v56 = vpop.f32.mrb[17].mxu1  ;;  %v444_v51 = vld [vmem:[%s4882_s10 + $0x770] sm:$0xff] }
 0x16e   : > { %2109 = vst.msk [vmem:[#allocation3 + $0xd0] sm:$0xff] %vm1823_vm0, %v2093_v53  ;;  %v2092_v57 = vld [vmem:[#allocation2 + $0x60] sm:$0xff]  ;;  %2822 = vst.msk [vmem:[#allocation3 + $0xf8] sm:$0xff] %vm1823_vm0, %v2806_v54  ;;  %v2805_v58 = vld [vmem:[#allocation2 + $0x470] sm:$0xff]  ;;  %4217 = vmatprep.mubr.f32.mxu0 %v330_v49  ;;  %4388 = vmatprep.mubr.f32.mxu1 %v444_v51 }
 0x16f   : > { %1840 = vst.msk [vmem:[#allocation2 + $0x80] sm:$0xff] %vm1823_vm0, %v624_v55  ;;  %1970 = vst.msk [vmem:[#allocation2 + $0x490] sm:$0xff] %vm1823_vm0, %v1274_v56  ;;  %v445_v53 = vld [vmem:[%s4882_s10 + $0x778] sm:$0xff] }
 0x170   : > { %2108 = vst.msk [vmem:[#allocation3 + $0xc0] sm:$0xff] %vm1823_vm0, %v2092_v57  ;;  %2821 = vst.msk [vmem:[#allocation3 + $0xe8] sm:$0xff] %vm1823_vm0, %v2805_v58  ;;  %v4060_v61 = vpop.f32.mrb[18].mxu0  ;;  %v2824_v62 = vld [vmem:[#allocation2 + $0x488] sm:$0xff]  ;;  %v4255_v63 = vpop.f32.mrb[18].mxu1  ;;  %v2095_v0 = vld [vmem:[#allocation2 + $0x78] sm:$0xff]  ;;  %4389 = vmatmul.mubr.f32.gmra.mrb[108].mxu1 %v445_v53 }
 0x171   : > { %1843 = vst.msk [vmem:[#allocation2 + $0x98] sm:$0xff] %vm1823_vm0, %v4060_v61  ;;  %2857 = vrot.lane.b32.xlu1 %v2824_v62, %s4698_s20  ;;  %v634_v1 = vpop.f32.mrb[19].mxu0  ;;  %4218 = vmatmul.mubr.f32.gmra.mrb[124].mxu0 %v331_v59  ;;  %1973 = vst.msk [vmem:[#allocation2 + $0x4a8] sm:$0xff] %vm1823_vm0, %v4255_v63  ;;  %v1284_v3 = vpop.f32.mrb[19].mxu1  ;;  %v446_v59 = vld [vmem:[%s4882_s10 + $0x780] sm:$0xff]  ;;  %v447_v61 = vld [vmem:[%s4882_s10 + $0x788] sm:$0xff] }
 0x172   : > { %v2823_v2 = vld [vmem:[#allocation2 + $0x480] sm:$0xff]  ;;  %2111 = vst.msk [vmem:[#allocation3 + $0xf0] sm:$0xff] %vm1823_vm0, %v2095_v0  ;;  %v2094_v4 = vld [vmem:[#allocation2 + $0x70] sm:$0xff]  ;;  %1842 = vst.msk [vmem:[#allocation2 + $0x90] sm:$0xff] %vm1823_vm0, %v634_v1  ;;  %4220 = vmatprep.mubr.f32.mxu0 %v332_v60  ;;  %4391 = vmatprep.mubr.f32.mxu1 %v446_v59 }
 0x173   : > { %2855 = vrot.lane.b32.xlu0 %v2823_v2, %s4698_s20  ;;  %1972 = vst.msk [vmem:[#allocation2 + $0x4a0] sm:$0xff] %vm1823_vm0, %v1284_v3  ;;  %2110 = vst.msk [vmem:[#allocation3 + $0xe0] sm:$0xff] %vm1823_vm0, %v2094_v4  ;;  %v455_v59 = vld [vmem:[%s4882_s10 + $0x7c8] sm:$0xff] }
 0x174   : > { %v2826_v9 = vld [vmem:[#allocation2 + $0x498] sm:$0xff]  ;;  %v2113_v10 = vld [vmem:[#allocation2 + $0x88] sm:$0xff]  ;;  %v4063_v11 = vpop.f32.mrb[20].mxu0  ;;  %v4258_v12 = vpop.f32.mrb[20].mxu1  ;;  %4392 = vmatmul.mubr.f32.gmra.mrb[110].mxu1 %v447_v61 }
 0x175   : > { %2861 = vrot.lane.b32.xlu1 %v2826_v9, %s4698_s20  ;;  %4221 = vmatmul.mubr.f32.gmra.mrb[126].mxu0 %v333_v5  ;;  %1845 = vst.msk [vmem:[#allocation2 + $0xa8] sm:$0xff] %vm1823_vm0, %v4063_v11  ;;  %v644_v13 = vpop.f32.mrb[21].mxu0  ;;  %1975 = vst.msk [vmem:[#allocation2 + $0x4b8] sm:$0xff] %vm1823_vm0, %v4258_v12  ;;  %v1294_v14 = vpop.f32.mrb[21].mxu1 }
 0x176   : > { %4223 = vmatprep.mubr.f32.mxu0 %v334_v7  ;;  %1844 = vst.msk [vmem:[#allocation2 + $0xa0] sm:$0xff] %vm1823_vm0, %v644_v13  ;;  %1974 = vst.msk [vmem:[#allocation2 + $0x4b0] sm:$0xff] %vm1823_vm0, %v1294_v14  ;;  %v2112_v19 = vld [vmem:[#allocation2 + $0x80] sm:$0xff]  ;;  %v2825_v27 = vld [vmem:[#allocation2 + $0x490] sm:$0xff] }
 0x177   : > { %2146 = vrot.lane.b32.xlu0 %v2113_v10, %s4698_s20 }
 0x178   : > { %v2115_v16 = vld [vmem:[#allocation2 + $0x98] sm:$0xff]  ;;  %v4066_v17 = vpop.f32.mrb[22].mxu0  ;;  %v4261_v18 = vpop.f32.mrb[22].mxu1  ;;  %v2828_v22 = vld [vmem:[#allocation2 + $0x4a8] sm:$0xff] }
 0x179   : > { %4224 = vmatmul.mubr.f32.gmra.mrb[128].mxu0 %v335_v15  ;;  %2150 = vrot.lane.b32.xlu1 %v2115_v16, %s4698_s20  ;;  %1847 = vst.msk [vmem:[#allocation2 + $0xb8] sm:$0xff] %vm1823_vm0, %v4066_v17  ;;  %v654_v20 = vpop.f32.mrb[23].mxu0  ;;  %1977 = vst.msk [vmem:[#allocation2 + $0x4c8] sm:$0xff] %vm1823_vm0, %v4261_v18  ;;  %v1304_v21 = vpop.f32.mrb[23].mxu1  ;;  %v2114_v30 = vld [vmem:[#allocation2 + $0x90] sm:$0xff]  ;;  %v448_v15 = vld [vmem:[%s4882_s10 + $0x790] sm:$0xff] }
 0x17a   : > { %1846 = vst.msk [vmem:[#allocation2 + $0xb0] sm:$0xff] %vm1823_vm0, %v654_v20  ;;  %1976 = vst.msk [vmem:[#allocation2 + $0x4c0] sm:$0xff] %vm1823_vm0, %v1304_v21  ;;  %v2827_v33 = vld [vmem:[#allocation2 + $0x4a0] sm:$0xff]  ;;  %4394 = vmatprep.mubr.f32.mxu1 %v448_v15  ;;  %v449_v17 = vld [vmem:[%s4882_s10 + $0x798] sm:$0xff] }
 0x17b   : > { %2144 = vrot.lane.b32.xlu0 %v2112_v19, %s4698_s20  ;;  %4395 = vmatmul.mubr.f32.gmra.mrb[112].mxu1 %v449_v17 }
 0x17c   : > { %v4069_v25 = vpop.f32.mrb[24].mxu0  ;;  %v4264_v26 = vpop.f32.mrb[24].mxu1  ;;  %v2117_v36 = vld [vmem:[#allocation2 + $0xa8] sm:$0xff]  ;;  %v2830_v44 = vld [vmem:[#allocation2 + $0x4b8] sm:$0xff] }
 0x17d   : > { %2865 = vrot.lane.b32.xlu1 %v2828_v22, %s4698_s20  ;;  %1849 = vst.msk [vmem:[#allocation2 + $0xc8] sm:$0xff] %vm1823_vm0, %v4069_v25  ;;  %v664_v28 = vpop.f32.mrb[25].mxu0  ;;  %1979 = vst.msk [vmem:[#allocation2 + $0x4d8] sm:$0xff] %vm1823_vm0, %v4264_v26  ;;  %v1314_v29 = vpop.f32.mrb[25].mxu1  ;;  %v2116_v38 = vld [vmem:[#allocation2 + $0xa0] sm:$0xff]  ;;  %v2829_v45 = vld [vmem:[#allocation2 + $0x4b0] sm:$0xff] }
 0x17e   : > { %1848 = vst.msk [vmem:[#allocation2 + $0xc0] sm:$0xff] %vm1823_vm0, %v664_v28  ;;  %1978 = vst.msk [vmem:[#allocation2 + $0x4d0] sm:$0xff] %vm1823_vm0, %v1314_v29  ;;  %v450_v29 = vld [vmem:[%s4882_s10 + $0x7a0] sm:$0xff] }
 0x17f   : > { %2859 = vrot.lane.b32.xlu0 %v2825_v27, %s4698_s20  ;;  %4397 = vmatprep.mubr.f32.mxu1 %v450_v29 }
 0x180   : > { %v4072_v31 = vpop.f32.mrb[26].mxu0  ;;  %v4267_v32 = vpop.f32.mrb[26].mxu1  ;;  %v2119_v50 = vld [vmem:[#allocation2 + $0xb8] sm:$0xff]  ;;  %v2832_v58 = vld [vmem:[#allocation2 + $0x4c8] sm:$0xff] }
 0x181   : > { %2148 = vrot.lane.b32.xlu1 %v2114_v30, %s4698_s20  ;;  %1851 = vst.msk [vmem:[#allocation2 + $0xd8] sm:$0xff] %vm1823_vm0, %v4072_v31  ;;  %v674_v34 = vpop.f32.mrb[27].mxu0  ;;  %1981 = vst.msk [vmem:[#allocation2 + $0x4e8] sm:$0xff] %vm1823_vm0, %v4267_v32  ;;  %v1324_v35 = vpop.f32.mrb[27].mxu1  ;;  %v2118_v52 = vld [vmem:[#allocation2 + $0xb0] sm:$0xff]  ;;  %v2831_v60 = vld [vmem:[#allocation2 + $0x4c0] sm:$0xff] }
 0x182   : > { %1850 = vst.msk [vmem:[#allocation2 + $0xd0] sm:$0xff] %vm1823_vm0, %v674_v34  ;;  %1980 = vst.msk [vmem:[#allocation2 + $0x4e0] sm:$0xff] %vm1823_vm0, %v1324_v35  ;;  %v451_v31 = vld [vmem:[%s4882_s10 + $0x7a8] sm:$0xff] }
 0x183   : > { %2863 = vrot.lane.b32.xlu0 %v2827_v33, %s4698_s20  ;;  %4398 = vmatmul.mubr.f32.gmra.mrb[114].mxu1 %v451_v31 }
 0x184   : > { %v4075_v40 = vpop.f32.mrb[28].mxu0  ;;  %v4270_v41 = vpop.f32.mrb[28].mxu1  ;;  %v2121_v2 = vld [vmem:[#allocation2 + $0xc8] sm:$0xff]  ;;  %v2834_v8 = vld [vmem:[#allocation2 + $0x4d8] sm:$0xff] }
 0x185   : > { %2154 = vrot.lane.b32.xlu1 %v2117_v36, %s4698_s20  ;;  %1853 = vst.msk [vmem:[#allocation2 + $0xe8] sm:$0xff] %vm1823_vm0, %v4075_v40  ;;  %v684_v42 = vpop.f32.mrb[29].mxu0  ;;  %1983 = vst.msk [vmem:[#allocation2 + $0x4f8] sm:$0xff] %vm1823_vm0, %v4270_v41  ;;  %v1334_v43 = vpop.f32.mrb[29].mxu1  ;;  %v2120_v3 = vld [vmem:[#allocation2 + $0xc0] sm:$0xff]  ;;  %v2833_v9 = vld [vmem:[#allocation2 + $0x4d0] sm:$0xff] }
 0x186   : > { %1852 = vst.msk [vmem:[#allocation2 + $0xe0] sm:$0xff] %vm1823_vm0, %v684_v42  ;;  %1982 = vst.msk [vmem:[#allocation2 + $0x4f0] sm:$0xff] %vm1823_vm0, %v1334_v43  ;;  %v452_v43 = vld [vmem:[%s4882_s10 + $0x7b0] sm:$0xff] }
 0x187   : > { %2152 = vrot.lane.b32.xlu0 %v2116_v38, %s4698_s20  ;;  %4400 = vmatprep.mubr.f32.mxu1 %v452_v43 }
 0x188   : > { %v4078_v46 = vpop.f32.mrb[30].mxu0  ;;  %v4273_v47 = vpop.f32.mrb[30].mxu1  ;;  %v2123_v14 = vld [vmem:[#allocation2 + $0xd8] sm:$0xff]  ;;  %v2836_v22 = vld [vmem:[#allocation2 + $0x4e8] sm:$0xff] }
 0x189   : > { %2869 = vrot.lane.b32.xlu1 %v2830_v44, %s4698_s20  ;;  %1855 = vst.msk [vmem:[#allocation2 + $0xf8] sm:$0xff] %vm1823_vm0, %v4078_v46  ;;  %v694_v48 = vpop.f32.mrb[31].mxu0  ;;  %1985 = vst.msk [vmem:[#allocation2 + $0x508] sm:$0xff] %vm1823_vm0, %v4273_v47  ;;  %v1344_v49 = vpop.f32.mrb[31].mxu1  ;;  %v2122_v16 = vld [vmem:[#allocation2 + $0xd0] sm:$0xff]  ;;  %v2835_v23 = vld [vmem:[#allocation2 + $0x4e0] sm:$0xff] }
 0x18a   : > { %1854 = vst.msk [vmem:[#allocation2 + $0xf0] sm:$0xff] %vm1823_vm0, %v694_v48  ;;  %1984 = vst.msk [vmem:[#allocation2 + $0x500] sm:$0xff] %vm1823_vm0, %v1344_v49 }
 0x18b   : > { %2867 = vrot.lane.b32.xlu0 %v2829_v45, %s4698_s20  ;;  %v453_v45 = vld [vmem:[%s4882_s10 + $0x7b8] sm:$0xff] }
 0x18c   : > { %v4081_v54 = vpop.f32.mrb[32].mxu0  ;;  %v4276_v55 = vpop.f32.mrb[32].mxu1  ;;  %v2125_v28 = vld [vmem:[#allocation2 + $0xe8] sm:$0xff]  ;;  %v2838_v36 = vld [vmem:[#allocation2 + $0x4f8] sm:$0xff]  ;;  %4401 = vmatmul.mubr.f32.gmra.mrb[116].mxu1 %v453_v45 }
 0x18d   : > { %2158 = vrot.lane.b32.xlu1 %v2119_v50, %s4698_s20  ;;  %1857 = vst.msk [vmem:[#allocation2 + $0x108] sm:$0xff] %vm1823_vm0, %v4081_v54  ;;  %v704_v56 = vpop.f32.mrb[33].mxu0  ;;  %1987 = vst.msk [vmem:[#allocation2 + $0x518] sm:$0xff] %vm1823_vm0, %v4276_v55  ;;  %v1354_v57 = vpop.f32.mrb[33].mxu1  ;;  %v2124_v30 = vld [vmem:[#allocation2 + $0xe0] sm:$0xff]  ;;  %v2837_v37 = vld [vmem:[#allocation2 + $0x4f0] sm:$0xff] }
 0x18e   : > { %1856 = vst.msk [vmem:[#allocation2 + $0x100] sm:$0xff] %vm1823_vm0, %v704_v56  ;;  %1986 = vst.msk [vmem:[#allocation2 + $0x510] sm:$0xff] %vm1823_vm0, %v1354_v57  ;;  %v454_v57 = vld [vmem:[%s4882_s10 + $0x7c0] sm:$0xff] }
 0x18f   : > { %2156 = vrot.lane.b32.xlu0 %v2118_v52, %s4698_s20  ;;  %4403 = vmatprep.mubr.f32.mxu1 %v454_v57 }
 0x190   : > { %v4084_v62 = vpop.f32.mrb[34].mxu0  ;;  %v4279_v63 = vpop.f32.mrb[34].mxu1  ;;  %v2127_v42 = vld [vmem:[#allocation2 + $0xf8] sm:$0xff]  ;;  %v2920_v50 = vld [vmem:[#allocation2 + $0x508] sm:$0xff]  ;;  %4404 = vmatmul.mubr.f32.gmra.mrb[118].mxu1 %v455_v59 }
 0x191   : > { %2873 = vrot.lane.b32.xlu1 %v2832_v58, %s4698_s20  ;;  %1859 = vst.msk [vmem:[#allocation2 + $0x118] sm:$0xff] %vm1823_vm0, %v4084_v62  ;;  %v714_v0 = vpop.f32.mrb[35].mxu0  ;;  %1989 = vst.msk [vmem:[#allocation2 + $0x528] sm:$0xff] %vm1823_vm0, %v4279_v63  ;;  %v1364_v1 = vpop.f32.mrb[35].mxu1  ;;  %v2126_v44 = vld [vmem:[#allocation2 + $0xf0] sm:$0xff]  ;;  %v2919_v51 = vld [vmem:[#allocation2 + $0x500] sm:$0xff] }
 0x192   : > { %1858 = vst.msk [vmem:[#allocation2 + $0x110] sm:$0xff] %vm1823_vm0, %v714_v0  ;;  %1988 = vst.msk [vmem:[#allocation2 + $0x520] sm:$0xff] %vm1823_vm0, %v1364_v1 }
 0x193   : > { %2871 = vrot.lane.b32.xlu0 %v2831_v60, %s4698_s20 }
 0x194   : > { %v4087_v4 = vpop.f32.mrb[36].mxu0  ;;  %v4282_v5 = vpop.f32.mrb[36].mxu1  ;;  %v2210_v56 = vld [vmem:[#allocation2 + $0x108] sm:$0xff]  ;;  %v2922_v0 = vld [vmem:[#allocation2 + $0x518] sm:$0xff] }
 0x195   : > { %2162 = vrot.lane.b32.xlu1 %v2121_v2, %s4698_s20  ;;  %1861 = vst.msk [vmem:[#allocation2 + $0x128] sm:$0xff] %vm1823_vm0, %v4087_v4  ;;  %v724_v6 = vpop.f32.mrb[37].mxu0  ;;  %1991 = vst.msk [vmem:[#allocation2 + $0x538] sm:$0xff] %vm1823_vm0, %v4282_v5  ;;  %v1374_v7 = vpop.f32.mrb[37].mxu1  ;;  %v2209_v58 = vld [vmem:[#allocation2 + $0x100] sm:$0xff]  ;;  %v2921_v1 = vld [vmem:[#allocation2 + $0x510] sm:$0xff] }
 0x196   : > { %1860 = vst.msk [vmem:[#allocation2 + $0x120] sm:$0xff] %vm1823_vm0, %v724_v6  ;;  %1990 = vst.msk [vmem:[#allocation2 + $0x530] sm:$0xff] %vm1823_vm0, %v1374_v7  ;;  %v456_v7 = vld [vmem:[%s4882_s10 + $0x7d0] sm:$0xff] }
 0x197   : > { %2160 = vrot.lane.b32.xlu0 %v2120_v3, %s4698_s20  ;;  %4406 = vmatprep.mubr.f32.mxu1 %v456_v7 }
 0x198   : > { %v4090_v10 = vpop.f32.mrb[38].mxu0  ;;  %v4285_v11 = vpop.f32.mrb[38].mxu1  ;;  %v2212_v6 = vld [vmem:[#allocation2 + $0x118] sm:$0xff] }
 0x199   : > { %2877 = vrot.lane.b32.xlu1 %v2834_v8, %s4698_s20  ;;  %1863 = vst.msk [vmem:[#allocation2 + $0x138] sm:$0xff] %vm1823_vm0, %v4090_v10  ;;  %v734_v12 = vpop.f32.mrb[39].mxu0  ;;  %1993 = vst.msk [vmem:[#allocation2 + $0x548] sm:$0xff] %vm1823_vm0, %v4285_v11  ;;  %v1384_v13 = vpop.f32.mrb[39].mxu1  ;;  %v2211_v8 = vld [vmem:[#allocation2 + $0x110] sm:$0xff]  ;;  %v2923_v15 = vld [vmem:[#allocation2 + $0x520] sm:$0xff] }
 0x19a   : > { %1862 = vst.msk [vmem:[#allocation2 + $0x130] sm:$0xff] %vm1823_vm0, %v734_v12  ;;  %1992 = vst.msk [vmem:[#allocation2 + $0x540] sm:$0xff] %vm1823_vm0, %v1384_v13 }
 0x19b   : > { %2875 = vrot.lane.b32.xlu0 %v2833_v9, %s4698_s20  ;;  %v457_v9 = vld [vmem:[%s4882_s10 + $0x7d8] sm:$0xff] }
 0x19c   : > { %v4093_v18 = vpop.f32.mrb[40].mxu0  ;;  %v4288_v19 = vpop.f32.mrb[40].mxu1  ;;  %4407 = vmatmul.mubr.f32.gmra.mrb[120].mxu1 %v457_v9 }
 0x19d   : > { %2166 = vrot.lane.b32.xlu1 %v2123_v14, %s4698_s20  ;;  %1865 = vst.msk [vmem:[#allocation2 + $0x148] sm:$0xff] %vm1823_vm0, %v4093_v18  ;;  %v744_v20 = vpop.f32.mrb[41].mxu0  ;;  %1995 = vst.msk [vmem:[#allocation2 + $0x558] sm:$0xff] %vm1823_vm0, %v4288_v19  ;;  %v1394_v21 = vpop.f32.mrb[41].mxu1  ;;  %v2924_v14 = vld [vmem:[#allocation2 + $0x528] sm:$0xff]  ;;  %v2925_v29 = vld [vmem:[#allocation2 + $0x530] sm:$0xff] }
 0x19e   : > { %1864 = vst.msk [vmem:[#allocation2 + $0x140] sm:$0xff] %vm1823_vm0, %v744_v20  ;;  %1994 = vst.msk [vmem:[#allocation2 + $0x550] sm:$0xff] %vm1823_vm0, %v1394_v21  ;;  %v2214_v20 = vld [vmem:[#allocation2 + $0x128] sm:$0xff]  ;;  %v458_v21 = vld [vmem:[%s4882_s10 + $0x7e0] sm:$0xff] }
 0x19f   : > { %2164 = vrot.lane.b32.xlu0 %v2122_v16, %s4698_s20  ;;  %4409 = vmatprep.mubr.f32.mxu1 %v458_v21 }
 0x1a0   : > { %v4096_v24 = vpop.f32.mrb[42].mxu0  ;;  %v4291_v25 = vpop.f32.mrb[42].mxu1 }
 0x1a1   : > { %2881 = vrot.lane.b32.xlu1 %v2836_v22, %s4698_s20  ;;  %1867 = vst.msk [vmem:[#allocation2 + $0x158] sm:$0xff] %vm1823_vm0, %v4096_v24  ;;  %v754_v26 = vpop.f32.mrb[43].mxu0  ;;  %1997 = vst.msk [vmem:[#allocation2 + $0x568] sm:$0xff] %vm1823_vm0, %v4291_v25  ;;  %v1404_v27 = vpop.f32.mrb[43].mxu1  ;;  %v2213_v22 = vld [vmem:[#allocation2 + $0x120] sm:$0xff] }
 0x1a2   : > { %1866 = vst.msk [vmem:[#allocation2 + $0x150] sm:$0xff] %vm1823_vm0, %v754_v26  ;;  %1996 = vst.msk [vmem:[#allocation2 + $0x560] sm:$0xff] %vm1823_vm0, %v1404_v27  ;;  %v2927_v43 = vld [vmem:[#allocation2 + $0x540] sm:$0xff] }
 0x1a3   : > { %2879 = vrot.lane.b32.xlu0 %v2835_v23, %s4698_s20  ;;  %v459_v23 = vld [vmem:[%s4882_s10 + $0x7e8] sm:$0xff] }
 0x1a4   : > { %v4099_v32 = vpop.f32.mrb[44].mxu0  ;;  %v4294_v33 = vpop.f32.mrb[44].mxu1  ;;  %4410 = vmatmul.mubr.f32.gmra.mrb[122].mxu1 %v459_v23 }
 0x1a5   : > { %2170 = vrot.lane.b32.xlu1 %v2125_v28, %s4698_s20  ;;  %1869 = vst.msk [vmem:[#allocation2 + $0x168] sm:$0xff] %vm1823_vm0, %v4099_v32  ;;  %v764_v34 = vpop.f32.mrb[45].mxu0  ;;  %1999 = vst.msk [vmem:[#allocation2 + $0x578] sm:$0xff] %vm1823_vm0, %v4294_v33  ;;  %v1414_v35 = vpop.f32.mrb[45].mxu1  ;;  %v2926_v28 = vld [vmem:[#allocation2 + $0x538] sm:$0xff] }
 0x1a6   : > { %1868 = vst.msk [vmem:[#allocation2 + $0x160] sm:$0xff] %vm1823_vm0, %v764_v34  ;;  %1998 = vst.msk [vmem:[#allocation2 + $0x570] sm:$0xff] %vm1823_vm0, %v1414_v35  ;;  %v2216_v34 = vld [vmem:[#allocation2 + $0x138] sm:$0xff]  ;;  %v460_v35 = vld [vmem:[%s4882_s10 + $0x7f0] sm:$0xff] }
 0x1a7   : > { %2168 = vrot.lane.b32.xlu0 %v2124_v30, %s4698_s20  ;;  %4412 = vmatprep.mubr.f32.mxu1 %v460_v35 }
 0x1a8   : > { %v4102_v38 = vpop.f32.mrb[46].mxu0  ;;  %v4297_v39 = vpop.f32.mrb[46].mxu1 }
 0x1a9   : > { %2885 = vrot.lane.b32.xlu1 %v2838_v36, %s4698_s20  ;;  %1871 = vst.msk [vmem:[#allocation2 + $0x178] sm:$0xff] %vm1823_vm0, %v4102_v38  ;;  %v774_v40 = vpop.f32.mrb[47].mxu0  ;;  %2001 = vst.msk [vmem:[#allocation2 + $0x588] sm:$0xff] %vm1823_vm0, %v4297_v39  ;;  %v1424_v41 = vpop.f32.mrb[47].mxu1  ;;  %v2215_v36 = vld [vmem:[#allocation2 + $0x130] sm:$0xff] }
 0x1aa   : > { %1870 = vst.msk [vmem:[#allocation2 + $0x170] sm:$0xff] %vm1823_vm0, %v774_v40  ;;  %2000 = vst.msk [vmem:[#allocation2 + $0x580] sm:$0xff] %vm1823_vm0, %v1424_v41 }
 0x1ab   : > { %2883 = vrot.lane.b32.xlu0 %v2837_v37, %s4698_s20  ;;  %v461_v37 = vld [vmem:[%s4882_s10 + $0x7f8] sm:$0xff]  ;;  %s4700_s10 = smov 48  }
 0x1ac   : > { %v4105_v46 = vpop.f32.mrb[48].mxu0  ;;  %v4300_v47 = vpop.f32.mrb[48].mxu1  ;;  %4413 = vmatmul.mubr.f32.gmra.mrb[124].mxu1 %v461_v37 }
 0x1ad   : > { %2174 = vrot.lane.b32.xlu1 %v2127_v42, %s4698_s20  ;;  %1873 = vst.msk [vmem:[#allocation2 + $0x188] sm:$0xff] %vm1823_vm0, %v4105_v46  ;;  %v784_v48 = vpop.f32.mrb[49].mxu0  ;;  %2003 = vst.msk [vmem:[#allocation2 + $0x598] sm:$0xff] %vm1823_vm0, %v4300_v47  ;;  %v1434_v49 = vpop.f32.mrb[49].mxu1  ;;  %v2928_v42 = vld [vmem:[#allocation2 + $0x548] sm:$0xff] }
 0x1ae   : > { %1872 = vst.msk [vmem:[#allocation2 + $0x180] sm:$0xff] %vm1823_vm0, %v784_v48  ;;  %2002 = vst.msk [vmem:[#allocation2 + $0x590] sm:$0xff] %vm1823_vm0, %v1434_v49  ;;  %v2218_v48 = vld [vmem:[#allocation2 + $0x148] sm:$0xff]  ;;  %v2217_v49 = vld [vmem:[#allocation2 + $0x140] sm:$0xff] }
 0x1af   : > { %2172 = vrot.lane.b32.xlu0 %v2126_v44, %s4698_s20 }
 0x1b0   : > { %v4108_v52 = vpop.f32.mrb[50].mxu0  ;;  %v4303_v53 = vpop.f32.mrb[50].mxu1  ;;  %v2224_v23 = vld [vmem:[#allocation2 + $0x178] sm:$0xff] }
 0x1b1   : > { %2953 = vrot.lane.b32.xlu1 %v2920_v50, %s4699_s8  ;;  %1875 = vst.msk [vmem:[#allocation2 + $0x198] sm:$0xff] %vm1823_vm0, %v4108_v52  ;;  %v794_v54 = vpop.f32.mrb[51].mxu0  ;;  %2005 = vst.msk [vmem:[#allocation2 + $0x5a8] sm:$0xff] %vm1823_vm0, %v4303_v53  ;;  %v1444_v55 = vpop.f32.mrb[51].mxu1 }
 0x1b2   : > { %1874 = vst.msk [vmem:[#allocation2 + $0x190] sm:$0xff] %vm1823_vm0, %v794_v54  ;;  %2004 = vst.msk [vmem:[#allocation2 + $0x5a0] sm:$0xff] %vm1823_vm0, %v1444_v55  ;;  %v2930_v54 = vld [vmem:[#allocation2 + $0x558] sm:$0xff]  ;;  %v2929_v55 = vld [vmem:[#allocation2 + $0x550] sm:$0xff] }
 0x1b3   : > { %2951 = vrot.lane.b32.xlu0 %v2919_v51, %s4699_s8 }
 0x1b4   : > { %v4111_v60 = vpop.f32.mrb[52].mxu0  ;;  %v4306_v61 = vpop.f32.mrb[52].mxu1 }
 0x1b5   : > { %2243 = vrot.lane.b32.xlu1 %v2210_v56, %s4699_s8  ;;  %1877 = vst.msk [vmem:[#allocation2 + $0x1a8] sm:$0xff] %vm1823_vm0, %v4111_v60  ;;  %v804_v62 = vpop.f32.mrb[53].mxu0  ;;  %2007 = vst.msk [vmem:[#allocation2 + $0x5b8] sm:$0xff] %vm1823_vm0, %v4306_v61  ;;  %v1454_v63 = vpop.f32.mrb[53].mxu1  ;;  %v2220_v60 = vld [vmem:[#allocation2 + $0x158] sm:$0xff]  ;;  %v2219_v61 = vld [vmem:[#allocation2 + $0x150] sm:$0xff] }
 0x1b6   : > { %1876 = vst.msk [vmem:[#allocation2 + $0x1a0] sm:$0xff] %vm1823_vm0, %v804_v62  ;;  %2006 = vst.msk [vmem:[#allocation2 + $0x5b0] sm:$0xff] %vm1823_vm0, %v1454_v63 }
 0x1b7   : > { %2241 = vrot.lane.b32.xlu0 %v2209_v58, %s4699_s8 }
 0x1b8   : > { %v4114_v2 = vpop.f32.mrb[54].mxu0  ;;  %v4309_v3 = vpop.f32.mrb[54].mxu1 }
 0x1b9   : > { %2957 = vrot.lane.b32.xlu1 %v2922_v0, %s4699_s8  ;;  %1879 = vst.msk [vmem:[#allocation2 + $0x1b8] sm:$0xff] %vm1823_vm0, %v4114_v2  ;;  %v814_v4 = vpop.f32.mrb[55].mxu0  ;;  %2009 = vst.msk [vmem:[#allocation2 + $0x5c8] sm:$0xff] %vm1823_vm0, %v4309_v3  ;;  %v1464_v5 = vpop.f32.mrb[55].mxu1  ;;  %v2932_v2 = vld [vmem:[#allocation2 + $0x568] sm:$0xff]  ;;  %v2931_v3 = vld [vmem:[#allocation2 + $0x560] sm:$0xff] }
 0x1ba   : > { %1878 = vst.msk [vmem:[#allocation2 + $0x1b0] sm:$0xff] %vm1823_vm0, %v814_v4  ;;  %2008 = vst.msk [vmem:[#allocation2 + $0x5c0] sm:$0xff] %vm1823_vm0, %v1464_v5 }
 0x1bb   : > { %2955 = vrot.lane.b32.xlu0 %v2921_v1, %s4699_s8 }
 0x1bc   : > { %v4117_v10 = vpop.f32.mrb[56].mxu0  ;;  %v4312_v11 = vpop.f32.mrb[56].mxu1 }
 0x1bd   : > { %2247 = vrot.lane.b32.xlu1 %v2212_v6, %s4699_s8  ;;  %1881 = vst.msk [vmem:[#allocation2 + $0x1c8] sm:$0xff] %vm1823_vm0, %v4117_v10  ;;  %v824_v12 = vpop.f32.mrb[57].mxu0  ;;  %2011 = vst.msk [vmem:[#allocation2 + $0x5d8] sm:$0xff] %vm1823_vm0, %v4312_v11  ;;  %v1474_v13 = vpop.f32.mrb[57].mxu1  ;;  %v2221_v10 = vld [vmem:[#allocation2 + $0x160] sm:$0xff] }
 0x1be   : > { %1880 = vst.msk [vmem:[#allocation2 + $0x1c0] sm:$0xff] %vm1823_vm0, %v824_v12  ;;  %2010 = vst.msk [vmem:[#allocation2 + $0x5d0] sm:$0xff] %vm1823_vm0, %v1474_v13 }
 0x1bf   : > { %2245 = vrot.lane.b32.xlu0 %v2211_v8, %s4699_s8  ;;  %v2222_v8 = vld [vmem:[#allocation2 + $0x168] sm:$0xff] }
 0x1c0   : > { %v4120_v16 = vpop.f32.mrb[58].mxu0  ;;  %v4315_v17 = vpop.f32.mrb[58].mxu1 }
 0x1c1   : > { %2961 = vrot.lane.b32.xlu1 %v2924_v14, %s4699_s8  ;;  %1883 = vst.msk [vmem:[#allocation2 + $0x1d8] sm:$0xff] %vm1823_vm0, %v4120_v16  ;;  %v834_v18 = vpop.f32.mrb[59].mxu0  ;;  %2013 = vst.msk [vmem:[#allocation2 + $0x5e8] sm:$0xff] %vm1823_vm0, %v4315_v17  ;;  %v1484_v19 = vpop.f32.mrb[59].mxu1 }
 0x1c2   : > { %1882 = vst.msk [vmem:[#allocation2 + $0x1d0] sm:$0xff] %vm1823_vm0, %v834_v18  ;;  %2012 = vst.msk [vmem:[#allocation2 + $0x5e0] sm:$0xff] %vm1823_vm0, %v1484_v19  ;;  %v2933_v18 = vld [vmem:[#allocation2 + $0x570] sm:$0xff] }
 0x1c3   : > { %2959 = vrot.lane.b32.xlu0 %v2923_v15, %s4699_s8  ;;  %v2934_v15 = vld [vmem:[#allocation2 + $0x578] sm:$0xff] }
 0x1c4   : > { %v4123_v24 = vpop.f32.mrb[60].mxu0  ;;  %v4318_v25 = vpop.f32.mrb[60].mxu1 }
 0x1c5   : > { %2251 = vrot.lane.b32.xlu1 %v2214_v20, %s4699_s8  ;;  %1885 = vst.msk [vmem:[#allocation2 + $0x1e8] sm:$0xff] %vm1823_vm0, %v4123_v24  ;;  %v844_v26 = vpop.f32.mrb[61].mxu0  ;;  %2015 = vst.msk [vmem:[#allocation2 + $0x5f8] sm:$0xff] %vm1823_vm0, %v4318_v25  ;;  %v1494_v27 = vpop.f32.mrb[61].mxu1 }
 0x1c6   : > { %1884 = vst.msk [vmem:[#allocation2 + $0x1e0] sm:$0xff] %vm1823_vm0, %v844_v26  ;;  %2014 = vst.msk [vmem:[#allocation2 + $0x5f0] sm:$0xff] %vm1823_vm0, %v1494_v27  ;;  %v2223_v26 = vld [vmem:[#allocation2 + $0x170] sm:$0xff] }
 0x1c7   : > { %2249 = vrot.lane.b32.xlu0 %v2213_v22, %s4699_s8 }
 0x1c8   : > { %v4126_v30 = vpop.f32.mrb[62].mxu0  ;;  %v4321_v31 = vpop.f32.mrb[62].mxu1 }
 0x1c9   : > { %2965 = vrot.lane.b32.xlu1 %v2926_v28, %s4699_s8  ;;  %1887 = vst.msk [vmem:[#allocation2 + $0x1f8] sm:$0xff] %vm1823_vm0, %v4126_v30  ;;  %v854_v32 = vpop.f32.mrb[63].mxu0  ;;  %2017 = vst.msk [vmem:[#allocation2 + $0x608] sm:$0xff] %vm1823_vm0, %v4321_v31  ;;  %v1504_v33 = vpop.f32.mrb[63].mxu1  ;;  %v3016_v30 = vld [vmem:[#allocation2 + $0x588] sm:$0xff] }
 0x1ca   : > { %1886 = vst.msk [vmem:[#allocation2 + $0x1f0] sm:$0xff] %vm1823_vm0, %v854_v32  ;;  %2016 = vst.msk [vmem:[#allocation2 + $0x600] sm:$0xff] %vm1823_vm0, %v1504_v33  ;;  %v3015_v32 = vld [vmem:[#allocation2 + $0x580] sm:$0xff] }
 0x1cb   : > { %2963 = vrot.lane.b32.xlu0 %v2925_v29, %s4699_s8 }
 0x1cc   : > { %v4129_v38 = vpop.f32.mrb[64].mxu0  ;;  %v4324_v39 = vpop.f32.mrb[64].mxu1 }
 0x1cd   : > { %2255 = vrot.lane.b32.xlu1 %v2216_v34, %s4699_s8  ;;  %1889 = vst.msk [vmem:[#allocation2 + $0x208] sm:$0xff] %vm1823_vm0, %v4129_v38  ;;  %v864_v40 = vpop.f32.mrb[65].mxu0  ;;  %2019 = vst.msk [vmem:[#allocation2 + $0x618] sm:$0xff] %vm1823_vm0, %v4324_v39  ;;  %v1514_v41 = vpop.f32.mrb[65].mxu1  ;;  %v2307_v38 = vld [vmem:[#allocation2 + $0x188] sm:$0xff] }
 0x1ce   : > { %1888 = vst.msk [vmem:[#allocation2 + $0x200] sm:$0xff] %vm1823_vm0, %v864_v40  ;;  %2018 = vst.msk [vmem:[#allocation2 + $0x610] sm:$0xff] %vm1823_vm0, %v1514_v41  ;;  %v2306_v40 = vld [vmem:[#allocation2 + $0x180] sm:$0xff] }
 0x1cf   : > { %2253 = vrot.lane.b32.xlu0 %v2215_v36, %s4699_s8 }
 0x1d0   : > { %v4132_v44 = vpop.f32.mrb[66].mxu0  ;;  %v4327_v45 = vpop.f32.mrb[66].mxu1 }
 0x1d1   : > { %2969 = vrot.lane.b32.xlu1 %v2928_v42, %s4699_s8  ;;  %1891 = vst.msk [vmem:[#allocation2 + $0x218] sm:$0xff] %vm1823_vm0, %v4132_v44  ;;  %v874_v46 = vpop.f32.mrb[67].mxu0  ;;  %2021 = vst.msk [vmem:[#allocation2 + $0x628] sm:$0xff] %vm1823_vm0, %v4327_v45  ;;  %v1524_v47 = vpop.f32.mrb[67].mxu1  ;;  %v3018_v44 = vld [vmem:[#allocation2 + $0x598] sm:$0xff] }
 0x1d2   : > { %1890 = vst.msk [vmem:[#allocation2 + $0x210] sm:$0xff] %vm1823_vm0, %v874_v46  ;;  %2020 = vst.msk [vmem:[#allocation2 + $0x620] sm:$0xff] %vm1823_vm0, %v1524_v47  ;;  %v3017_v46 = vld [vmem:[#allocation2 + $0x590] sm:$0xff] }
 0x1d3   : > { %2967 = vrot.lane.b32.xlu0 %v2927_v43, %s4699_s8 }
 0x1d4   : > { %v4135_v50 = vpop.f32.mrb[68].mxu0  ;;  %v4330_v51 = vpop.f32.mrb[68].mxu1 }
 0x1d5   : > { %2259 = vrot.lane.b32.xlu1 %v2218_v48, %s4699_s8  ;;  %1893 = vst.msk [vmem:[#allocation2 + $0x228] sm:$0xff] %vm1823_vm0, %v4135_v50  ;;  %v884_v52 = vpop.f32.mrb[69].mxu0  ;;  %2023 = vst.msk [vmem:[#allocation2 + $0x638] sm:$0xff] %vm1823_vm0, %v4330_v51  ;;  %v1534_v53 = vpop.f32.mrb[69].mxu1 }
 0x1d6   : > { %1892 = vst.msk [vmem:[#allocation2 + $0x220] sm:$0xff] %vm1823_vm0, %v884_v52  ;;  %2022 = vst.msk [vmem:[#allocation2 + $0x630] sm:$0xff] %vm1823_vm0, %v1534_v53  ;;  %v2309_v52 = vld [vmem:[#allocation2 + $0x198] sm:$0xff] }
 0x1d7   : > { %2257 = vrot.lane.b32.xlu0 %v2217_v49, %s4699_s8 }
 0x1d8   : > { %v4138_v56 = vpop.f32.mrb[70].mxu0  ;;  %v4333_v57 = vpop.f32.mrb[70].mxu1 }
 0x1d9   : > { %2973 = vrot.lane.b32.xlu1 %v2930_v54, %s4699_s8  ;;  %1895 = vst.msk [vmem:[#allocation2 + $0x238] sm:$0xff] %vm1823_vm0, %v4138_v56  ;;  %v894_v58 = vpop.f32.mrb[71].mxu0  ;;  %2025 = vst.msk [vmem:[#allocation2 + $0x648] sm:$0xff] %vm1823_vm0, %v4333_v57  ;;  %v1544_v59 = vpop.f32.mrb[71].mxu1  ;;  %v2308_v54 = vld [vmem:[#allocation2 + $0x190] sm:$0xff] }
 0x1da   : > { %1894 = vst.msk [vmem:[#allocation2 + $0x230] sm:$0xff] %vm1823_vm0, %v894_v58  ;;  %2024 = vst.msk [vmem:[#allocation2 + $0x640] sm:$0xff] %vm1823_vm0, %v1544_v59  ;;  %v3020_v58 = vld [vmem:[#allocation2 + $0x5a8] sm:$0xff] }
 0x1db   : > { %2971 = vrot.lane.b32.xlu0 %v2929_v55, %s4699_s8 }
 0x1dc   : > { %v4141_v62 = vpop.f32.mrb[72].mxu0  ;;  %v4336_v63 = vpop.f32.mrb[72].mxu1 }
 0x1dd   : > { %2263 = vrot.lane.b32.xlu1 %v2220_v60, %s4699_s8  ;;  %1897 = vst.msk [vmem:[#allocation2 + $0x248] sm:$0xff] %vm1823_vm0, %v4141_v62  ;;  %v904_v0 = vpop.f32.mrb[73].mxu0  ;;  %2027 = vst.msk [vmem:[#allocation2 + $0x658] sm:$0xff] %vm1823_vm0, %v4336_v63  ;;  %v1554_v1 = vpop.f32.mrb[73].mxu1  ;;  %v3019_v60 = vld [vmem:[#allocation2 + $0x5a0] sm:$0xff] }
 0x1de   : > { %1896 = vst.msk [vmem:[#allocation2 + $0x240] sm:$0xff] %vm1823_vm0, %v904_v0  ;;  %2026 = vst.msk [vmem:[#allocation2 + $0x650] sm:$0xff] %vm1823_vm0, %v1554_v1 }
 0x1df   : > { %2261 = vrot.lane.b32.xlu0 %v2219_v61, %s4699_s8 }
 0x1e0   : > { %v4144_v4 = vpop.f32.mrb[74].mxu0  ;;  %v4339_v5 = vpop.f32.mrb[74].mxu1 }
 0x1e1   : > { %2977 = vrot.lane.b32.xlu1 %v2932_v2, %s4699_s8  ;;  %1899 = vst.msk [vmem:[#allocation2 + $0x258] sm:$0xff] %vm1823_vm0, %v4144_v4  ;;  %v914_v6 = vpop.f32.mrb[75].mxu0  ;;  %2029 = vst.msk [vmem:[#allocation2 + $0x668] sm:$0xff] %vm1823_vm0, %v4339_v5  ;;  %v1564_v7 = vpop.f32.mrb[75].mxu1  ;;  %v2311_v2 = vld [vmem:[#allocation2 + $0x1a8] sm:$0xff]  ;;  %v2310_v4 = vld [vmem:[#allocation2 + $0x1a0] sm:$0xff] }
 0x1e2   : > { %1898 = vst.msk [vmem:[#allocation2 + $0x250] sm:$0xff] %vm1823_vm0, %v914_v6  ;;  %2028 = vst.msk [vmem:[#allocation2 + $0x660] sm:$0xff] %vm1823_vm0, %v1564_v7 }
 0x1e3   : > { %2975 = vrot.lane.b32.xlu0 %v2931_v3, %s4699_s8  ;;  %v5432_v9 = vpop.permute.xlu1 %2857 }
 0x1e4   : > { %v4147_v12 = vpop.f32.mrb[76].mxu0  ;;  %v4342_v14 = vpop.f32.mrb[76].mxu1 }
 0x1e5   : > { %v5434_v11 = vpop.permute.xlu0 %2855  ;;  %2267 = vrot.lane.b32.xlu1 %v2222_v8, %s4699_s8  ;;  %1901 = vst.msk [vmem:[#allocation2 + $0x268] sm:$0xff] %vm1823_vm0, %v4147_v12  ;;  %v924_v13 = vpop.f32.mrb[77].mxu0  ;;  %2031 = vst.msk [vmem:[#allocation2 + $0x678] sm:$0xff] %vm1823_vm0, %v4342_v14  ;;  %v3022_v8 = vld [vmem:[#allocation2 + $0x5b8] sm:$0xff]  ;;  %v3021_v12 = vld [vmem:[#allocation2 + $0x5b0] sm:$0xff] }
 0x1e6   : > { %1900 = vst.msk [vmem:[#allocation2 + $0x260] sm:$0xff] %vm1823_vm0, %v924_v13  ;;  %v1574_v16 = vpop.f32.mrb[77].mxu1 }
 0x1e7   : > { %2265 = vrot.lane.b32.xlu0 %v2221_v10, %s4699_s8  ;;  %v2862_v17 = vpop.permute.xlu1 %2861  ;;  %2030 = vst.msk [vmem:[#allocation2 + $0x670] sm:$0xff] %vm1823_vm0, %v1574_v16 }
 0x1e8   : > { %2906 = vst.msk [vmem:[#allocation3 + $0x38] sm:$0xff] %vm2192_vm1, %v2862_v17  ;;  %v4150_v20 = vpop.f32.mrb[78].mxu0  ;;  %v4345_v22 = vpop.f32.mrb[78].mxu1 }
 0x1e9   : > { %v2147_v19 = vpop.permute.xlu0 %2146  ;;  %2981 = vrot.lane.b32.xlu1 %v2934_v15, %s4699_s8  ;;  %1903 = vst.msk [vmem:[#allocation2 + $0x278] sm:$0xff] %vm1823_vm0, %v4150_v20  ;;  %v934_v21 = vpop.f32.mrb[79].mxu0  ;;  %2033 = vst.msk [vmem:[#allocation2 + $0x688] sm:$0xff] %vm1823_vm0, %v4345_v22  ;;  %v2312_v20 = vld [vmem:[#allocation2 + $0x1b0] sm:$0xff] }
 0x1ea   : > { %2194 = vst.msk [vmem:[#allocation3 + $0x10] sm:$0xff] %vm2192_vm1, %v2147_v19  ;;  %v1584_v24 = vpop.f32.mrb[79].mxu1 }
 0x1eb   : > { %2979 = vrot.lane.b32.xlu0 %v2933_v18, %s4699_s8  ;;  %1902 = vst.msk [vmem:[#allocation2 + $0x270] sm:$0xff] %vm1823_vm0, %v934_v21  ;;  %v2151_v25 = vpop.permute.xlu1 %2150  ;;  %2032 = vst.msk [vmem:[#allocation2 + $0x680] sm:$0xff] %vm1823_vm0, %v1584_v24  ;;  %v2313_v18 = vld [vmem:[#allocation2 + $0x1b8] sm:$0xff]  ;;  %v3024_v24 = vld [vmem:[#allocation2 + $0x5c8] sm:$0xff] }
 0x1ec   : > { %2196 = vst.msk [vmem:[#allocation3 + $0x30] sm:$0xff] %vm2192_vm1, %v2151_v25  ;;  %v4153_v28 = vpop.f32.mrb[80].mxu0  ;;  %v4348_v33 = vpop.f32.mrb[80].mxu1 }
 0x1ed   : > { %v2145_v27 = vpop.permute.xlu0 %2144  ;;  %2271 = vrot.lane.b32.xlu1 %v2224_v23, %s4699_s8  ;;  %1905 = vst.msk [vmem:[#allocation2 + $0x288] sm:$0xff] %vm1823_vm0, %v4153_v28  ;;  %v944_v29 = vpop.f32.mrb[81].mxu0  ;;  %2035 = vst.msk [vmem:[#allocation2 + $0x698] sm:$0xff] %vm1823_vm0, %v4348_v33 }
 0x1ee   : > { %2193 = vst.msk [vmem:[#allocation3] sm:$0xff] %vm2192_vm1, %v2145_v27  ;;  %v1594_v37 = vpop.f32.mrb[81].mxu1 }
 0x1ef   : > { %2269 = vrot.lane.b32.xlu0 %v2223_v26, %s4699_s8  ;;  %1904 = vst.msk [vmem:[#allocation2 + $0x280] sm:$0xff] %vm1823_vm0, %v944_v29  ;;  %v2866_v31 = vpop.permute.xlu1 %2865  ;;  %2034 = vst.msk [vmem:[#allocation2 + $0x690] sm:$0xff] %vm1823_vm0, %v1594_v37  ;;  %v3023_v26 = vld [vmem:[#allocation2 + $0x5c0] sm:$0xff]  ;;  %s4628_s8 = scalar_lea.vmem %s4627_s7, 1024 }
 0x1f0   : > { %2908 = vst.msk [vmem:[#allocation3 + $0x58] sm:$0xff] %vm2192_vm1, %v2866_v31  ;;  %v4156_v35 = vpop.f32.mrb[82].mxu0  ;;  %v4351_v47 = vpop.f32.mrb[82].mxu1  ;;  %p4630_p13 = scmp.lt.s32.totalorder %s4628_s8, %s4622_s26 }
 0x1f1   : > { %v2860_v34 = vpop.permute.xlu0 %2859  ;;  %3049 = vrot.lane.b32.xlu1 %v3016_v30, %s4700_s10  ;;  %1907 = vst.msk [vmem:[#allocation2 + $0x298] sm:$0xff] %vm1823_vm0, %v4156_v35  ;;  %v954_v36 = vpop.f32.mrb[83].mxu0  ;;  %2037 = vst.msk [vmem:[#allocation2 + $0x6a8] sm:$0xff] %vm1823_vm0, %v4351_v47 }
 0x1f2   : > { %2905 = vst.msk [vmem:[#allocation3 + $0x28] sm:$0xff] %vm2192_vm1, %v2860_v34  ;;  %v1604_v51 = vpop.f32.mrb[83].mxu1  ;;  %v2314_v34 = vld [vmem:[#allocation2 + $0x1c0] sm:$0xff]  ;;  %p4631_p3 = por %p4630_p13, %p4629_p10 }
 0x1f3   : > { %3047 = vrot.lane.b32.xlu0 %v3015_v32, %s4700_s10  ;;  %1906 = vst.msk [vmem:[#allocation2 + $0x290] sm:$0xff] %vm1823_vm0, %v954_v36  ;;  %v2149_v39 = vpop.permute.xlu1 %2148  ;;  %2036 = vst.msk [vmem:[#allocation2 + $0x6a0] sm:$0xff] %vm1823_vm0, %v1604_v51  ;;  %v2315_v32 = vld [vmem:[#allocation2 + $0x1c8] sm:$0xff] }
 0x1f4   : > { %2195 = vst.msk [vmem:[#allocation3 + $0x20] sm:$0xff] %vm2192_vm1, %v2149_v39  ;;  %v4159_v42 = vpop.f32.mrb[84].mxu0  ;;  %v4354_v61 = vpop.f32.mrb[84].mxu1  ;;  %p4632_p7 = pnand %p4631_p3, %p4625_p8 }
 0x1f5   : > { %v2864_v41 = vpop.permute.xlu0 %2863  ;;  %2340 = vrot.lane.b32.xlu1 %v2307_v38, %s4700_s10  ;;  %1909 = vst.msk [vmem:[#allocation2 + $0x2a8] sm:$0xff] %vm1823_vm0, %v4159_v42  ;;  %v964_v43 = vpop.f32.mrb[85].mxu0  ;;  %2039 = vst.msk [vmem:[#allocation2 + $0x6b8] sm:$0xff] %vm1823_vm0, %v4354_v61  ;;  %v3026_v38 = vld [vmem:[#allocation2 + $0x5d8] sm:$0xff] }
 0x1f6   : > { %2907 = vst.msk [vmem:[#allocation3 + $0x48] sm:$0xff] %vm2192_vm1, %v2864_v41  ;;  %v1614_v1 = vpop.f32.mrb[85].mxu1 }
 0x1f7   : > { %2338 = vrot.lane.b32.xlu0 %v2306_v40, %s4700_s10  ;;  %1908 = vst.msk [vmem:[#allocation2 + $0x2a0] sm:$0xff] %vm1823_vm0, %v964_v43  ;;  %v2155_v45 = vpop.permute.xlu1 %2154  ;;  %2038 = vst.msk [vmem:[#allocation2 + $0x6b0] sm:$0xff] %vm1823_vm0, %v1614_v1  ;;  %v3025_v40 = vld [vmem:[#allocation2 + $0x5d0] sm:$0xff] }
 0x1f8   : > { %2198 = vst.msk [vmem:[#allocation3 + $0x50] sm:$0xff] %vm2192_vm1, %v2155_v45  ;;  %v4162_v49 = vpop.f32.mrb[86].mxu0  ;;  %v4357_v13 = vpop.f32.mrb[86].mxu1 }
 0x1f9   : > { %v2153_v48 = vpop.permute.xlu0 %2152  ;;  %3053 = vrot.lane.b32.xlu1 %v3018_v44, %s4700_s10  ;;  %1911 = vst.msk [vmem:[#allocation2 + $0x2b8] sm:$0xff] %vm1823_vm0, %v4162_v49  ;;  %v974_v50 = vpop.f32.mrb[87].mxu0  ;;  %2041 = vst.msk [vmem:[#allocation2 + $0x6c8] sm:$0xff] %vm1823_vm0, %v4357_v13 }
 0x1fa   : > { %2197 = vst.msk [vmem:[#allocation3 + $0x40] sm:$0xff] %vm2192_vm1, %v2153_v48  ;;  %v1624_v17 = vpop.f32.mrb[87].mxu1  ;;  %v2316_v48 = vld [vmem:[#allocation2 + $0x1d0] sm:$0xff] }
 0x1fb   : > { %3051 = vrot.lane.b32.xlu0 %v3017_v46, %s4700_s10  ;;  %1910 = vst.msk [vmem:[#allocation2 + $0x2b0] sm:$0xff] %vm1823_vm0, %v974_v50  ;;  %v2870_v53 = vpop.permute.xlu1 %2869  ;;  %2040 = vst.msk [vmem:[#allocation2 + $0x6c0] sm:$0xff] %vm1823_vm0, %v1624_v17  ;;  %v2317_v46 = vld [vmem:[#allocation2 + $0x1d8] sm:$0xff] }
 0x1fc   : > { %2910 = vst.msk [vmem:[#allocation3 + $0x78] sm:$0xff] %vm2192_vm1, %v2870_v53  ;;  %v4165_v56 = vpop.f32.mrb[88].mxu0  ;;  %v4360_v27 = vpop.f32.mrb[88].mxu1 }
 0x1fd   : > { %v2868_v55 = vpop.permute.xlu0 %2867  ;;  %2344 = vrot.lane.b32.xlu1 %v2309_v52, %s4700_s10  ;;  %1913 = vst.msk [vmem:[#allocation2 + $0x2c8] sm:$0xff] %vm1823_vm0, %v4165_v56  ;;  %v984_v57 = vpop.f32.mrb[89].mxu0  ;;  %2043 = vst.msk [vmem:[#allocation2 + $0x6d8] sm:$0xff] %vm1823_vm0, %v4360_v27  ;;  %v3028_v52 = vld [vmem:[#allocation2 + $0x5e8] sm:$0xff] }
 0x1fe   : > { %2909 = vst.msk [vmem:[#allocation3 + $0x68] sm:$0xff] %vm2192_vm1, %v2868_v55  ;;  %v1634_v31 = vpop.f32.mrb[89].mxu1 }
 0x1ff   : > { %2342 = vrot.lane.b32.xlu0 %v2308_v54, %s4700_s10  ;;  %1912 = vst.msk [vmem:[#allocation2 + $0x2c0] sm:$0xff] %vm1823_vm0, %v984_v57  ;;  %v2159_v59 = vpop.permute.xlu1 %2158  ;;  %2042 = vst.msk [vmem:[#allocation2 + $0x6d0] sm:$0xff] %vm1823_vm0, %v1634_v31  ;;  %v3027_v54 = vld [vmem:[#allocation2 + $0x5e0] sm:$0xff] }
 0x200   : > { %2200 = vst.msk [vmem:[#allocation3 + $0x70] sm:$0xff] %vm2192_vm1, %v2159_v59  ;;  %v4168_v63 = vpop.f32.mrb[90].mxu0  ;;  %v4363_v41 = vpop.f32.mrb[90].mxu1 }
 0x201   : > { %v2157_v62 = vpop.permute.xlu0 %2156  ;;  %3057 = vrot.lane.b32.xlu1 %v3020_v58, %s4700_s10  ;;  %1915 = vst.msk [vmem:[#allocation2 + $0x2d8] sm:$0xff] %vm1823_vm0, %v4168_v63  ;;  %v994_v0 = vpop.f32.mrb[91].mxu0  ;;  %2045 = vst.msk [vmem:[#allocation2 + $0x6e8] sm:$0xff] %vm1823_vm0, %v4363_v41 }
 0x202   : > { %2199 = vst.msk [vmem:[#allocation3 + $0x60] sm:$0xff] %vm2192_vm1, %v2157_v62  ;;  %v1644_v45 = vpop.f32.mrb[91].mxu1  ;;  %v2318_v62 = vld [vmem:[#allocation2 + $0x1e0] sm:$0xff] }
 0x203   : > { %3055 = vrot.lane.b32.xlu0 %v3019_v60, %s4700_s10  ;;  %1914 = vst.msk [vmem:[#allocation2 + $0x2d0] sm:$0xff] %vm1823_vm0, %v994_v0  ;;  %v2874_v3 = vpop.permute.xlu1 %2873  ;;  %2044 = vst.msk [vmem:[#allocation2 + $0x6e0] sm:$0xff] %vm1823_vm0, %v1644_v45  ;;  %v2319_v60 = vld [vmem:[#allocation2 + $0x1e8] sm:$0xff] }
 0x204   : > { %2912 = vst.msk [vmem:[#allocation3 + $0x98] sm:$0xff] %vm2192_vm1, %v2874_v3  ;;  %v4171_v6 = vpop.f32.mrb[92].mxu0  ;;  %v4366_v55 = vpop.f32.mrb[92].mxu1 }
 0x205   : > { %v2872_v5 = vpop.permute.xlu0 %2871  ;;  %2348 = vrot.lane.b32.xlu1 %v2311_v2, %s4700_s10  ;;  %1917 = vst.msk [vmem:[#allocation2 + $0x2e8] sm:$0xff] %vm1823_vm0, %v4171_v6  ;;  %v1004_v7 = vpop.f32.mrb[93].mxu0  ;;  %2047 = vst.msk [vmem:[#allocation2 + $0x6f8] sm:$0xff] %vm1823_vm0, %v4366_v55  ;;  %v3029_v6 = vld [vmem:[#allocation2 + $0x5f0] sm:$0xff] }
 0x206   : > { %2911 = vst.msk [vmem:[#allocation3 + $0x88] sm:$0xff] %vm2192_vm1, %v2872_v5  ;;  %v1654_v59 = vpop.f32.mrb[93].mxu1 }
 0x207   : > { %2346 = vrot.lane.b32.xlu0 %v2310_v4, %s4700_s10  ;;  %1916 = vst.msk [vmem:[#allocation2 + $0x2e0] sm:$0xff] %vm1823_vm0, %v1004_v7  ;;  %v2163_v10 = vpop.permute.xlu1 %2162  ;;  %2046 = vst.msk [vmem:[#allocation2 + $0x6f0] sm:$0xff] %vm1823_vm0, %v1654_v59  ;;  %v3030_v4 = vld [vmem:[#allocation2 + $0x5f8] sm:$0xff] }
 0x208   : > { %2202 = vst.msk [vmem:[#allocation3 + $0x90] sm:$0xff] %vm2192_vm1, %v2163_v10  ;;  %v4174_v15 = vpop.f32.mrb[94].mxu0  ;;  %v4369_v63 = vpop.f32.mrb[94].mxu1 }
 0x209   : > { %v2161_v14 = vpop.permute.xlu0 %2160  ;;  %3061 = vrot.lane.b32.xlu1 %v3022_v8, %s4700_s10  ;;  %1919 = vst.msk [vmem:[#allocation2 + $0x2f8] sm:$0xff] %vm1823_vm0, %v4174_v15  ;;  %v1014_v16 = vpop.f32.mrb[95].mxu0  ;;  %2049 = vst.msk [vmem:[#allocation2 + $0x708] sm:$0xff] %vm1823_vm0, %v4369_v63  ;;  %v3117_v63 = vld [vmem:[#allocation2 + $0x630] sm:$0xff] }
 0x20a   : > { %2201 = vst.msk [vmem:[#allocation3 + $0x80] sm:$0xff] %vm2192_vm1, %v2161_v14  ;;  %v1664_v3 = vpop.f32.mrb[95].mxu1  ;;  %v2320_v14 = vld [vmem:[#allocation2 + $0x1f0] sm:$0xff] }
 0x20b   : > { %3059 = vrot.lane.b32.xlu0 %v3021_v12, %s4700_s10  ;;  %1918 = vst.msk [vmem:[#allocation2 + $0x2f0] sm:$0xff] %vm1823_vm0, %v1014_v16  ;;  %v2878_v19 = vpop.permute.xlu1 %2877  ;;  %2048 = vst.msk [vmem:[#allocation2 + $0x700] sm:$0xff] %vm1823_vm0, %v1664_v3  ;;  %v2321_v12 = vld [vmem:[#allocation2 + $0x1f8] sm:$0xff] }
 0x20c   : > { %2914 = vst.msk [vmem:[#allocation3 + $0xb8] sm:$0xff] %vm2192_vm1, %v2878_v19  ;;  %v4177_v22 = vpop.f32.mrb[96].mxu0 }
 0x20d   : > { %v2876_v21 = vpop.permute.xlu0 %2875  ;;  %2352 = vrot.lane.b32.xlu1 %v2313_v18, %s4700_s10  ;;  %1921 = vst.msk [vmem:[#allocation2 + $0x308] sm:$0xff] %vm1823_vm0, %v4177_v22  ;;  %v1024_v23 = vpop.f32.mrb[97].mxu0  ;;  %v3112_v18 = vld [vmem:[#allocation2 + $0x608] sm:$0xff] }
 0x20e   : > { %2913 = vst.msk [vmem:[#allocation3 + $0xa8] sm:$0xff] %vm2192_vm1, %v2876_v21  ;;  %v4372_v21 = vpop.f32.mrb[96].mxu1 }
 0x20f   : > { %2350 = vrot.lane.b32.xlu0 %v2312_v20, %s4700_s10  ;;  %1920 = vst.msk [vmem:[#allocation2 + $0x300] sm:$0xff] %vm1823_vm0, %v1024_v23  ;;  %v2167_v25 = vpop.permute.xlu1 %2166  ;;  %v3111_v20 = vld [vmem:[#allocation2 + $0x600] sm:$0xff]  ;;  %2051 = vst.msk [vmem:[#allocation2 + $0x718] sm:$0xff] %vm1823_vm0, %v4372_v21 }
 0x210   : > { %2204 = vst.msk [vmem:[#allocation3 + $0xb0] sm:$0xff] %vm2192_vm1, %v2167_v25  ;;  %v4180_v29 = vpop.f32.mrb[98].mxu0  ;;  %v1674_v25 = vpop.f32.mrb[97].mxu1 }
 0x211   : > { %v2165_v28 = vpop.permute.xlu0 %2164  ;;  %3065 = vrot.lane.b32.xlu1 %v3024_v24, %s4700_s10  ;;  %1923 = vst.msk [vmem:[#allocation2 + $0x318] sm:$0xff] %vm1823_vm0, %v4180_v29  ;;  %v1034_v30 = vpop.f32.mrb[99].mxu0  ;;  %2050 = vst.msk [vmem:[#allocation2 + $0x710] sm:$0xff] %vm1823_vm0, %v1674_v25 }
 0x212   : > { %2203 = vst.msk [vmem:[#allocation3 + $0xa0] sm:$0xff] %vm2192_vm1, %v2165_v28  ;;  %v2403_v28 = vld [vmem:[#allocation2 + $0x200] sm:$0xff] }
 0x213   : > { %3063 = vrot.lane.b32.xlu0 %v3023_v26, %s4700_s10  ;;  %1922 = vst.msk [vmem:[#allocation2 + $0x310] sm:$0xff] %vm1823_vm0, %v1034_v30  ;;  %v2882_v33 = vpop.permute.xlu1 %2881  ;;  %v2404_v26 = vld [vmem:[#allocation2 + $0x208] sm:$0xff] }
 0x214   : > { %2916 = vst.msk [vmem:[#allocation3 + $0xd8] sm:$0xff] %vm2192_vm1, %v2882_v33  ;;  %v4183_v36 = vpop.f32.mrb[100].mxu0 }
 0x215   : > { %v2880_v35 = vpop.permute.xlu0 %2879  ;;  %2356 = vrot.lane.b32.xlu1 %v2315_v32, %s4700_s10  ;;  %1925 = vst.msk [vmem:[#allocation2 + $0x328] sm:$0xff] %vm1823_vm0, %v4183_v36  ;;  %v1044_v37 = vpop.f32.mrb[101].mxu0  ;;  %v3114_v32 = vld [vmem:[#allocation2 + $0x618] sm:$0xff] }
 0x216   : > { %2915 = vst.msk [vmem:[#allocation3 + $0xc8] sm:$0xff] %vm2192_vm1, %v2880_v35 }
 0x217   : > { %2354 = vrot.lane.b32.xlu0 %v2314_v34, %s4700_s10  ;;  %1924 = vst.msk [vmem:[#allocation2 + $0x320] sm:$0xff] %vm1823_vm0, %v1044_v37  ;;  %v2171_v39 = vpop.permute.xlu1 %2170  ;;  %v3113_v34 = vld [vmem:[#allocation2 + $0x610] sm:$0xff] }
 0x218   : > { %2206 = vst.msk [vmem:[#allocation3 + $0xd0] sm:$0xff] %vm2192_vm1, %v2171_v39  ;;  %v4186_v43 = vpop.f32.mrb[102].mxu0 }
 0x219   : > { %v2169_v42 = vpop.permute.xlu0 %2168  ;;  %3069 = vrot.lane.b32.xlu1 %v3026_v38, %s4700_s10  ;;  %1927 = vst.msk [vmem:[#allocation2 + $0x338] sm:$0xff] %vm1823_vm0, %v4186_v43  ;;  %v1054_v44 = vpop.f32.mrb[103].mxu0 }
 0x21a   : > { %2205 = vst.msk [vmem:[#allocation3 + $0xc0] sm:$0xff] %vm2192_vm1, %v2169_v42  ;;  %v4375_v35 = vpop.f32.mrb[98].mxu1  ;;  %v2405_v42 = vld [vmem:[#allocation2 + $0x210] sm:$0xff] }
 0x21b   : > { %3067 = vrot.lane.b32.xlu0 %v3025_v40, %s4700_s10  ;;  %1926 = vst.msk [vmem:[#allocation2 + $0x330] sm:$0xff] %vm1823_vm0, %v1054_v44  ;;  %v2886_v47 = vpop.permute.xlu1 %2885  ;;  %2053 = vst.msk [vmem:[#allocation2 + $0x728] sm:$0xff] %vm1823_vm0, %v4375_v35  ;;  %v1684_v39 = vpop.f32.mrb[99].mxu1  ;;  %v2406_v40 = vld [vmem:[#allocation2 + $0x218] sm:$0xff] }
 0x21c   : > { %2918 = vst.msk [vmem:[#allocation3 + $0xf8] sm:$0xff] %vm2192_vm1, %v2886_v47  ;;  %v4189_v50 = vpop.f32.mrb[104].mxu0 }
 0x21d   : > { %v2884_v49 = vpop.permute.xlu0 %2883  ;;  %2360 = vrot.lane.b32.xlu1 %v2317_v46, %s4700_s10  ;;  %1929 = vst.msk [vmem:[#allocation2 + $0x348] sm:$0xff] %vm1823_vm0, %v4189_v50  ;;  %v1064_v51 = vpop.f32.mrb[105].mxu0  ;;  %2052 = vst.msk [vmem:[#allocation2 + $0x720] sm:$0xff] %vm1823_vm0, %v1684_v39  ;;  %v3116_v46 = vld [vmem:[#allocation2 + $0x628] sm:$0xff] }
 0x21e   : > { %2917 = vst.msk [vmem:[#allocation3 + $0xe8] sm:$0xff] %vm2192_vm1, %v2884_v49 }
 0x21f   : > { %2358 = vrot.lane.b32.xlu0 %v2316_v48, %s4700_s10  ;;  %1928 = vst.msk [vmem:[#allocation2 + $0x340] sm:$0xff] %vm1823_vm0, %v1064_v51  ;;  %v2175_v53 = vpop.permute.xlu1 %2174  ;;  %v3115_v48 = vld [vmem:[#allocation2 + $0x620] sm:$0xff] }
 0x220   : > { %2208 = vst.msk [vmem:[#allocation3 + $0xf0] sm:$0xff] %vm2192_vm1, %v2175_v53  ;;  %v4192_v57 = vpop.f32.mrb[106].mxu0 }
 0x221   : > { %v2173_v56 = vpop.permute.xlu0 %2172  ;;  %3073 = vrot.lane.b32.xlu1 %v3028_v52, %s4700_s10  ;;  %1931 = vst.msk [vmem:[#allocation2 + $0x358] sm:$0xff] %vm1823_vm0, %v4192_v57  ;;  %v1074_v58 = vpop.f32.mrb[107].mxu0 }
 0x222   : > { %2207 = vst.msk [vmem:[#allocation3 + $0xe0] sm:$0xff] %vm2192_vm1, %v2173_v56  ;;  %v2407_v56 = vld [vmem:[#allocation2 + $0x220] sm:$0xff] }
 0x223   : > { %3071 = vrot.lane.b32.xlu0 %v3027_v54, %s4700_s10  ;;  %1930 = vst.msk [vmem:[#allocation2 + $0x350] sm:$0xff] %vm1823_vm0, %v1074_v58  ;;  %v5548_v61 = vpop.permute.xlu1 %2953  ;;  %v2408_v54 = vld [vmem:[#allocation2 + $0x228] sm:$0xff] }
 0x224   : > { %v4195_v1 = vpop.f32.mrb[108].mxu0 }
 0x225   : > { %v5550_v0 = vpop.permute.xlu0 %2951  ;;  %2364 = vrot.lane.b32.xlu1 %v2319_v60, %s4700_s10  ;;  %1933 = vst.msk [vmem:[#allocation2 + $0x368] sm:$0xff] %vm1823_vm0, %v4195_v1  ;;  %v1084_v2 = vpop.f32.mrb[109].mxu0  ;;  %v3118_v60 = vld [vmem:[#allocation2 + $0x638] sm:$0xff] }
 0x226   : > { %1932 = vst.msk [vmem:[#allocation2 + $0x360] sm:$0xff] %vm1823_vm0, %v1084_v2 }
 0x227   : > { %2362 = vrot.lane.b32.xlu0 %v2318_v62, %s4700_s10  ;;  %v2244_v5 = vpop.permute.xlu1 %2243 }
 0x228   : > { %2291 = vst.msk [vmem:[#allocation3 + $0x10] sm:$0xff] %vm2289_vm2, %v2244_v5  ;;  %v4198_v8 = vpop.f32.mrb[110].mxu0 }
 0x229   : > { %v2242_v7 = vpop.permute.xlu0 %2241  ;;  %3077 = vrot.lane.b32.xlu1 %v3030_v4, %s4700_s10  ;;  %1935 = vst.msk [vmem:[#allocation2 + $0x378] sm:$0xff] %vm1823_vm0, %v4198_v8  ;;  %v1094_v10 = vpop.f32.mrb[111].mxu0  ;;  %v2409_v8 = vld [vmem:[#allocation2 + $0x230] sm:$0xff] }
 0x22a   : > { %2290 = vst.msk [vmem:[#allocation3] sm:$0xff] %vm2289_vm2, %v2242_v7 }
 0x22b   : > { %3075 = vrot.lane.b32.xlu0 %v3029_v6, %s4700_s10  ;;  %1934 = vst.msk [vmem:[#allocation2 + $0x370] sm:$0xff] %vm1823_vm0, %v1094_v10  ;;  %v2958_v13 = vpop.permute.xlu1 %2957  ;;  %v4378_v49 = vpop.f32.mrb[100].mxu1  ;;  %v2410_v6 = vld [vmem:[#allocation2 + $0x238] sm:$0xff] }
 0x22c   : > { %3002 = vst.msk [vmem:[#allocation3 + $0x38] sm:$0xff] %vm2289_vm2, %v2958_v13  ;;  %v4201_v16 = vpop.f32.mrb[112].mxu0  ;;  %v1694_v53 = vpop.f32.mrb[101].mxu1 }
 0x22d   : > { %v2956_v15 = vpop.permute.xlu0 %2955  ;;  %2368 = vrot.lane.b32.xlu1 %v2321_v12, %s4700_s10  ;;  %1937 = vst.msk [vmem:[#allocation2 + $0x388] sm:$0xff] %vm1823_vm0, %v4201_v16  ;;  %v1104_v17 = vpop.f32.mrb[113].mxu0  ;;  %2055 = vst.msk [vmem:[#allocation2 + $0x738] sm:$0xff] %vm1823_vm0, %v4378_v49  ;;  %v3119_v16 = vld [vmem:[#allocation2 + $0x640] sm:$0xff] }
 0x22e   : > { %3001 = vst.msk [vmem:[#allocation3 + $0x28] sm:$0xff] %vm2289_vm2, %v2956_v15 }
 0x22f   : > { %2366 = vrot.lane.b32.xlu0 %v2320_v14, %s4700_s10  ;;  %1936 = vst.msk [vmem:[#allocation2 + $0x380] sm:$0xff] %vm1823_vm0, %v1104_v17  ;;  %v2248_v19 = vpop.permute.xlu1 %2247  ;;  %2054 = vst.msk [vmem:[#allocation2 + $0x730] sm:$0xff] %vm1823_vm0, %v1694_v53  ;;  %v3120_v14 = vld [vmem:[#allocation2 + $0x648] sm:$0xff] }
 0x230   : > { %2293 = vst.msk [vmem:[#allocation3 + $0x30] sm:$0xff] %vm2289_vm2, %v2248_v19  ;;  %v4204_v23 = vpop.f32.mrb[114].mxu0 }
 0x231   : > { %v2246_v22 = vpop.permute.xlu0 %2245  ;;  %3145 = vrot.lane.b32.xlu1 %v3112_v18, %s4701_s9  ;;  %1939 = vst.msk [vmem:[#allocation2 + $0x398] sm:$0xff] %vm1823_vm0, %v4204_v23  ;;  %v1114_v24 = vpop.f32.mrb[115].mxu0 }
 0x232   : > { %2292 = vst.msk [vmem:[#allocation3 + $0x20] sm:$0xff] %vm2289_vm2, %v2246_v22  ;;  %v2411_v22 = vld [vmem:[#allocation2 + $0x240] sm:$0xff] }
 0x233   : > { %3143 = vrot.lane.b32.xlu0 %v3111_v20, %s4701_s9  ;;  %1938 = vst.msk [vmem:[#allocation2 + $0x390] sm:$0xff] %vm1823_vm0, %v1114_v24  ;;  %v2962_v27 = vpop.permute.xlu1 %2961  ;;  %v2412_v20 = vld [vmem:[#allocation2 + $0x248] sm:$0xff] }
 0x234   : > { %3004 = vst.msk [vmem:[#allocation3 + $0x58] sm:$0xff] %vm2289_vm2, %v2962_v27  ;;  %v4207_v30 = vpop.f32.mrb[116].mxu0  ;;  %v4381_v1 = vpop.f32.mrb[102].mxu1 }
 0x235   : > { %v2960_v29 = vpop.permute.xlu0 %2959  ;;  %2437 = vrot.lane.b32.xlu1 %v2404_v26, %s4701_s9  ;;  %1941 = vst.msk [vmem:[#allocation2 + $0x3a8] sm:$0xff] %vm1823_vm0, %v4207_v30  ;;  %v1124_v31 = vpop.f32.mrb[117].mxu0  ;;  %2057 = vst.msk [vmem:[#allocation2 + $0x748] sm:$0xff] %vm1823_vm0, %v4381_v1  ;;  %v3122_v26 = vld [vmem:[#allocation2 + $0x658] sm:$0xff] }
 0x236   : > { %3003 = vst.msk [vmem:[#allocation3 + $0x48] sm:$0xff] %vm2289_vm2, %v2960_v29  ;;  %v1704_v5 = vpop.f32.mrb[103].mxu1 }
 0x237   : > { %2435 = vrot.lane.b32.xlu0 %v2403_v28, %s4701_s9  ;;  %1940 = vst.msk [vmem:[#allocation2 + $0x3a0] sm:$0xff] %vm1823_vm0, %v1124_v31  ;;  %v2252_v33 = vpop.permute.xlu1 %2251  ;;  %2056 = vst.msk [vmem:[#allocation2 + $0x740] sm:$0xff] %vm1823_vm0, %v1704_v5  ;;  %v3121_v28 = vld [vmem:[#allocation2 + $0x650] sm:$0xff] }
 0x238   : > { %2295 = vst.msk [vmem:[#allocation3 + $0x50] sm:$0xff] %vm2289_vm2, %v2252_v33  ;;  %v4210_v37 = vpop.f32.mrb[118].mxu0  ;;  %v2413_v31 = vld [vmem:[#allocation2 + $0x250] sm:$0xff] }
 0x239   : > { %v2250_v36 = vpop.permute.xlu0 %2249  ;;  %3149 = vrot.lane.b32.xlu1 %v3114_v32, %s4701_s9  ;;  %1943 = vst.msk [vmem:[#allocation2 + $0x3b8] sm:$0xff] %vm1823_vm0, %v4210_v37  ;;  %v1134_v38 = vpop.f32.mrb[119].mxu0 }
 0x23a   : > { %2294 = vst.msk [vmem:[#allocation3 + $0x40] sm:$0xff] %vm2289_vm2, %v2250_v36  ;;  %v4384_v17 = vpop.f32.mrb[104].mxu1 }
 0x23b   : > { %3147 = vrot.lane.b32.xlu0 %v3113_v34, %s4701_s9  ;;  %1942 = vst.msk [vmem:[#allocation2 + $0x3b0] sm:$0xff] %vm1823_vm0, %v1134_v38  ;;  %v2966_v41 = vpop.permute.xlu1 %2965  ;;  %2059 = vst.msk [vmem:[#allocation2 + $0x758] sm:$0xff] %vm1823_vm0, %v4384_v17  ;;  %v1714_v19 = vpop.f32.mrb[105].mxu1  ;;  %v3123_v34 = vld [vmem:[#allocation2 + $0x660] sm:$0xff]  ;;  %v2416_v38 = vld [vmem:[#allocation2 + $0x268] sm:$0xff] }
 0x23c   : > { %3006 = vst.msk [vmem:[#allocation3 + $0x78] sm:$0xff] %vm2289_vm2, %v2966_v41  ;;  %v4213_v44 = vpop.f32.mrb[120].mxu0 }
 0x23d   : > { %v2964_v43 = vpop.permute.xlu0 %2963  ;;  %2441 = vrot.lane.b32.xlu1 %v2406_v40, %s4701_s9  ;;  %1945 = vst.msk [vmem:[#allocation2 + $0x3c8] sm:$0xff] %vm1823_vm0, %v4213_v44  ;;  %v1144_v45 = vpop.f32.mrb[121].mxu0  ;;  %2058 = vst.msk [vmem:[#allocation2 + $0x750] sm:$0xff] %vm1823_vm0, %v1714_v19  ;;  %v2415_v40 = vld [vmem:[#allocation2 + $0x260] sm:$0xff]  ;;  %v3126_v44 = vld [vmem:[#allocation2 + $0x678] sm:$0xff] }
 0x23e   : > { %3005 = vst.msk [vmem:[#allocation3 + $0x68] sm:$0xff] %vm2289_vm2, %v2964_v43  ;;  %v4387_v29 = vpop.f32.mrb[106].mxu1 }
 0x23f   : > { %2439 = vrot.lane.b32.xlu0 %v2405_v42, %s4701_s9  ;;  %1944 = vst.msk [vmem:[#allocation2 + $0x3c0] sm:$0xff] %vm1823_vm0, %v1144_v45  ;;  %v2256_v47 = vpop.permute.xlu1 %2255  ;;  %2061 = vst.msk [vmem:[#allocation2 + $0x768] sm:$0xff] %vm1823_vm0, %v4387_v29 }
 0x240   : > { %2297 = vst.msk [vmem:[#allocation3 + $0x70] sm:$0xff] %vm2289_vm2, %v2256_v47  ;;  %v4216_v51 = vpop.f32.mrb[122].mxu0 }
 0x241   : > { %v2254_v50 = vpop.permute.xlu0 %2253  ;;  %3153 = vrot.lane.b32.xlu1 %v3116_v46, %s4701_s9  ;;  %1947 = vst.msk [vmem:[#allocation2 + $0x3d8] sm:$0xff] %vm1823_vm0, %v4216_v51  ;;  %v1154_v52 = vpop.f32.mrb[123].mxu0  ;;  %v3125_v46 = vld [vmem:[#allocation2 + $0x670] sm:$0xff] }
 0x242   : > { %2296 = vst.msk [vmem:[#allocation3 + $0x60] sm:$0xff] %vm2289_vm2, %v2254_v50  ;;  %v3207_v50 = vld [vmem:[#allocation2 + $0x680] sm:$0xff] }
 0x243   : > { %3151 = vrot.lane.b32.xlu0 %v3115_v48, %s4701_s9  ;;  %1946 = vst.msk [vmem:[#allocation2 + $0x3d0] sm:$0xff] %vm1823_vm0, %v1154_v52  ;;  %v2970_v55 = vpop.permute.xlu1 %2969  ;;  %v3208_v48 = vld [vmem:[#allocation2 + $0x688] sm:$0xff]  ;;  %v2418_v52 = vld [vmem:[#allocation2 + $0x278] sm:$0xff] }
 0x244   : > { %3008 = vst.msk [vmem:[#allocation3 + $0x98] sm:$0xff] %vm2289_vm2, %v2970_v55  ;;  %v4219_v58 = vpop.f32.mrb[124].mxu0 }
 0x245   : > { %v2968_v57 = vpop.permute.xlu0 %2967  ;;  %2445 = vrot.lane.b32.xlu1 %v2408_v54, %s4701_s9  ;;  %1949 = vst.msk [vmem:[#allocation2 + $0x3e8] sm:$0xff] %vm1823_vm0, %v4219_v58  ;;  %v1164_v59 = vpop.f32.mrb[125].mxu0  ;;  %v2417_v54 = vld [vmem:[#allocation2 + $0x270] sm:$0xff]  ;;  %v2501_v58 = vld [vmem:[#allocation2 + $0x288] sm:$0xff] }
 0x246   : > { %3007 = vst.msk [vmem:[#allocation3 + $0x88] sm:$0xff] %vm2289_vm2, %v2968_v57 }
 0x247   : > { %2443 = vrot.lane.b32.xlu0 %v2407_v56, %s4701_s9  ;;  %1948 = vst.msk [vmem:[#allocation2 + $0x3e0] sm:$0xff] %vm1823_vm0, %v1164_v59  ;;  %v2260_v62 = vpop.permute.xlu1 %2259 }
 0x248   : > { %2299 = vst.msk [vmem:[#allocation3 + $0x90] sm:$0xff] %vm2289_vm2, %v2260_v62  ;;  %v4222_v3 = vpop.f32.mrb[126].mxu0 }
 0x249   : > { %v2258_v2 = vpop.permute.xlu0 %2257  ;;  %3157 = vrot.lane.b32.xlu1 %v3118_v60, %s4701_s9  ;;  %1951 = vst.msk [vmem:[#allocation2 + $0x3f8] sm:$0xff] %vm1823_vm0, %v4222_v3  ;;  %v1174_v4 = vpop.f32.mrb[127].mxu0  ;;  %v2500_v60 = vld [vmem:[#allocation2 + $0x280] sm:$0xff] }
 0x24a   : > { %2298 = vst.msk [vmem:[#allocation3 + $0x80] sm:$0xff] %vm2289_vm2, %v2258_v2  ;;  %v3209_v2 = vld [vmem:[#allocation2 + $0x690] sm:$0xff] }
 0x24b   : > { %3155 = vrot.lane.b32.xlu0 %v3117_v63, %s4701_s9  ;;  %1950 = vst.msk [vmem:[#allocation2 + $0x3f0] sm:$0xff] %vm1823_vm0, %v1174_v4  ;;  %v2974_v7 = vpop.permute.xlu1 %2973  ;;  %v3210_v63 = vld [vmem:[#allocation2 + $0x698] sm:$0xff] }
 0x24c   : > { %3010 = vst.msk [vmem:[#allocation3 + $0xb8] sm:$0xff] %vm2289_vm2, %v2974_v7  ;;  %v4225_v12 = vpop.f32.mrb[128].mxu0 }
 0x24d   : > { %v2972_v10 = vpop.permute.xlu0 %2971  ;;  %1953 = vst.msk [vmem:[#allocation2 + $0x408] sm:$0xff] %vm1823_vm0, %v4225_v12  ;;  %2449 = vrot.lane.b32.xlu1 %v2410_v6, %s4701_s9  ;;  %v1184_v13 = vpop.f32.mrb[129].mxu0  ;;  %v2503_v6 = vld [vmem:[#allocation2 + $0x298] sm:$0xff]  ;;  %v3212_v12 = vld [vmem:[#allocation2 + $0x6a8] sm:$0xff] }
 0x24e   : > { %3009 = vst.msk [vmem:[#allocation3 + $0xa8] sm:$0xff] %vm2289_vm2, %v2972_v10 }
 0x24f   : > { %1952 = vst.msk [vmem:[#allocation2 + $0x400] sm:$0xff] %vm1823_vm0, %v1184_v13  ;;  %2447 = vrot.lane.b32.xlu0 %v2409_v8, %s4701_s9  ;;  %v2264_v15 = vpop.permute.xlu1 %2263  ;;  %v2502_v8 = vld [vmem:[#allocation2 + $0x290] sm:$0xff] }
 0x250   : > { %2301 = vst.msk [vmem:[#allocation3 + $0xb0] sm:$0xff] %vm2289_vm2, %v2264_v15 }
 0x251   : > { %v2262_v18 = vpop.permute.xlu0 %2261  ;;  %3161 = vrot.lane.b32.xlu1 %v3120_v14, %s4701_s9  ;;  %v3211_v14 = vld [vmem:[#allocation2 + $0x6a0] sm:$0xff] }
 0x252   : > { %2300 = vst.msk [vmem:[#allocation3 + $0xa0] sm:$0xff] %vm2289_vm2, %v2262_v18  ;;  %v2505_v18 = vld [vmem:[#allocation2 + $0x2a8] sm:$0xff] }
 0x253   : > { %3159 = vrot.lane.b32.xlu0 %v3119_v16, %s4701_s9  ;;  %v2978_v21 = vpop.permute.xlu1 %2977 }
 0x254   : > { %3012 = vst.msk [vmem:[#allocation3 + $0xd8] sm:$0xff] %vm2289_vm2, %v2978_v21  ;;  %v2792_v24 = vld [vmem:[#allocation2 + $0x408] sm:$0xff] }
 0x255   : > { %v2976_v23 = vpop.permute.xlu0 %2975  ;;  %2453 = vrot.lane.b32.xlu1 %v2412_v20, %s4701_s9  ;;  %2808 = vst.msk [vmem:[#allocation3 + $0x18] sm:$0xff] %vm1823_vm0, %v2792_v24  ;;  %v2504_v20 = vld [vmem:[#allocation2 + $0x2a0] sm:$0xff]  ;;  %v3213_v24 = vld [vmem:[#allocation2 + $0x6b0] sm:$0xff] }
 0x256   : > { %3011 = vst.msk [vmem:[#allocation3 + $0xc8] sm:$0xff] %vm2289_vm2, %v2976_v23  ;;  %v2791_v25 = vld [vmem:[#allocation2 + $0x400] sm:$0xff] }
 0x257   : > { %2451 = vrot.lane.b32.xlu0 %v2411_v22, %s4701_s9  ;;  %2904 = vst.msk [vmem:[#allocation3 + $0x18] sm:$0xff] %vm2192_vm1, %v5432_v9  ;;  %v2268_v27 = vpop.permute.xlu1 %2267  ;;  %v1724_v9 = vpop.f32.mrb[107].mxu1  ;;  %v3214_v22 = vld [vmem:[#allocation2 + $0x6b8] sm:$0xff] }
 0x258   : > { %2807 = vst.msk [vmem:[#allocation3 + $0x8] sm:$0xff] %vm1823_vm0, %v2791_v25  ;;  %2060 = vst.msk [vmem:[#allocation2 + $0x760] sm:$0xff] %vm1823_vm0, %v1724_v9  ;;  %v4390_v35 = vpop.f32.mrb[108].mxu1 }
 0x259   : > { %3000 = vst.msk [vmem:[#allocation3 + $0x18] sm:$0xff] %vm2289_vm2, %v5548_v61  ;;  %2303 = vst.msk [vmem:[#allocation3 + $0xd0] sm:$0xff] %vm2289_vm2, %v2268_v27  ;;  %v2266_v30 = vpop.permute.xlu0 %2265  ;;  %3165 = vrot.lane.b32.xlu1 %v3122_v26, %s4701_s9  ;;  %v2414_v61 = vld [vmem:[#allocation2 + $0x258] sm:$0xff]  ;;  %v1734_v37 = vpop.f32.mrb[109].mxu1 }
 0x25a   : > { %2903 = vst.msk [vmem:[#allocation3 + $0x8] sm:$0xff] %vm2192_vm1, %v5434_v11  ;;  %v4393_v41 = vpop.f32.mrb[110].mxu1 }
 0x25b   : > { %2999 = vst.msk [vmem:[#allocation3 + $0x8] sm:$0xff] %vm2289_vm2, %v5550_v0  ;;  %2302 = vst.msk [vmem:[#allocation3 + $0xc0] sm:$0xff] %vm2289_vm2, %v2266_v30  ;;  %3163 = vrot.lane.b32.xlu0 %v3121_v28, %s4701_s9  ;;  %v2982_v11 = vpop.permute.xlu1 %2981  ;;  %v3124_v0 = vld [vmem:[#allocation2 + $0x668] sm:$0xff]  ;;  %v1744_v43 = vpop.f32.mrb[111].mxu1  ;;  %v2507_v28 = vld [vmem:[#allocation2 + $0x2b8] sm:$0xff] }
 0x25c   : > { %3014 = vst.msk [vmem:[#allocation3 + $0xf8] sm:$0xff] %vm2289_vm2, %v2982_v11  ;;  %v4396_v55 = vpop.f32.mrb[112].mxu1  ;;  %v2506_v30 = vld [vmem:[#allocation2 + $0x2b0] sm:$0xff] }
 0x25d   : > { %v2980_v32 = vpop.permute.xlu0 %2979  ;;  %2457 = vrot.lane.b32.xlu1 %v2414_v61, %s4701_s9  ;;  %2063 = vst.msk [vmem:[#allocation2 + $0x778] sm:$0xff] %vm1823_vm0, %v4390_v35  ;;  %2062 = vst.msk [vmem:[#allocation2 + $0x770] sm:$0xff] %vm1823_vm0, %v1734_v37  ;;  %v1754_v57 = vpop.f32.mrb[113].mxu1  ;;  %v3216_v61 = vld [vmem:[#allocation2 + $0x6c8] sm:$0xff] }
 0x25e   : > { %3013 = vst.msk [vmem:[#allocation3 + $0xe8] sm:$0xff] %vm2289_vm2, %v2980_v32  ;;  %v4399_v3 = vpop.f32.mrb[114].mxu1 }
 0x25f   : > { %2455 = vrot.lane.b32.xlu0 %v2413_v31, %s4701_s9  ;;  %v2272_v33 = vpop.permute.xlu1 %2271  ;;  %2065 = vst.msk [vmem:[#allocation2 + $0x788] sm:$0xff] %vm1823_vm0, %v4393_v41  ;;  %2064 = vst.msk [vmem:[#allocation2 + $0x780] sm:$0xff] %vm1823_vm0, %v1744_v43  ;;  %v1764_v5 = vpop.f32.mrb[115].mxu1  ;;  %v3215_v31 = vld [vmem:[#allocation2 + $0x6c0] sm:$0xff] }
 0x260   : > { %2305 = vst.msk [vmem:[#allocation3 + $0xf0] sm:$0xff] %vm2289_vm2, %v2272_v33  ;;  %v4402_v15 = vpop.f32.mrb[116].mxu1 }
 0x261   : > { %v2270_v36 = vpop.permute.xlu0 %2269  ;;  %3169 = vrot.lane.b32.xlu1 %v3124_v0, %s4701_s9  ;;  %2067 = vst.msk [vmem:[#allocation2 + $0x798] sm:$0xff] %vm1823_vm0, %v4396_v55  ;;  %2066 = vst.msk [vmem:[#allocation2 + $0x790] sm:$0xff] %vm1823_vm0, %v1754_v57  ;;  %v1774_v17 = vpop.f32.mrb[117].mxu1 }
 0x262   : > { %2304 = vst.msk [vmem:[#allocation3 + $0xe0] sm:$0xff] %vm2289_vm2, %v2270_v36  ;;  %v2508_v36 = vld [vmem:[#allocation2 + $0x2c0] sm:$0xff] }
 0x263   : > { %3167 = vrot.lane.b32.xlu0 %v3123_v34, %s4701_s9  ;;  %v3050_v39 = vpop.permute.xlu1 %3049  ;;  %2069 = vst.msk [vmem:[#allocation2 + $0x7a8] sm:$0xff] %vm1823_vm0, %v4399_v3  ;;  %2068 = vst.msk [vmem:[#allocation2 + $0x7a0] sm:$0xff] %vm1823_vm0, %v1764_v5  ;;  %v4405_v25 = vpop.f32.mrb[118].mxu1  ;;  %v2509_v34 = vld [vmem:[#allocation2 + $0x2c8] sm:$0xff] }
 0x264   : > { %3096 = vst.msk [vmem:[#allocation3 + $0x18] sm:$0xff] %vm2386_vm3, %v3050_v39  ;;  %v1784_v27 = vpop.f32.mrb[119].mxu1 }
 0x265   : > { %v3048_v42 = vpop.permute.xlu0 %3047  ;;  %2461 = vrot.lane.b32.xlu1 %v2416_v38, %s4701_s9  ;;  %2071 = vst.msk [vmem:[#allocation2 + $0x7b8] sm:$0xff] %vm1823_vm0, %v4402_v15  ;;  %2070 = vst.msk [vmem:[#allocation2 + $0x7b0] sm:$0xff] %vm1823_vm0, %v1774_v17  ;;  %v3218_v38 = vld [vmem:[#allocation2 + $0x6d8] sm:$0xff] }
 0x266   : > { %3095 = vst.msk [vmem:[#allocation3 + $0x8] sm:$0xff] %vm2386_vm3, %v3048_v42 }
 0x267   : > { %2459 = vrot.lane.b32.xlu0 %v2415_v40, %s4701_s9  ;;  %v2341_v45 = vpop.permute.xlu1 %2340  ;;  %2073 = vst.msk [vmem:[#allocation2 + $0x7c8] sm:$0xff] %vm1823_vm0, %v4405_v25  ;;  %2072 = vst.msk [vmem:[#allocation2 + $0x7c0] sm:$0xff] %vm1823_vm0, %v1784_v27  ;;  %v3217_v40 = vld [vmem:[#allocation2 + $0x6d0] sm:$0xff] }
 0x268   : > { %2388 = vst.msk [vmem:[#allocation3 + $0x10] sm:$0xff] %vm2386_vm3, %v2341_v45 }
 0x269   : > { %v2339_v47 = vpop.permute.xlu0 %2338  ;;  %3173 = vrot.lane.b32.xlu1 %v3126_v44, %s4701_s9  ;;  %v2511_v44 = vld [vmem:[#allocation2 + $0x2d8] sm:$0xff] }
 0x26a   : > { %2387 = vst.msk [vmem:[#allocation3] sm:$0xff] %vm2386_vm3, %v2339_v47 }
 0x26b   : > { %3171 = vrot.lane.b32.xlu0 %v3125_v46, %s4701_s9  ;;  %v3054_v49 = vpop.permute.xlu1 %3053  ;;  %v2510_v46 = vld [vmem:[#allocation2 + $0x2d0] sm:$0xff] }
 0x26c   : > { %3098 = vst.msk [vmem:[#allocation3 + $0x38] sm:$0xff] %vm2386_vm3, %v3054_v49 }
 0x26d   : > { %v3052_v51 = vpop.permute.xlu0 %3051  ;;  %3241 = vrot.lane.b32.xlu1 %v3208_v48, %s4702_s4  ;;  %v3220_v48 = vld [vmem:[#allocation2 + $0x6e8] sm:$0xff] }
 0x26e   : > { %3097 = vst.msk [vmem:[#allocation3 + $0x28] sm:$0xff] %vm2386_vm3, %v3052_v51 }
 0x26f   : > { %3239 = vrot.lane.b32.xlu0 %v3207_v50, %s4702_s4  ;;  %v2345_v53 = vpop.permute.xlu1 %2344  ;;  %v4408_v32 = vpop.f32.mrb[120].mxu1  ;;  %v3219_v50 = vld [vmem:[#allocation2 + $0x6e0] sm:$0xff] }
 0x270   : > { %2390 = vst.msk [vmem:[#allocation3 + $0x30] sm:$0xff] %vm2386_vm3, %v2345_v53  ;;  %v1794_v33 = vpop.f32.mrb[121].mxu1 }
 0x271   : > { %v2343_v56 = vpop.permute.xlu0 %2342  ;;  %2465 = vrot.lane.b32.xlu1 %v2418_v52, %s4701_s9  ;;  %2075 = vst.msk [vmem:[#allocation2 + $0x7d8] sm:$0xff] %vm1823_vm0, %v4408_v32  ;;  %2074 = vst.msk [vmem:[#allocation2 + $0x7d0] sm:$0xff] %vm1823_vm0, %v1794_v33 }
 0x272   : > { %2389 = vst.msk [vmem:[#allocation3 + $0x20] sm:$0xff] %vm2386_vm3, %v2343_v56  ;;  %v2512_v56 = vld [vmem:[#allocation2 + $0x2e0] sm:$0xff] }
 0x273   : > { %2463 = vrot.lane.b32.xlu0 %v2417_v54, %s4701_s9  ;;  %v3058_v59 = vpop.permute.xlu1 %3057  ;;  %v2513_v54 = vld [vmem:[#allocation2 + $0x2e8] sm:$0xff] }
 0x274   : > { %3100 = vst.msk [vmem:[#allocation3 + $0x58] sm:$0xff] %vm2386_vm3, %v3058_v59 }
 0x275   : > { %v3056_v62 = vpop.permute.xlu0 %3055  ;;  %2534 = vrot.lane.b32.xlu1 %v2501_v58, %s4702_s4  ;;  %v3222_v58 = vld [vmem:[#allocation2 + $0x6f8] sm:$0xff] }
 0x276   : > { %3099 = vst.msk [vmem:[#allocation3 + $0x48] sm:$0xff] %vm2386_vm3, %v3056_v62 }
 0x277   : > { %2532 = vrot.lane.b32.xlu0 %v2500_v60, %s4702_s4  ;;  %v2349_v1 = vpop.permute.xlu1 %2348  ;;  %v4411_v41 = vpop.f32.mrb[122].mxu1  ;;  %v3221_v60 = vld [vmem:[#allocation2 + $0x6f0] sm:$0xff] }
 0x278   : > { %2392 = vst.msk [vmem:[#allocation3 + $0x50] sm:$0xff] %vm2386_vm3, %v2349_v1  ;;  %v1804_v43 = vpop.f32.mrb[123].mxu1 }
 0x279   : > { %v2347_v4 = vpop.permute.xlu0 %2346  ;;  %3245 = vrot.lane.b32.xlu1 %v3210_v63, %s4702_s4  ;;  %2077 = vst.msk [vmem:[#allocation2 + $0x7e8] sm:$0xff] %vm1823_vm0, %v4411_v41  ;;  %2076 = vst.msk [vmem:[#allocation2 + $0x7e0] sm:$0xff] %vm1823_vm0, %v1804_v43  ;;  %v3304_v63 = vld [vmem:[#allocation2 + $0x708] sm:$0xff] }
 0x27a   : > { %2391 = vst.msk [vmem:[#allocation3 + $0x40] sm:$0xff] %vm2386_vm3, %v2347_v4  ;;  %v2515_v4 = vld [vmem:[#allocation2 + $0x2f8] sm:$0xff] }
 0x27b   : > { %3243 = vrot.lane.b32.xlu0 %v3209_v2, %s4702_s4  ;;  %v3062_v7 = vpop.permute.xlu1 %3061  ;;  %v3303_v2 = vld [vmem:[#allocation2 + $0x700] sm:$0xff] }
 0x27c   : > { %3102 = vst.msk [vmem:[#allocation3 + $0x78] sm:$0xff] %vm2386_vm3, %v3062_v7 }
 0x27d   : > { %v3060_v10 = vpop.permute.xlu0 %3059  ;;  %2538 = vrot.lane.b32.xlu1 %v2503_v6, %s4702_s4  ;;  %v2514_v6 = vld [vmem:[#allocation2 + $0x2f0] sm:$0xff] }
 0x27e   : > { %3101 = vst.msk [vmem:[#allocation3 + $0x68] sm:$0xff] %vm2386_vm3, %v3060_v10 }
 0x27f   : > { %2536 = vrot.lane.b32.xlu0 %v2502_v8, %s4702_s4  ;;  %v2353_v13 = vpop.permute.xlu1 %2352  ;;  %v4414_v51 = vpop.f32.mrb[124].mxu1  ;;  %v2598_v8 = vld [vmem:[#allocation2 + $0x308] sm:$0xff] }
 0x280   : > { %2394 = vst.msk [vmem:[#allocation3 + $0x70] sm:$0xff] %vm2386_vm3, %v2353_v13  ;;  %v1814_v53 = vpop.f32.mrb[125].mxu1 }
 0x281   : > { %v2351_v16 = vpop.permute.xlu0 %2350  ;;  %3249 = vrot.lane.b32.xlu1 %v3212_v12, %s4702_s4  ;;  %2079 = vst.msk [vmem:[#allocation2 + $0x7f8] sm:$0xff] %vm1823_vm0, %v4414_v51  ;;  %2078 = vst.msk [vmem:[#allocation2 + $0x7f0] sm:$0xff] %vm1823_vm0, %v1814_v53  ;;  %v2597_v12 = vld [vmem:[#allocation2 + $0x300] sm:$0xff] }
 0x282   : > { %2393 = vst.msk [vmem:[#allocation3 + $0x60] sm:$0xff] %vm2386_vm3, %v2351_v16  ;;  %v3305_v16 = vld [vmem:[#allocation2 + $0x710] sm:$0xff] }
 0x283   : > { %3247 = vrot.lane.b32.xlu0 %v3211_v14, %s4702_s4  ;;  %v3066_v19 = vpop.permute.xlu1 %3065  ;;  %v3306_v14 = vld [vmem:[#allocation2 + $0x718] sm:$0xff] }
 0x284   : > { %3104 = vst.msk [vmem:[#allocation3 + $0x98] sm:$0xff] %vm2386_vm3, %v3066_v19 }
 0x285   : > { %v3064_v21 = vpop.permute.xlu0 %3063  ;;  %2542 = vrot.lane.b32.xlu1 %v2505_v18, %s4702_s4  ;;  %v2600_v18 = vld [vmem:[#allocation2 + $0x318] sm:$0xff] }
 0x286   : > { %3103 = vst.msk [vmem:[#allocation3 + $0x88] sm:$0xff] %vm2386_vm3, %v3064_v21 }
 0x287   : > { %2540 = vrot.lane.b32.xlu0 %v2504_v20, %s4702_s4  ;;  %v2357_v23 = vpop.permute.xlu1 %2356  ;;  %v2599_v20 = vld [vmem:[#allocation2 + $0x310] sm:$0xff] }
 0x288   : > { %2396 = vst.msk [vmem:[#allocation3 + $0x90] sm:$0xff] %vm2386_vm3, %v2357_v23 }
 0x289   : > { %v2355_v26 = vpop.permute.xlu0 %2354  ;;  %3253 = vrot.lane.b32.xlu1 %v3214_v22, %s4702_s4  ;;  %v3308_v22 = vld [vmem:[#allocation2 + $0x728] sm:$0xff] }
 0x28a   : > { %2395 = vst.msk [vmem:[#allocation3 + $0x80] sm:$0xff] %vm2386_vm3, %v2355_v26  ;;  %v2602_v26 = vld [vmem:[#allocation2 + $0x328] sm:$0xff] }
 0x28b   : > { %3251 = vrot.lane.b32.xlu0 %v3213_v24, %s4702_s4  ;;  %v3070_v29 = vpop.permute.xlu1 %3069  ;;  %v3307_v24 = vld [vmem:[#allocation2 + $0x720] sm:$0xff] }
 0x28c   : > { %3106 = vst.msk [vmem:[#allocation3 + $0xb8] sm:$0xff] %vm2386_vm3, %v3070_v29 }
 0x28d   : > { %v3068_v9 = vpop.permute.xlu0 %3067  ;;  %2546 = vrot.lane.b32.xlu1 %v2507_v28, %s4702_s4  ;;  %v2601_v28 = vld [vmem:[#allocation2 + $0x320] sm:$0xff] }
 0x28e   : > { %3105 = vst.msk [vmem:[#allocation3 + $0xa8] sm:$0xff] %vm2386_vm3, %v3068_v9 }
 0x28f   : > { %2544 = vrot.lane.b32.xlu0 %v2506_v30, %s4702_s4  ;;  %v2361_v11 = vpop.permute.xlu1 %2360  ;;  %v3310_v30 = vld [vmem:[#allocation2 + $0x738] sm:$0xff] }
 0x290   : > { %2398 = vst.msk [vmem:[#allocation3 + $0xb0] sm:$0xff] %vm2386_vm3, %v2361_v11 }
 0x291   : > { %v2359_v0 = vpop.permute.xlu0 %2358  ;;  %3257 = vrot.lane.b32.xlu1 %v3216_v61, %s4702_s4  ;;  %v3309_v61 = vld [vmem:[#allocation2 + $0x730] sm:$0xff] }
 0x292   : > { %2397 = vst.msk [vmem:[#allocation3 + $0xa0] sm:$0xff] %vm2386_vm3, %v2359_v0  ;;  %v2603_v0 = vld [vmem:[#allocation2 + $0x330] sm:$0xff] }
 0x293   : > { %3255 = vrot.lane.b32.xlu0 %v3215_v31, %s4702_s4  ;;  %v3074_v35 = vpop.permute.xlu1 %3073  ;;  %v2604_v31 = vld [vmem:[#allocation2 + $0x338] sm:$0xff] }
 0x294   : > { %3108 = vst.msk [vmem:[#allocation3 + $0xd8] sm:$0xff] %vm2386_vm3, %v3074_v35 }
 0x295   : > { %v3072_v37 = vpop.permute.xlu0 %3071  ;;  %2550 = vrot.lane.b32.xlu1 %v2509_v34, %s4702_s4  ;;  %v3312_v34 = vld [vmem:[#allocation2 + $0x748] sm:$0xff] }
 0x296   : > { %3107 = vst.msk [vmem:[#allocation3 + $0xc8] sm:$0xff] %vm2386_vm3, %v3072_v37 }
 0x297   : > { %2548 = vrot.lane.b32.xlu0 %v2508_v36, %s4702_s4  ;;  %v2365_v39 = vpop.permute.xlu1 %2364  ;;  %v3311_v36 = vld [vmem:[#allocation2 + $0x740] sm:$0xff] }
 0x298   : > { %2400 = vst.msk [vmem:[#allocation3 + $0xd0] sm:$0xff] %vm2386_vm3, %v2365_v39 }
 0x299   : > { %v2363_v42 = vpop.permute.xlu0 %2362  ;;  %3261 = vrot.lane.b32.xlu1 %v3218_v38, %s4702_s4  ;;  %v2606_v38 = vld [vmem:[#allocation2 + $0x348] sm:$0xff] }
 0x29a   : > { %2399 = vst.msk [vmem:[#allocation3 + $0xc0] sm:$0xff] %vm2386_vm3, %v2363_v42  ;;  %v3314_v42 = vld [vmem:[#allocation2 + $0x758] sm:$0xff] }
 0x29b   : > { %3259 = vrot.lane.b32.xlu0 %v3217_v40, %s4702_s4  ;;  %v3078_v45 = vpop.permute.xlu1 %3077  ;;  %v2605_v40 = vld [vmem:[#allocation2 + $0x340] sm:$0xff] }
 0x29c   : > { %3110 = vst.msk [vmem:[#allocation3 + $0xf8] sm:$0xff] %vm2386_vm3, %v3078_v45 }
 0x29d   : > { %v3076_v47 = vpop.permute.xlu0 %3075  ;;  %2554 = vrot.lane.b32.xlu1 %v2511_v44, %s4702_s4  ;;  %v3313_v44 = vld [vmem:[#allocation2 + $0x750] sm:$0xff] }
 0x29e   : > { %3109 = vst.msk [vmem:[#allocation3 + $0xe8] sm:$0xff] %vm2386_vm3, %v3076_v47 }
 0x29f   : > { %2552 = vrot.lane.b32.xlu0 %v2510_v46, %s4702_s4  ;;  %v2369_v49 = vpop.permute.xlu1 %2368  ;;  %v2608_v46 = vld [vmem:[#allocation2 + $0x358] sm:$0xff] }
 0x2a0   : > { %2402 = vst.msk [vmem:[#allocation3 + $0xf0] sm:$0xff] %vm2386_vm3, %v2369_v49 }
 0x2a1   : > { %v2367_v52 = vpop.permute.xlu0 %2366  ;;  %3265 = vrot.lane.b32.xlu1 %v3220_v48, %s4702_s4  ;;  %v2607_v48 = vld [vmem:[#allocation2 + $0x350] sm:$0xff] }
 0x2a2   : > { %2401 = vst.msk [vmem:[#allocation3 + $0xe0] sm:$0xff] %vm2386_vm3, %v2367_v52  ;;  %v3315_v52 = vld [vmem:[#allocation2 + $0x760] sm:$0xff] }
 0x2a3   : > { %3263 = vrot.lane.b32.xlu0 %v3219_v50, %s4702_s4  ;;  %v3146_v55 = vpop.permute.xlu1 %3145  ;;  %v3316_v50 = vld [vmem:[#allocation2 + $0x768] sm:$0xff] }
 0x2a4   : > { %3192 = vst.msk [vmem:[#allocation3 + $0x18] sm:$0xff] %vm2483_vm4, %v3146_v55 }
 0x2a5   : > { %v3144_v57 = vpop.permute.xlu0 %3143  ;;  %2558 = vrot.lane.b32.xlu1 %v2513_v54, %s4702_s4  ;;  %v2610_v54 = vld [vmem:[#allocation2 + $0x368] sm:$0xff] }
 0x2a6   : > { %3191 = vst.msk [vmem:[#allocation3 + $0x8] sm:$0xff] %vm2483_vm4, %v3144_v57 }
 0x2a7   : > { %2556 = vrot.lane.b32.xlu0 %v2512_v56, %s4702_s4  ;;  %v2438_v59 = vpop.permute.xlu1 %2437  ;;  %v2609_v56 = vld [vmem:[#allocation2 + $0x360] sm:$0xff] }
 0x2a8   : > { %2485 = vst.msk [vmem:[#allocation3 + $0x10] sm:$0xff] %vm2483_vm4, %v2438_v59 }
 0x2a9   : > { %v2436_v62 = vpop.permute.xlu0 %2435  ;;  %3269 = vrot.lane.b32.xlu1 %v3222_v58, %s4702_s4  ;;  %v3318_v58 = vld [vmem:[#allocation2 + $0x778] sm:$0xff] }
 0x2aa   : > { %2484 = vst.msk [vmem:[#allocation3] sm:$0xff] %vm2483_vm4, %v2436_v62 }
 0x2ab   : > { %3267 = vrot.lane.b32.xlu0 %v3221_v60, %s4702_s4  ;;  %v3150_v1 = vpop.permute.xlu1 %3149  ;;  %v3317_v60 = vld [vmem:[#allocation2 + $0x770] sm:$0xff] }
 0x2ac   : > { %3194 = vst.msk [vmem:[#allocation3 + $0x38] sm:$0xff] %vm2483_vm4, %v3150_v1 }
 0x2ad   : > { %v3148_v3 = vpop.permute.xlu0 %3147  ;;  %3337 = vrot.lane.b32.xlu1 %v3304_v63, %s4703_s25  ;;  %v3400_v63 = vld [vmem:[#allocation2 + $0x788] sm:$0xff] }
 0x2ae   : > { %3193 = vst.msk [vmem:[#allocation3 + $0x28] sm:$0xff] %vm2483_vm4, %v3148_v3 }
 0x2af   : > { %3335 = vrot.lane.b32.xlu0 %v3303_v2, %s4703_s25  ;;  %v2442_v5 = vpop.permute.xlu1 %2441  ;;  %v3399_v2 = vld [vmem:[#allocation2 + $0x780] sm:$0xff] }
 0x2b0   : > { %2487 = vst.msk [vmem:[#allocation3 + $0x30] sm:$0xff] %vm2483_vm4, %v2442_v5 }
 0x2b1   : > { %v2440_v7 = vpop.permute.xlu0 %2439  ;;  %2562 = vrot.lane.b32.xlu1 %v2515_v4, %s4702_s4  ;;  %v2612_v4 = vld [vmem:[#allocation2 + $0x378] sm:$0xff] }
 0x2b2   : > { %2486 = vst.msk [vmem:[#allocation3 + $0x20] sm:$0xff] %vm2483_vm4, %v2440_v7 }
 0x2b3   : > { %2560 = vrot.lane.b32.xlu0 %v2514_v6, %s4702_s4  ;;  %v3154_v10 = vpop.permute.xlu1 %3153  ;;  %v2611_v6 = vld [vmem:[#allocation2 + $0x370] sm:$0xff] }
 0x2b4   : > { %3196 = vst.msk [vmem:[#allocation3 + $0x58] sm:$0xff] %vm2483_vm4, %v3154_v10 }
 0x2b5   : > { %v3152_v13 = vpop.permute.xlu0 %3151  ;;  %2631 = vrot.lane.b32.xlu1 %v2598_v8, %s4703_s25  ;;  %v2695_v8 = vld [vmem:[#allocation2 + $0x388] sm:$0xff] }
 0x2b6   : > { %3195 = vst.msk [vmem:[#allocation3 + $0x48] sm:$0xff] %vm2483_vm4, %v3152_v13 }
 0x2b7   : > { %2629 = vrot.lane.b32.xlu0 %v2597_v12, %s4703_s25  ;;  %v2446_v15 = vpop.permute.xlu1 %2445  ;;  %v2694_v12 = vld [vmem:[#allocation2 + $0x380] sm:$0xff] }
 0x2b8   : > { %2489 = vst.msk [vmem:[#allocation3 + $0x50] sm:$0xff] %vm2483_vm4, %v2446_v15 }
 0x2b9   : > { %v2444_v17 = vpop.permute.xlu0 %2443  ;;  %3341 = vrot.lane.b32.xlu1 %v3306_v14, %s4703_s25  ;;  %v3402_v14 = vld [vmem:[#allocation2 + $0x798] sm:$0xff] }
 0x2ba   : > { %2488 = vst.msk [vmem:[#allocation3 + $0x40] sm:$0xff] %vm2483_vm4, %v2444_v17 }
 0x2bb   : > { %3339 = vrot.lane.b32.xlu0 %v3305_v16, %s4703_s25  ;;  %v3158_v19 = vpop.permute.xlu1 %3157  ;;  %v3401_v16 = vld [vmem:[#allocation2 + $0x790] sm:$0xff] }
 0x2bc   : > { %3198 = vst.msk [vmem:[#allocation3 + $0x78] sm:$0xff] %vm2483_vm4, %v3158_v19 }
 0x2bd   : > { %v3156_v21 = vpop.permute.xlu0 %3155  ;;  %2635 = vrot.lane.b32.xlu1 %v2600_v18, %s4703_s25  ;;  %v2697_v18 = vld [vmem:[#allocation2 + $0x398] sm:$0xff] }
 0x2be   : > { %3197 = vst.msk [vmem:[#allocation3 + $0x68] sm:$0xff] %vm2483_vm4, %v3156_v21 }
 0x2bf   : > { %2633 = vrot.lane.b32.xlu0 %v2599_v20, %s4703_s25  ;;  %v2450_v23 = vpop.permute.xlu1 %2449  ;;  %v2696_v20 = vld [vmem:[#allocation2 + $0x390] sm:$0xff] }
 0x2c0   : > { %2491 = vst.msk [vmem:[#allocation3 + $0x70] sm:$0xff] %vm2483_vm4, %v2450_v23 }
 0x2c1   : > { %v2448_v25 = vpop.permute.xlu0 %2447  ;;  %3345 = vrot.lane.b32.xlu1 %v3308_v22, %s4703_s25  ;;  %v3404_v22 = vld [vmem:[#allocation2 + $0x7a8] sm:$0xff] }
 0x2c2   : > { %2490 = vst.msk [vmem:[#allocation3 + $0x60] sm:$0xff] %vm2483_vm4, %v2448_v25 }
 0x2c3   : > { %3343 = vrot.lane.b32.xlu0 %v3307_v24, %s4703_s25  ;;  %v3162_v27 = vpop.permute.xlu1 %3161  ;;  %v3403_v24 = vld [vmem:[#allocation2 + $0x7a0] sm:$0xff] }
 0x2c4   : > { %3200 = vst.msk [vmem:[#allocation3 + $0x98] sm:$0xff] %vm2483_vm4, %v3162_v27 }
 0x2c5   : > { %v3160_v29 = vpop.permute.xlu0 %3159  ;;  %2639 = vrot.lane.b32.xlu1 %v2602_v26, %s4703_s25  ;;  %v2699_v26 = vld [vmem:[#allocation2 + $0x3a8] sm:$0xff] }
 0x2c6   : > { %3199 = vst.msk [vmem:[#allocation3 + $0x88] sm:$0xff] %vm2483_vm4, %v3160_v29 }
 0x2c7   : > { %2637 = vrot.lane.b32.xlu0 %v2601_v28, %s4703_s25  ;;  %v2454_v9 = vpop.permute.xlu1 %2453  ;;  %v2698_v28 = vld [vmem:[#allocation2 + $0x3a0] sm:$0xff] }
 0x2c8   : > { %2493 = vst.msk [vmem:[#allocation3 + $0x90] sm:$0xff] %vm2483_vm4, %v2454_v9 }
 0x2c9   : > { %v2452_v11 = vpop.permute.xlu0 %2451  ;;  %3349 = vrot.lane.b32.xlu1 %v3310_v30, %s4703_s25  ;;  %v3406_v30 = vld [vmem:[#allocation2 + $0x7b8] sm:$0xff] }
 0x2ca   : > { %2492 = vst.msk [vmem:[#allocation3 + $0x80] sm:$0xff] %vm2483_vm4, %v2452_v11 }
 0x2cb   : > { %3347 = vrot.lane.b32.xlu0 %v3309_v61, %s4703_s25  ;;  %v3166_v32 = vpop.permute.xlu1 %3165  ;;  %v3405_v61 = vld [vmem:[#allocation2 + $0x7b0] sm:$0xff] }
 0x2cc   : > { %3202 = vst.msk [vmem:[#allocation3 + $0xb8] sm:$0xff] %vm2483_vm4, %v3166_v32 }
 0x2cd   : > { %v3164_v33 = vpop.permute.xlu0 %3163  ;;  %2643 = vrot.lane.b32.xlu1 %v2604_v31, %s4703_s25  ;;  %v2701_v31 = vld [vmem:[#allocation2 + $0x3b8] sm:$0xff] }
 0x2ce   : > { %3201 = vst.msk [vmem:[#allocation3 + $0xa8] sm:$0xff] %vm2483_vm4, %v3164_v33 }
 0x2cf   : > { %2641 = vrot.lane.b32.xlu0 %v2603_v0, %s4703_s25  ;;  %v2458_v35 = vpop.permute.xlu1 %2457  ;;  %v2700_v0 = vld [vmem:[#allocation2 + $0x3b0] sm:$0xff] }
 0x2d0   : > { %2495 = vst.msk [vmem:[#allocation3 + $0xb0] sm:$0xff] %vm2483_vm4, %v2458_v35 }
 0x2d1   : > { %v2456_v37 = vpop.permute.xlu0 %2455  ;;  %3353 = vrot.lane.b32.xlu1 %v3312_v34, %s4703_s25  ;;  %v3408_v34 = vld [vmem:[#allocation2 + $0x7c8] sm:$0xff] }
 0x2d2   : > { %2494 = vst.msk [vmem:[#allocation3 + $0xa0] sm:$0xff] %vm2483_vm4, %v2456_v37 }
 0x2d3   : > { %3351 = vrot.lane.b32.xlu0 %v3311_v36, %s4703_s25  ;;  %v3170_v39 = vpop.permute.xlu1 %3169  ;;  %v3407_v36 = vld [vmem:[#allocation2 + $0x7c0] sm:$0xff] }
 0x2d4   : > { %3204 = vst.msk [vmem:[#allocation3 + $0xd8] sm:$0xff] %vm2483_vm4, %v3170_v39 }
 0x2d5   : > { %v3168_v41 = vpop.permute.xlu0 %3167  ;;  %2647 = vrot.lane.b32.xlu1 %v2606_v38, %s4703_s25  ;;  %v2703_v38 = vld [vmem:[#allocation2 + $0x3c8] sm:$0xff] }
 0x2d6   : > { %3203 = vst.msk [vmem:[#allocation3 + $0xc8] sm:$0xff] %vm2483_vm4, %v3168_v41 }
 0x2d7   : > { %2645 = vrot.lane.b32.xlu0 %v2605_v40, %s4703_s25  ;;  %v2462_v43 = vpop.permute.xlu1 %2461  ;;  %v2702_v40 = vld [vmem:[#allocation2 + $0x3c0] sm:$0xff] }
 0x2d8   : > { %2497 = vst.msk [vmem:[#allocation3 + $0xd0] sm:$0xff] %vm2483_vm4, %v2462_v43 }
 0x2d9   : > { %v2460_v45 = vpop.permute.xlu0 %2459  ;;  %3357 = vrot.lane.b32.xlu1 %v3314_v42, %s4703_s25  ;;  %v3410_v42 = vld [vmem:[#allocation2 + $0x7d8] sm:$0xff] }
 0x2da   : > { %2496 = vst.msk [vmem:[#allocation3 + $0xc0] sm:$0xff] %vm2483_vm4, %v2460_v45 }
 0x2db   : > { %3355 = vrot.lane.b32.xlu0 %v3313_v44, %s4703_s25  ;;  %v3174_v47 = vpop.permute.xlu1 %3173  ;;  %v3409_v44 = vld [vmem:[#allocation2 + $0x7d0] sm:$0xff] }
 0x2dc   : > { %3206 = vst.msk [vmem:[#allocation3 + $0xf8] sm:$0xff] %vm2483_vm4, %v3174_v47 }
 0x2dd   : > { %v3172_v49 = vpop.permute.xlu0 %3171  ;;  %2651 = vrot.lane.b32.xlu1 %v2608_v46, %s4703_s25  ;;  %v2705_v46 = vld [vmem:[#allocation2 + $0x3d8] sm:$0xff] }
 0x2de   : > { %3205 = vst.msk [vmem:[#allocation3 + $0xe8] sm:$0xff] %vm2483_vm4, %v3172_v49 }
 0x2df   : > { %2649 = vrot.lane.b32.xlu0 %v2607_v48, %s4703_s25  ;;  %v3242_v51 = vpop.permute.xlu1 %3241  ;;  %v2704_v48 = vld [vmem:[#allocation2 + $0x3d0] sm:$0xff] }
 0x2e0   : > { %3288 = vst.msk [vmem:[#allocation3 + $0x18] sm:$0xff] %vm2580_vm5, %v3242_v51 }
 0x2e1   : > { %v3240_v53 = vpop.permute.xlu0 %3239  ;;  %3361 = vrot.lane.b32.xlu1 %v3316_v50, %s4703_s25  ;;  %v3412_v50 = vld [vmem:[#allocation2 + $0x7e8] sm:$0xff] }
 0x2e2   : > { %3287 = vst.msk [vmem:[#allocation3 + $0x8] sm:$0xff] %vm2580_vm5, %v3240_v53 }
 0x2e3   : > { %3359 = vrot.lane.b32.xlu0 %v3315_v52, %s4703_s25  ;;  %v2466_v55 = vpop.permute.xlu1 %2465  ;;  %v3411_v52 = vld [vmem:[#allocation2 + $0x7e0] sm:$0xff] }
 0x2e4   : > { %2499 = vst.msk [vmem:[#allocation3 + $0xf0] sm:$0xff] %vm2483_vm4, %v2466_v55 }
 0x2e5   : > { %v2464_v57 = vpop.permute.xlu0 %2463  ;;  %2655 = vrot.lane.b32.xlu1 %v2610_v54, %s4703_s25  ;;  %v2707_v54 = vld [vmem:[#allocation2 + $0x3e8] sm:$0xff] }
 0x2e6   : > { %2498 = vst.msk [vmem:[#allocation3 + $0xe0] sm:$0xff] %vm2483_vm4, %v2464_v57 }
 0x2e7   : > { %2653 = vrot.lane.b32.xlu0 %v2609_v56, %s4703_s25  ;;  %v2535_v59 = vpop.permute.xlu1 %2534  ;;  %v2706_v56 = vld [vmem:[#allocation2 + $0x3e0] sm:$0xff] }
 0x2e8   : > { %2582 = vst.msk [vmem:[#allocation3 + $0x10] sm:$0xff] %vm2580_vm5, %v2535_v59 }
 0x2e9   : > { %v2533_v62 = vpop.permute.xlu0 %2532  ;;  %3365 = vrot.lane.b32.xlu1 %v3318_v58, %s4703_s25  ;;  %v3414_v58 = vld [vmem:[#allocation2 + $0x7f8] sm:$0xff] }
 0x2ea   : > { %2581 = vst.msk [vmem:[#allocation3] sm:$0xff] %vm2580_vm5, %v2533_v62 }
 0x2eb   : > { %3363 = vrot.lane.b32.xlu0 %v3317_v60, %s4703_s25  ;;  %v3246_v1 = vpop.permute.xlu1 %3245  ;;  %v3413_v60 = vld [vmem:[#allocation2 + $0x7f0] sm:$0xff] }
 0x2ec   : > { %3290 = vst.msk [vmem:[#allocation3 + $0x38] sm:$0xff] %vm2580_vm5, %v3246_v1 }
 0x2ed   : > { %v3244_v3 = vpop.permute.xlu0 %3243  ;;  %3433 = vrot.lane.b32.xlu1 %v3400_v63, %s4704_s5  ;;  %v2709_v63 = vld [vmem:[#allocation2 + $0x3f8] sm:$0xff] }
 0x2ee   : > { %3289 = vst.msk [vmem:[#allocation3 + $0x28] sm:$0xff] %vm2580_vm5, %v3244_v3 }
 0x2ef   : > { %3431 = vrot.lane.b32.xlu0 %v3399_v2, %s4704_s5  ;;  %v2539_v5 = vpop.permute.xlu1 %2538  ;;  %v2708_v2 = vld [vmem:[#allocation2 + $0x3f0] sm:$0xff] }
 0x2f0   : > { %2584 = vst.msk [vmem:[#allocation3 + $0x30] sm:$0xff] %vm2580_vm5, %v2539_v5 }
 0x2f1   : > { %v2537_v7 = vpop.permute.xlu0 %2536  ;;  %2659 = vrot.lane.b32.xlu1 %v2612_v4, %s4703_s25  ;;  %v4705_v4 = vmov 0.0  }
 0x2f2   : > { %2583 = vst.msk [vmem:[#allocation3 + $0x20] sm:$0xff] %vm2580_vm5, %v2537_v7  ;;  %3593 = vmatprep.mubr.f32.mxu1 %v4705_v4 }
 0x2f3   : > { %2657 = vrot.lane.b32.xlu0 %v2611_v6, %s4703_s25  ;;  %v3250_v10 = vpop.permute.xlu1 %3249 }
 0x2f4   : > { %3292 = vst.msk [vmem:[#allocation3 + $0x58] sm:$0xff] %vm2580_vm5, %v3250_v10 }
 0x2f5   : > { %v3248_v13 = vpop.permute.xlu0 %3247  ;;  %2728 = vrot.lane.b32.xlu1 %v2695_v8, %s4704_s5 }
 0x2f6   : > { %3291 = vst.msk [vmem:[#allocation3 + $0x48] sm:$0xff] %vm2580_vm5, %v3248_v13 }
 0x2f7   : > { %2726 = vrot.lane.b32.xlu0 %v2694_v12, %s4704_s5  ;;  %v2543_v15 = vpop.permute.xlu1 %2542 }
 0x2f8   : > { %2586 = vst.msk [vmem:[#allocation3 + $0x50] sm:$0xff] %vm2580_vm5, %v2543_v15 }
 0x2f9   : > { %v2541_v17 = vpop.permute.xlu0 %2540  ;;  %3437 = vrot.lane.b32.xlu1 %v3402_v14, %s4704_s5 }
 0x2fa   : > { %2585 = vst.msk [vmem:[#allocation3 + $0x40] sm:$0xff] %vm2580_vm5, %v2541_v17 }
 0x2fb   : > { %3435 = vrot.lane.b32.xlu0 %v3401_v16, %s4704_s5  ;;  %v3254_v19 = vpop.permute.xlu1 %3253 }
 0x2fc   : > { %3294 = vst.msk [vmem:[#allocation3 + $0x78] sm:$0xff] %vm2580_vm5, %v3254_v19 }
 0x2fd   : > { %v3252_v21 = vpop.permute.xlu0 %3251  ;;  %2732 = vrot.lane.b32.xlu1 %v2697_v18, %s4704_s5 }
 0x2fe   : > { %3293 = vst.msk [vmem:[#allocation3 + $0x68] sm:$0xff] %vm2580_vm5, %v3252_v21 }
 0x2ff   : > { %2730 = vrot.lane.b32.xlu0 %v2696_v20, %s4704_s5  ;;  %v2547_v23 = vpop.permute.xlu1 %2546 }
 0x300   : > { %2588 = vst.msk [vmem:[#allocation3 + $0x70] sm:$0xff] %vm2580_vm5, %v2547_v23 }
 0x301   : > { %v2545_v25 = vpop.permute.xlu0 %2544  ;;  %3441 = vrot.lane.b32.xlu1 %v3404_v22, %s4704_s5 }
 0x302   : > { %2587 = vst.msk [vmem:[#allocation3 + $0x60] sm:$0xff] %vm2580_vm5, %v2545_v25 }
 0x303   : > { %3439 = vrot.lane.b32.xlu0 %v3403_v24, %s4704_s5  ;;  %v3258_v27 = vpop.permute.xlu1 %3257 }
 0x304   : > { %3296 = vst.msk [vmem:[#allocation3 + $0x98] sm:$0xff] %vm2580_vm5, %v3258_v27 }
 0x305   : > { %v3256_v29 = vpop.permute.xlu0 %3255  ;;  %2736 = vrot.lane.b32.xlu1 %v2699_v26, %s4704_s5 }
 0x306   : > { %3295 = vst.msk [vmem:[#allocation3 + $0x88] sm:$0xff] %vm2580_vm5, %v3256_v29 }
 0x307   : > { %2734 = vrot.lane.b32.xlu0 %v2698_v28, %s4704_s5  ;;  %v2551_v9 = vpop.permute.xlu1 %2550 }
 0x308   : > { %2590 = vst.msk [vmem:[#allocation3 + $0x90] sm:$0xff] %vm2580_vm5, %v2551_v9 }
 0x309   : > { %v2549_v11 = vpop.permute.xlu0 %2548  ;;  %3445 = vrot.lane.b32.xlu1 %v3406_v30, %s4704_s5 }
 0x30a   : > { %2589 = vst.msk [vmem:[#allocation3 + $0x80] sm:$0xff] %vm2580_vm5, %v2549_v11 }
 0x30b   : > { %3443 = vrot.lane.b32.xlu0 %v3405_v61, %s4704_s5  ;;  %v3262_v32 = vpop.permute.xlu1 %3261 }
 0x30c   : > { %3298 = vst.msk [vmem:[#allocation3 + $0xb8] sm:$0xff] %vm2580_vm5, %v3262_v32 }
 0x30d   : > { %v3260_v33 = vpop.permute.xlu0 %3259  ;;  %2740 = vrot.lane.b32.xlu1 %v2701_v31, %s4704_s5 }
 0x30e   : > { %3297 = vst.msk [vmem:[#allocation3 + $0xa8] sm:$0xff] %vm2580_vm5, %v3260_v33 }
 0x30f   : > { %2738 = vrot.lane.b32.xlu0 %v2700_v0, %s4704_s5  ;;  %v2555_v35 = vpop.permute.xlu1 %2554 }
 0x310   : > { %2592 = vst.msk [vmem:[#allocation3 + $0xb0] sm:$0xff] %vm2580_vm5, %v2555_v35 }
 0x311   : > { %v2553_v37 = vpop.permute.xlu0 %2552  ;;  %3449 = vrot.lane.b32.xlu1 %v3408_v34, %s4704_s5 }
 0x312   : > { %2591 = vst.msk [vmem:[#allocation3 + $0xa0] sm:$0xff] %vm2580_vm5, %v2553_v37 }
 0x313   : > { %3447 = vrot.lane.b32.xlu0 %v3407_v36, %s4704_s5  ;;  %v3266_v39 = vpop.permute.xlu1 %3265 }
 0x314   : > { %3300 = vst.msk [vmem:[#allocation3 + $0xd8] sm:$0xff] %vm2580_vm5, %v3266_v39 }
 0x315   : > { %v3264_v41 = vpop.permute.xlu0 %3263  ;;  %2744 = vrot.lane.b32.xlu1 %v2703_v38, %s4704_s5 }
 0x316   : > { %3299 = vst.msk [vmem:[#allocation3 + $0xc8] sm:$0xff] %vm2580_vm5, %v3264_v41 }
 0x317   : > { %2742 = vrot.lane.b32.xlu0 %v2702_v40, %s4704_s5  ;;  %v2559_v43 = vpop.permute.xlu1 %2558 }
 0x318   : > { %2594 = vst.msk [vmem:[#allocation3 + $0xd0] sm:$0xff] %vm2580_vm5, %v2559_v43 }
 0x319   : > { %v2557_v45 = vpop.permute.xlu0 %2556  ;;  %3453 = vrot.lane.b32.xlu1 %v3410_v42, %s4704_s5 }
 0x31a   : > { %2593 = vst.msk [vmem:[#allocation3 + $0xc0] sm:$0xff] %vm2580_vm5, %v2557_v45 }
 0x31b   : > { %3451 = vrot.lane.b32.xlu0 %v3409_v44, %s4704_s5  ;;  %v3270_v47 = vpop.permute.xlu1 %3269 }
 0x31c   : > { %3302 = vst.msk [vmem:[#allocation3 + $0xf8] sm:$0xff] %vm2580_vm5, %v3270_v47 }
 0x31d   : > { %v3268_v49 = vpop.permute.xlu0 %3267  ;;  %2748 = vrot.lane.b32.xlu1 %v2705_v46, %s4704_s5 }
 0x31e   : > { %3301 = vst.msk [vmem:[#allocation3 + $0xe8] sm:$0xff] %vm2580_vm5, %v3268_v49 }
 0x31f   : > { %2746 = vrot.lane.b32.xlu0 %v2704_v48, %s4704_s5  ;;  %v3338_v51 = vpop.permute.xlu1 %3337 }
 0x320   : > { %3384 = vst.msk [vmem:[#allocation3 + $0x18] sm:$0xff] %vm2677_vm6, %v3338_v51 }
 0x321   : > { %v3336_v53 = vpop.permute.xlu0 %3335  ;;  %3457 = vrot.lane.b32.xlu1 %v3412_v50, %s4704_s5 }
 0x322   : > { %3383 = vst.msk [vmem:[#allocation3 + $0x8] sm:$0xff] %vm2677_vm6, %v3336_v53 }
 0x323   : > { %3455 = vrot.lane.b32.xlu0 %v3411_v52, %s4704_s5  ;;  %v2563_v55 = vpop.permute.xlu1 %2562 }
 0x324   : > { %2596 = vst.msk [vmem:[#allocation3 + $0xf0] sm:$0xff] %vm2580_vm5, %v2563_v55 }
 0x325   : > { %v2561_v57 = vpop.permute.xlu0 %2560  ;;  %2752 = vrot.lane.b32.xlu1 %v2707_v54, %s4704_s5 }
 0x326   : > { %2595 = vst.msk [vmem:[#allocation3 + $0xe0] sm:$0xff] %vm2580_vm5, %v2561_v57 }
 0x327   : > { %2750 = vrot.lane.b32.xlu0 %v2706_v56, %s4704_s5  ;;  %v2632_v59 = vpop.permute.xlu1 %2631 }
 0x328   : > { %2679 = vst.msk [vmem:[#allocation3 + $0x10] sm:$0xff] %vm2677_vm6, %v2632_v59 }
 0x329   : > { %v2630_v62 = vpop.permute.xlu0 %2629  ;;  %3461 = vrot.lane.b32.xlu1 %v3414_v58, %s4704_s5 }
 0x32a   : > { %2678 = vst.msk [vmem:[#allocation3] sm:$0xff] %vm2677_vm6, %v2630_v62 }
 0x32b   : > { %3459 = vrot.lane.b32.xlu0 %v3413_v60, %s4704_s5  ;;  %v3342_v1 = vpop.permute.xlu1 %3341 }
 0x32c   : > { %3386 = vst.msk [vmem:[#allocation3 + $0x38] sm:$0xff] %vm2677_vm6, %v3342_v1 }
 0x32d   : > { %v3340_v3 = vpop.permute.xlu0 %3339  ;;  %2756 = vrot.lane.b32.xlu1 %v2709_v63, %s4704_s5 }
 0x32e   : > { %3385 = vst.msk [vmem:[#allocation3 + $0x28] sm:$0xff] %vm2677_vm6, %v3340_v3 }
 0x32f   : > { %2754 = vrot.lane.b32.xlu0 %v2708_v2, %s4704_s5  ;;  %v2636_v5 = vpop.permute.xlu1 %2635 }
 0x330   : > { %2681 = vst.msk [vmem:[#allocation3 + $0x30] sm:$0xff] %vm2677_vm6, %v2636_v5 }
 0x331   : > { %v2634_v6 = vpop.permute.xlu0 %2633 }
 0x332   : > { %2680 = vst.msk [vmem:[#allocation3 + $0x20] sm:$0xff] %vm2677_vm6, %v2634_v6 }
 0x333   : > { %v3346_v7 = vpop.permute.xlu1 %3345 }
 0x334   : > { %3388 = vst.msk [vmem:[#allocation3 + $0x58] sm:$0xff] %vm2677_vm6, %v3346_v7 }
 0x335   : > { %v3344_v8 = vpop.permute.xlu0 %3343 }
 0x336   : > { %3387 = vst.msk [vmem:[#allocation3 + $0x48] sm:$0xff] %vm2677_vm6, %v3344_v8 }
 0x337   : > { %v2640_v10 = vpop.permute.xlu1 %2639 }
 0x338   : > { %2683 = vst.msk [vmem:[#allocation3 + $0x50] sm:$0xff] %vm2677_vm6, %v2640_v10 }
 0x339   : > { %v2638_v12 = vpop.permute.xlu0 %2637 }
 0x33a   : > { %2682 = vst.msk [vmem:[#allocation3 + $0x40] sm:$0xff] %vm2677_vm6, %v2638_v12 }
 0x33b   : > { %v3350_v13 = vpop.permute.xlu1 %3349 }
 0x33c   : > { %3390 = vst.msk [vmem:[#allocation3 + $0x78] sm:$0xff] %vm2677_vm6, %v3350_v13 }
 0x33d   : > { %v3348_v14 = vpop.permute.xlu0 %3347 }
 0x33e   : > { %3389 = vst.msk [vmem:[#allocation3 + $0x68] sm:$0xff] %vm2677_vm6, %v3348_v14 }
 0x33f   : > { %v2644_v15 = vpop.permute.xlu1 %2643 }
 0x340   : > { %2685 = vst.msk [vmem:[#allocation3 + $0x70] sm:$0xff] %vm2677_vm6, %v2644_v15 }
 0x341   : > { %v2642_v16 = vpop.permute.xlu0 %2641 }
 0x342   : > { %2684 = vst.msk [vmem:[#allocation3 + $0x60] sm:$0xff] %vm2677_vm6, %v2642_v16 }
 0x343   : > { %v3354_v17 = vpop.permute.xlu1 %3353 }
 0x344   : > { %3392 = vst.msk [vmem:[#allocation3 + $0x98] sm:$0xff] %vm2677_vm6, %v3354_v17 }
 0x345   : > { %v3352_v18 = vpop.permute.xlu0 %3351 }
 0x346   : > { %3391 = vst.msk [vmem:[#allocation3 + $0x88] sm:$0xff] %vm2677_vm6, %v3352_v18 }
 0x347   : > { %v2648_v19 = vpop.permute.xlu1 %2647 }
 0x348   : > { %2687 = vst.msk [vmem:[#allocation3 + $0x90] sm:$0xff] %vm2677_vm6, %v2648_v19 }
 0x349   : > { %v2646_v20 = vpop.permute.xlu0 %2645 }
 0x34a   : > { %2686 = vst.msk [vmem:[#allocation3 + $0x80] sm:$0xff] %vm2677_vm6, %v2646_v20 }
 0x34b   : > { %v3358_v21 = vpop.permute.xlu1 %3357 }
 0x34c   : > { %3394 = vst.msk [vmem:[#allocation3 + $0xb8] sm:$0xff] %vm2677_vm6, %v3358_v21 }
 0x34d   : > { %v3356_v22 = vpop.permute.xlu0 %3355 }
 0x34e   : > { %3393 = vst.msk [vmem:[#allocation3 + $0xa8] sm:$0xff] %vm2677_vm6, %v3356_v22 }
 0x34f   : > { %v2652_v23 = vpop.permute.xlu1 %2651 }
 0x350   : > { %2689 = vst.msk [vmem:[#allocation3 + $0xb0] sm:$0xff] %vm2677_vm6, %v2652_v23 }
 0x351   : > { %v2650_v24 = vpop.permute.xlu0 %2649 }
 0x352   : > { %2688 = vst.msk [vmem:[#allocation3 + $0xa0] sm:$0xff] %vm2677_vm6, %v2650_v24 }
 0x353   : > { %v3362_v25 = vpop.permute.xlu1 %3361 }
 0x354   : > { %3396 = vst.msk [vmem:[#allocation3 + $0xd8] sm:$0xff] %vm2677_vm6, %v3362_v25 }
 0x355   : > { %v3360_v26 = vpop.permute.xlu0 %3359 }
 0x356   : > { %3395 = vst.msk [vmem:[#allocation3 + $0xc8] sm:$0xff] %vm2677_vm6, %v3360_v26 }
 0x357   : > { %v2656_v27 = vpop.permute.xlu1 %2655 }
 0x358   : > { %2691 = vst.msk [vmem:[#allocation3 + $0xd0] sm:$0xff] %vm2677_vm6, %v2656_v27 }
 0x359   : > { %v2654_v28 = vpop.permute.xlu0 %2653 }
 0x35a   : > { %2690 = vst.msk [vmem:[#allocation3 + $0xc0] sm:$0xff] %vm2677_vm6, %v2654_v28 }
 0x35b   : > { %v3366_v29 = vpop.permute.xlu1 %3365 }
 0x35c   : > { %3398 = vst.msk [vmem:[#allocation3 + $0xf8] sm:$0xff] %vm2677_vm6, %v3366_v29 }
 0x35d   : > { %v3364_v30 = vpop.permute.xlu0 %3363 }
 0x35e   : > { %3397 = vst.msk [vmem:[#allocation3 + $0xe8] sm:$0xff] %vm2677_vm6, %v3364_v30 }
 0x35f   : > { %v3434_v9 = vpop.permute.xlu1 %3433 }
 0x360   : > { %3480 = vst.msk [vmem:[#allocation3 + $0x18] sm:$0xff] %vm2774_vm7, %v3434_v9 }
 0x361   : > { %v3432_v61 = vpop.permute.xlu0 %3431 }
 0x362   : > { %3479 = vst.msk [vmem:[#allocation3 + $0x8] sm:$0xff] %vm2774_vm7, %v3432_v61 }
 0x363   : > { %v2660_v11 = vpop.permute.xlu1 %2659 }
 0x364   : > { %2693 = vst.msk [vmem:[#allocation3 + $0xf0] sm:$0xff] %vm2677_vm6, %v2660_v11 }
 0x365   : > { %v2658_v31 = vpop.permute.xlu0 %2657 }
 0x366   : > { %2692 = vst.msk [vmem:[#allocation3 + $0xe0] sm:$0xff] %vm2677_vm6, %v2658_v31 }
 0x367   : > { %v2729_v32 = vpop.permute.xlu1 %2728  ;;  %v3500_v0 = vld [vmem:[#allocation3 + $0x18] sm:$0xff] }
 0x368   : > { %2776 = vst.msk [vmem:[#allocation3 + $0x10] sm:$0xff] %vm2774_vm7, %v2729_v32 }
 0x369   : > { %v2727_v33 = vpop.permute.xlu0 %2726  ;;  %v3498_v34 = vld [vmem:[#allocation3 + $0x8] sm:$0xff] }
 0x36a   : > { %2775 = vst.msk [vmem:[#allocation3] sm:$0xff] %vm2774_vm7, %v2727_v33  ;;  %v4447_v35 = vpack.c.bf16 %v3500_v0, %v3498_v34 }
 0x36b   : > { %v3438_v36 = vpop.permute.xlu1 %3437 }
 0x36c   : > { %4448 = vmatprep.subr.bf16.mxu1 %v4447_v35  ;;  %3482 = vst.msk [vmem:[#allocation3 + $0x38] sm:$0xff] %vm2774_vm7, %v3438_v36 }
 0x36d   : > { %v3436_v37 = vpop.permute.xlu0 %3435 }
 0x36e   : > { %3481 = vst.msk [vmem:[#allocation3 + $0x28] sm:$0xff] %vm2774_vm7, %v3436_v37 }
 0x36f   : > { %v3499_v38 = vld [vmem:[#allocation3 + $0x10] sm:$0xff]  ;;  %v2733_v39 = vpop.permute.xlu1 %2732 }
 0x370   : > { %2778 = vst.msk [vmem:[#allocation3 + $0x30] sm:$0xff] %vm2774_vm7, %v2733_v39 }
 0x371   : > { %v3497_v40 = vld [vmem:[#allocation3] sm:$0xff]  ;;  %v2731_v41 = vpop.permute.xlu0 %2730 }
 0x372   : > { %v4449_v42 = vpack.c.bf16 %v3499_v38, %v3497_v40  ;;  %2777 = vst.msk [vmem:[#allocation3 + $0x20] sm:$0xff] %vm2774_vm7, %v2731_v41 }
 0x373   : > { %v3504_v43 = vld [vmem:[#allocation3 + $0x38] sm:$0xff]  ;;  %v3442_v44 = vpop.permute.xlu1 %3441 }
 0x374   : > { %4450 = vmatpush1.bf16.msra.mxu1 %v4449_v42  ;;  %3484 = vst.msk [vmem:[#allocation3 + $0x58] sm:$0xff] %vm2774_vm7, %v3442_v44 }
 0x375   : > { %v3502_v45 = vld [vmem:[#allocation3 + $0x28] sm:$0xff]  ;;  %v3440_v46 = vpop.permute.xlu0 %3439 }
 0x376   : > { %v4451_v47 = vpack.c.bf16 %v3504_v43, %v3502_v45  ;;  %3483 = vst.msk [vmem:[#allocation3 + $0x48] sm:$0xff] %vm2774_vm7, %v3440_v46  ;;  %v3495_v46 = vld [vmem:[#allocation4] sm:$0xff] }
 0x377   : > { %v3503_v48 = vld [vmem:[#allocation3 + $0x30] sm:$0xff]  ;;  %v2737_v49 = vpop.permute.xlu1 %2736 }
 0x378   : > { %4452 = vmatprep.subr.bf16.mxu1 %v4451_v47  ;;  %2780 = vst.msk [vmem:[#allocation3 + $0x50] sm:$0xff] %vm2774_vm7, %v2737_v49  ;;  %v3496_v47 = vld [vmem:[#allocation4 + $0x8] sm:$0xff] }
 0x379   : > { %v3501_v50 = vld [vmem:[#allocation3 + $0x20] sm:$0xff]  ;;  %v2735_v51 = vpop.permute.xlu0 %2734 }
 0x37a   : > { %v4453_v52 = vpack.c.bf16 %v3503_v48, %v3501_v50  ;;  %2779 = vst.msk [vmem:[#allocation3 + $0x40] sm:$0xff] %vm2774_vm7, %v2735_v51 }
 0x37b   : > { %v3446_v53 = vpop.permute.xlu1 %3445  ;;  %v3508_v54 = vld [vmem:[#allocation3 + $0x58] sm:$0xff] }
 0x37c   : > { %4454 = vmatpush1.bf16.msra.mxu1 %v4453_v52  ;;  %3486 = vst.msk [vmem:[#allocation3 + $0x78] sm:$0xff] %vm2774_vm7, %v3446_v53 }
 0x37d   : > { %v3444_v55 = vpop.permute.xlu0 %3443  ;;  %v3506_v56 = vld [vmem:[#allocation3 + $0x48] sm:$0xff] }
 0x37e   : > { %3485 = vst.msk [vmem:[#allocation3 + $0x68] sm:$0xff] %vm2774_vm7, %v3444_v55  ;;  %v4455_v57 = vpack.c.bf16 %v3508_v54, %v3506_v56 }
 0x37f   : > { %v2741_v58 = vpop.permute.xlu1 %2740  ;;  %v3507_v59 = vld [vmem:[#allocation3 + $0x50] sm:$0xff] }
 0x380   : > { %4456 = vmatprep.subr.bf16.mxu1 %v4455_v57  ;;  %2782 = vst.msk [vmem:[#allocation3 + $0x70] sm:$0xff] %vm2774_vm7, %v2741_v58 }
 0x381   : > { %v2739_v60 = vpop.permute.xlu0 %2738  ;;  %v3505_v62 = vld [vmem:[#allocation3 + $0x40] sm:$0xff] }
 0x382   : > { %2781 = vst.msk [vmem:[#allocation3 + $0x60] sm:$0xff] %vm2774_vm7, %v2739_v60  ;;  %v4457_v63 = vpack.c.bf16 %v3507_v59, %v3505_v62 }
 0x383   : > { %v3450_v1 = vpop.permute.xlu1 %3449  ;;  %v3512_v2 = vld [vmem:[#allocation3 + $0x78] sm:$0xff] }
 0x384   : > { %4458 = vmatpush1.bf16.msra.mxu1 %v4457_v63  ;;  %3488 = vst.msk [vmem:[#allocation3 + $0x98] sm:$0xff] %vm2774_vm7, %v3450_v1 }
 0x385   : > { %v3448_v3 = vpop.permute.xlu0 %3447  ;;  %v3510_v5 = vld [vmem:[#allocation3 + $0x68] sm:$0xff] }
 0x386   : > { %3487 = vst.msk [vmem:[#allocation3 + $0x88] sm:$0xff] %vm2774_vm7, %v3448_v3  ;;  %v4459_v6 = vpack.c.bf16 %v3512_v2, %v3510_v5 }
 0x387   : > { %v2745_v7 = vpop.permute.xlu1 %2744  ;;  %v3511_v8 = vld [vmem:[#allocation3 + $0x70] sm:$0xff] }
 0x388   : > { %4460 = vmatprep.subr.bf16.mxu1 %v4459_v6  ;;  %2784 = vst.msk [vmem:[#allocation3 + $0x90] sm:$0xff] %vm2774_vm7, %v2745_v7 }
 0x389   : > { %v2743_v10 = vpop.permute.xlu0 %2742  ;;  %v3509_v12 = vld [vmem:[#allocation3 + $0x60] sm:$0xff] }
 0x38a   : > { %2783 = vst.msk [vmem:[#allocation3 + $0x80] sm:$0xff] %vm2774_vm7, %v2743_v10  ;;  %v4461_v13 = vpack.c.bf16 %v3511_v8, %v3509_v12 }
 0x38b   : > { %v3454_v14 = vpop.permute.xlu1 %3453  ;;  %v3516_v15 = vld [vmem:[#allocation3 + $0x98] sm:$0xff] }
 0x38c   : > { %4462 = vmatpush1.bf16.msra.mxu1 %v4461_v13  ;;  %3490 = vst.msk [vmem:[#allocation3 + $0xb8] sm:$0xff] %vm2774_vm7, %v3454_v14 }
 0x38d   : > { %v3452_v16 = vpop.permute.xlu0 %3451  ;;  %v3514_v17 = vld [vmem:[#allocation3 + $0x88] sm:$0xff] }
 0x38e   : > { %3489 = vst.msk [vmem:[#allocation3 + $0xa8] sm:$0xff] %vm2774_vm7, %v3452_v16  ;;  %v4463_v18 = vpack.c.bf16 %v3516_v15, %v3514_v17 }
 0x38f   : > { %v2749_v19 = vpop.permute.xlu1 %2748  ;;  %v3515_v20 = vld [vmem:[#allocation3 + $0x90] sm:$0xff] }
 0x390   : > { %4464 = vmatprep.subr.bf16.mxu1 %v4463_v18  ;;  %2786 = vst.msk [vmem:[#allocation3 + $0xb0] sm:$0xff] %vm2774_vm7, %v2749_v19 }
 0x391   : > { %v2747_v21 = vpop.permute.xlu0 %2746  ;;  %v3513_v22 = vld [vmem:[#allocation3 + $0x80] sm:$0xff] }
 0x392   : > { %2785 = vst.msk [vmem:[#allocation3 + $0xa0] sm:$0xff] %vm2774_vm7, %v2747_v21  ;;  %v4465_v23 = vpack.c.bf16 %v3515_v20, %v3513_v22 }
 0x393   : > { %v3458_v24 = vpop.permute.xlu1 %3457  ;;  %v3520_v25 = vld [vmem:[#allocation3 + $0xb8] sm:$0xff] }
 0x394   : > { %4466 = vmatpush1.bf16.msra.mxu1 %v4465_v23  ;;  %3492 = vst.msk [vmem:[#allocation3 + $0xd8] sm:$0xff] %vm2774_vm7, %v3458_v24 }
 0x395   : > { %v3456_v26 = vpop.permute.xlu0 %3455  ;;  %v3518_v27 = vld [vmem:[#allocation3 + $0xa8] sm:$0xff] }
 0x396   : > { %3491 = vst.msk [vmem:[#allocation3 + $0xc8] sm:$0xff] %vm2774_vm7, %v3456_v26  ;;  %v4467_v28 = vpack.c.bf16 %v3520_v25, %v3518_v27 }
 0x397   : > { %v2753_v29 = vpop.permute.xlu1 %2752  ;;  %v3519_v30 = vld [vmem:[#allocation3 + $0xb0] sm:$0xff] }
 0x398   : > { %4468 = vmatprep.subr.bf16.mxu1 %v4467_v28  ;;  %2788 = vst.msk [vmem:[#allocation3 + $0xd0] sm:$0xff] %vm2774_vm7, %v2753_v29 }
 0x399   : > { %v2751_v9 = vpop.permute.xlu0 %2750  ;;  %v3517_v61 = vld [vmem:[#allocation3 + $0xa0] sm:$0xff] }
 0x39a   : > { %2787 = vst.msk [vmem:[#allocation3 + $0xc0] sm:$0xff] %vm2774_vm7, %v2751_v9  ;;  %v4469_v11 = vpack.c.bf16 %v3519_v30, %v3517_v61 }
 0x39b   : > { %v3462_v31 = vpop.permute.xlu1 %3461  ;;  %v3524_v32 = vld [vmem:[#allocation3 + $0xd8] sm:$0xff] }
 0x39c   : > { %4470 = vmatpush1.bf16.msra.mxu1 %v4469_v11  ;;  %3494 = vst.msk [vmem:[#allocation3 + $0xf8] sm:$0xff] %vm2774_vm7, %v3462_v31 }
 0x39d   : > { %v3460_v0 = vpop.permute.xlu0 %3459  ;;  %v3522_v33 = vld [vmem:[#allocation3 + $0xc8] sm:$0xff] }
 0x39e   : > { %3493 = vst.msk [vmem:[#allocation3 + $0xe8] sm:$0xff] %vm2774_vm7, %v3460_v0  ;;  %v4471_v34 = vpack.c.bf16 %v3524_v32, %v3522_v33 }
 0x39f   : > { %v2757_v35 = vpop.permute.xlu1 %2756  ;;  %v3523_v36 = vld [vmem:[#allocation3 + $0xd0] sm:$0xff] }
 0x3a0   : > { %4472 = vmatprep.subr.bf16.mxu1 %v4471_v34  ;;  %2790 = vst.msk [vmem:[#allocation3 + $0xf0] sm:$0xff] %vm2774_vm7, %v2757_v35 }
 0x3a1   : > { %v2755_v37 = vpop.permute.xlu0 %2754  ;;  %v3521_v38 = vld [vmem:[#allocation3 + $0xc0] sm:$0xff] }
 0x3a2   : > { %2789 = vst.msk [vmem:[#allocation3 + $0xe0] sm:$0xff] %vm2774_vm7, %v2755_v37  ;;  %v4473_v39 = vpack.c.bf16 %v3523_v36, %v3521_v38 }
 0x3a3   : > { %v3528_v40 = vld [vmem:[#allocation3 + $0xf8] sm:$0xff] }
 0x3a4   : > { %4474 = vmatpush1.bf16.msra.mxu1 %v4473_v39 }
 0x3a5   : > { %v3526_v41 = vld [vmem:[#allocation3 + $0xe8] sm:$0xff] }
 0x3a6   : > { %v4475_v42 = vpack.c.bf16 %v3528_v40, %v3526_v41 }
 0x3a7   : > { %v3527_v43 = vld [vmem:[#allocation3 + $0xf0] sm:$0xff] }
 0x3a8   : > { %4476 = vmatprep.subr.bf16.mxu1 %v4475_v42 }
 0x3a9   : > { %v3525_v44 = vld [vmem:[#allocation3 + $0xe0] sm:$0xff] }
 0x3aa   : > { %v4477_v45 = vpack.c.bf16 %v3527_v43, %v3525_v44 }
 0x3ac   : > { %4478 = vmatpush1.bf16.msra.mxu1 %v4477_v45 }
 0x3af   : > { %3594 = vmatmul.mubr.f32.vlgmr.msra.gmra.mrb[126].mxu1 %v3495_v46 }
 0x3b0   : > { %3599 = vmatprep.mubr.f32.mxu1 %v4705_v4 }
 0x3b3   : > { %3600 = vmatmul.mubr.f32.gmra.mrb[128].mxu1 %v3496_v47 }
 0x482   : > { %v3595_v48 = vpop.f32.mrb[126].mxu1 }
 0x483   : > { %3606 = vst [vmem:[%s203_s27] sm:$0xff] %v3595_v48  ;;  %v3597_v49 = vpop.f32.mrb[127].mxu1 }
 0x484   : > { %3607 = vst [vmem:[%s203_s27 + $0x8] sm:$0xff] %v3597_v49 }
 0x486   : > { %v3601_v4 = vpop.f32.mrb[128].mxu1 }
 0x487   : > { %3608 = vst [vmem:[%s203_s27 + $0x10] sm:$0xff] %v3601_v4  ;;  %v3603_v50 = vpop.f32.mrb[129].mxu1 }
 0x488   : > { %3609 = vst [vmem:[%s203_s27 + $0x18] sm:$0xff] %v3603_v50 }
 0x489   : > { %4635 = shalt.err (!%p4632_p7)
}
 0x48a   : > { %s4636_s10 = scalar_lea.hbm %s5949_s30, 512  ;;  %s4640_s25 = scalar_lea.hbm %s5997_s3, 1024 }
 0x48b   : > { %p4637_p9 = scmp.ne.s32.totalorder %s5949_s30, %s4636_s10  ;;  %p4641_p5 = scmp.lt.u32.totalorder %s5949_s30, %s5997_s3 }
 0x48c   : > { %p4642_p2 = scmp.lt.u32.totalorder %s4640_s25, %s4636_s10  ;;  %p4644_p4 = scmp.lt.u32.totalorder %s4636_s10, %s5949_s30 }
 0x48d   : > { %p4638_p1 = pnand %p4637_p9, %p4823_p12 }
 0x48e   : > { %p4643_p11 = por %p4642_p2, %p4641_p5 }
 0x48f   : > { %p4639_p0 = pneg %p4638_p1 }
 0x490   : > { %p4645_p6 = por %p4644_p4, %p4643_p11 }
 0x492   : > { %p4646_p8 = pnand %p4645_p6, %p4639_p0 }
 0x494   : > { %4649 = shalt.err (!%p4646_p8)
}
 0x495   : > { %s4707_s27 = smov 256   ;;  %s4708_s28 = smov 512  }
 0x496   : > { %4501 = dma.vmem_to_hbm [thread:$0]  (%p4823_p12), %s5944_s18, 512, %s5949_s30, %s3611_s22, %s4707_s27, %s4708_s28, %s4698_s20  }
 0x497 PF: > { %s3639_s23 = sand.u32 1, %s4680_s12   ;;  %p6012_p10 = scmp.ne.s32.totalorder %s6002_s19, 0 }
 0x498   : > { %p6013_p13 = scmp.ge.s32.totalorder %s4692_s15, 2  ;;  %s3640_s29 = scalar_lea.sflag [#allocation6], %s3639_s23 }
 0x49a   : > { %p4512_p3 = pnand %p6013_p13, %p6012_p10 }
 0x49c   : > { %4675 = dma.done.wait (!%p4512_p3), %s3640_s29, 512  }
 0x49d   : > { %4677 = vsyncadd (!%p4512_p3), %s3640_s29, 4294966784  ;;  %p17_p7 = scmp.ge.s32.totalorder %s4785_s24, 4   ;;  %s6014_s12 = smov %s4684_s13 }
 0x49e   : > { %s6015_s13 = smov %s4688_s14  ;;  %s6016_s14 = smov %s4819_s17 }
 0x49f   : > { %s6017_s15 = smov %s4785_s24  ;;  %19 = sbr.rel (!%p17_p7) target bundleno = 6 (0x6), region = 82 }
 0x4a6   :  { %3645 = vsyncpa [#allocation5], 1 }
 0x4a7   :  { %3647 = vsyncpa [#allocation5 + $0x1], 1 }
 0x4a8   :  { %3648 = vsyncpa [#allocation8], 1 }
 0x4a9   :  { %3650 = vsyncpa [#allocation8 + $0x1], 1 }
 0x4aa   :  { %3651 = vsyncpa [#allocation6], 1 }
 0x4ab   :  { %3653 = vsyncpa [#allocation6 + $0x1], 1 }

</bundles_post_ra>
